<compile_context>
chip_gen: v5e
topology: v5e:2x2
jax: 0.10.0
libtpu: 0.0.40
codegen_flags: <defaults>
</compile_context>

<pallas_src>
import jax
import jax.numpy as jnp
from jax import lax
from jax.experimental import pallas as pl
from jax.experimental.pallas import tpu as pltpu


# ---------------------------------------------------------------------------
# Kernel
# ---------------------------------------------------------------------------
def _upsample_conv_kernel(xm_ref, xt_ref, xb_ref, w_ref, b_ref, o_ref, acc_ref):
    """One (batch, row-tile) step of the fused upsample + conv.

    xm_ref : (1, TA, Wp, C)   rows [i*TA, (i+1)*TA) of the W-padded input
    xt_ref : (1, 1,  Wp, C)   row i*TA-1 (clamped; zeroed below for first tile)
    xb_ref : (1, 1,  Wp, C)   row (i+1)*TA (clamped; zeroed below for last tile)
    w_ref  : (3, 3, C, CO4)   per-tap phase-folded weights
    b_ref  : (1, CO4)         bias tiled over the 4 phases (float32)
    o_ref  : (1, TA, W, CO4)  phase-packed output, (p, q, cout) on the lanes
    acc_ref: (TA, W, CO4)     float32 accumulator scratch
    """
    ta = xm_ref.shape[1]
    wp = xm_ref.shape[2]
    c = xm_ref.shape[3]
    wo = o_ref.shape[2]
    co4 = o_ref.shape[3]

    i = pl.program_id(1)
    last = pl.num_programs(1) - 1

    xm = xm_ref[0]                                          # (TA, Wp, C)
    zero_row = jnp.zeros((1, wp, c), dtype=xm.dtype)
    # Halo rows outside the image are zeros (select, not multiply -> no 0*inf).
    top = jnp.where(i > 0, xt_ref[0], zero_row)             # (1, Wp, C)
    bot = jnp.where(i < last, xb_ref[0], zero_row)          # (1, Wp, C)

    # Initialize the accumulator with the (phase-tiled) bias.
    acc_ref[...] = jnp.broadcast_to(b_ref[...], (ta, wo, co4))

    def mm(lhs_3d, wt):
        rows = lhs_3d.shape[0]
        res = jnp.dot(lhs_3d.reshape(rows * wo, c), wt,
                      preferred_element_type=jnp.float32)
        return res.reshape(rows, wo, co4)

    # Accumulate the 9 taps: dj = column offset, di = row offset.
    for dj in range(3):
        xm_j = xm[:, dj:dj + wo, :]                         # (TA, W, C)
        xt_j = top[:, dj:dj + wo, :]                        # (1, W, C)
        xb_j = bot[:, dj:dj + wo, :]                        # (1, W, C)

        # di = 1 (centre row): contributes to every output row of the tile.
        acc_ref[...] += mm(xm_j, w_ref[1, dj])

        # di = 0 (row above): out row a uses input row a-1.
        acc_ref[0:1, :, :] += mm(xt_j, w_ref[0, dj])
        if ta > 1:
            acc_ref[1:ta, :, :] += mm(xm_j[:ta - 1], w_ref[0, dj])

        # di = 2 (row below): out row a uses input row a+1.
        acc_ref[ta - 1:ta, :, :] += mm(xb_j, w_ref[2, dj])
        if ta > 1:
            acc_ref[0:ta - 1, :, :] += mm(xm_j[1:ta], w_ref[2, dj])

    o_ref[...] = acc_ref[...].astype(o_ref.dtype).reshape(1, ta, wo, co4)


# ---------------------------------------------------------------------------
# Wrapper helpers
# ---------------------------------------------------------------------------
def _fold_upsample_into_weights(w_oihw):
    """Fold the nearest-2x upsample into the 3x3 conv weights.

    Writing the output as 4 interleaved phases y[2a+p, 2b+q] (p, q in {0,1}):
        y[2a+p, 2b+q, co] = sum_{i,j in 0..2} xpad[a+i, b+j, :] @ Wc[i, j, p, q]
    where xpad is the zero-padded ORIGINAL-resolution image and
        Wc[i,j,p,q] = sum_{dh:(p+dh+1)//2==i} sum_{dw:(q+dw+1)//2==j} w[dh, dw].
    Returns Wc of shape (3, 3, Cin, 4*Cout), column index (p*2+q)*Cout + co.
    """
    cout, cin = w_oihw.shape[0], w_oihw.shape[1]
    w_hwio = jnp.transpose(w_oihw.astype(jnp.float32), (2, 3, 1, 0))  # (3,3,Ci,Co)
    ph = jnp.arange(2)[:, None, None]      # phase p (or q)
    off = jnp.arange(3)[None, :, None]     # tap offset i (or j) into xpad
    k = jnp.arange(3)[None, None, :]       # kernel index dh (or dw)
    sel = ((ph + k + 1) // 2 == off).astype(jnp.float32)              # (2,3,3)
    wc = jnp.einsum('pid,qje,deco->ijpqco', sel, sel, w_hwio)  # (3,3,2,2,Ci,Co)
    return jnp.transpose(wc, (0, 1, 4, 2, 3, 5)).reshape(3, 3, cin, 4 * cout)


def _vmem_limits():
    try:
        cap = int(pltpu.get_tpu_info().vmem_capacity_bytes)
    except Exception:
        cap = 64 * 1024 * 1024  # v7x-sized fallback (smallest of the 3 gens)
    limit = min(cap * 3 // 4, 96 * 1024 * 1024)
    budget = int(limit * 0.7)   # headroom for Mosaic temps
    return budget, limit


def _tile_vmem_bytes(ta, w, wp, c, co4, in_isz, out_isz, w_bufs):
    """Honest per-grid-step VMEM estimate for the new kernel."""
    inp = 2 * in_isz * (ta + 2) * wp * c            # double-buffered main + halos
    wgt = w_bufs * in_isz * 9 * c * co4 + 2 * 4 * co4
    acc = 4 * ta * w * co4                          # f32 accumulator scratch
    out = 2 * out_isz * ta * w * co4                # double-buffered output block
    # transients: one dj-shifted slab + reshape copy + one matmul result in flight
    trans = 2 * in_isz * ta * w * c + 4 * ta * w * co4
    return inp + wgt + acc + out + trans


def _pick_row_tile(n, h, w, wp, c, co4, in_isz, out_isz, budget):
    """Largest divisor of H that fits the budget, keeping >=2 grid steps."""
    divisors = [d for d in range(1, h + 1) if h % d == 0]
    fits = [d for d in divisors
            if _tile_vmem_bytes(d, w, wp, c, co4, in_isz, out_isz, 2) <= budget]
    if not fits:
        fits = [1]
    if n == 1:  # v7x has 2 TensorCores: keep at least 2 parallel grid steps.
        multi = [d for d in fits if h // d >= 2]
        if multi:
            fits = multi
    return max(fits)


# ---------------------------------------------------------------------------
# Core (phase-packed NHWC output)
# ---------------------------------------------------------------------------
def _upsample_conv_packed(x_nhwc, w_oihw, bias, *, row_tile=None,
                          compute_dtype=jnp.bfloat16):
    n, h, w, c = x_nhwc.shape
    cout = w_oihw.shape[0]
    assert w_oihw.shape == (cout, c, 3, 3)
    co4 = 4 * cout
    co4p = co4 if co4 % 128 == 0 else ((co4 + 127) // 128) * 128  # lane-dense out
    out_dtype = x_nhwc.dtype
    cdt = jnp.dtype(compute_dtype) if compute_dtype is not None else jnp.dtype(out_dtype)

    # Zero-pad W once in the wrapper: col 0 is the conv's left padding, cols
    # W+1.. are the right padding rounded up to a sublane multiple.
    wp = ((w + 2 + 7) // 8) * 8
    x = x_nhwc.astype(cdt)
    xpw = jnp.pad(x, ((0, 0), (0, 0), (1, wp - w - 1), (0, 0)))

    wf = _fold_upsample_into_weights(w_oihw)                 # (3,3,C,4Cout) f32
    b4 = jnp.tile(bias.astype(jnp.float32), 4)               # (4Cout,)
    if co4p != co4:
        wf = jnp.pad(wf, ((0, 0), (0, 0), (0, 0), (0, co4p - co4)))
        b4 = jnp.pad(b4, (0, co4p - co4))
    wf = wf.astype(cdt)
    b4 = b4.reshape(1, co4p)

    budget, vmem_limit = _vmem_limits()
    in_isz = jnp.dtype(cdt).itemsize
    out_isz = jnp.dtype(out_dtype).itemsize
    if row_tile is None:
        row_tile = _pick_row_tile(n, h, w, wp, c, co4p, in_isz, out_isz, budget)
    ta = int(row_tile)
    assert h % ta == 0, "row_tile must divide H"
    n_tiles = h // ta

    cost = pl.CostEstimate(
        flops=2 * 9 * n * h * w * c * co4p,
        transcendentals=0,
        bytes_accessed=int(xpw.size) * in_isz + int(wf.size) * in_isz
                       + n * h * w * co4p * out_isz,
    )

    def run(single_buffer_weights):
        if single_buffer_weights:
            # Weights/bias are grid-resident (constant index map): single buffer.
            res_kw = {"pipeline_mode": pl.Buffered(1)}
        else:
            res_kw = {}
        grid_spec = pltpu.PrefetchScalarGridSpec(
            num_scalar_prefetch=0,
            grid=(n, n_tiles),
            in_specs=[
                # main rows of this tile
                pl.BlockSpec((1, ta, wp, c), lambda b, i: (b, i, 0, 0)),
                # 1-row halo above (clamped; where-zeroed in-kernel for tile 0)
                pl.BlockSpec((1, 1, wp, c),
                             lambda b, i: (b, jnp.maximum(i * ta - 1, 0), 0, 0)),
                # 1-row halo below (clamped; where-zeroed in-kernel for last tile)
                pl.BlockSpec((1, 1, wp, c),
                             lambda b, i: (b, jnp.minimum((i + 1) * ta, h - 1),
                                           0, 0)),
                # phase-folded weights and bias, resident across the whole grid
                pl.BlockSpec((3, 3, c, co4p), lambda b, i: (0, 0, 0, 0), **res_kw),
                pl.BlockSpec((1, co4p), lambda b, i: (0, 0), **res_kw),
            ],
            out_specs=pl.BlockSpec((1, ta, w, co4p), lambda b, i: (b, i, 0, 0)),
            scratch_shapes=[pltpu.VMEM((ta, w, co4p), jnp.float32)],
        )
        return pl.pallas_call(
            _upsample_conv_kernel,
            out_shape=jax.ShapeDtypeStruct((n, h, w, co4p), out_dtype),
            grid_spec=grid_spec,
            compiler_params=pltpu.CompilerParams(
                dimension_semantics=("parallel", "parallel"),
                vmem_limit_bytes=int(vmem_limit),
            ),
            cost_estimate=cost,
        )(xpw, xpw, xpw, wf, b4)

    try:
        packed = run(True)
    except Exception:
        # Fallback if single-buffered resident specs are not supported.
        packed = run(False)

    if co4p != co4:
        packed = packed[..., :co4]
    return packed                                            # (N, H, W, 4*Cout)


# ---------------------------------------------------------------------------
# Public entry points
# ---------------------------------------------------------------------------
def upsample_conv_nhwc(x_nhwc, w_oihw, bias, *, row_tile=None,
                       compute_dtype=jnp.bfloat16):
    """UpSample forward on NHWC input -> (N, 2H, 2W, Cout) NHWC output."""
    n, h, w, _ = x_nhwc.shape
    cout = w_oihw.shape[0]
    packed = _upsample_conv_packed(x_nhwc, w_oihw, bias, row_tile=row_tile,
                                   compute_dtype=compute_dtype)
    y = packed.reshape(n, h, w, 2, 2, cout)
    return jnp.transpose(y, (0, 1, 3, 2, 4, 5)).reshape(n, 2 * h, 2 * w, cout)


def upsample_conv(x_nchw, w_oihw, bias, *, row_tile=None,
                  compute_dtype=jnp.bfloat16):
    """Forward pass of UpSample: conv3x3(nearest_upsample_2x(x)), NCHW layout.

    Args:
      x_nchw: (N, C, H, W) input (PyTorch layout).
      w_oihw: (Cout, C, 3, 3) conv weight (PyTorch layout).
      bias:   (Cout,) conv bias.
      row_tile: original-resolution rows per grid step (must divide H);
        auto-picked from a VMEM budget when None.
      compute_dtype: matmul-operand dtype (default bfloat16; accumulation is
        always float32).  Pass jnp.float32 for bit-accurate f32 compute.
    Returns:
      (N, Cout, 2H, 2W) in PyTorch NCHW layout.
    """
    n, c, h, w = x_nchw.shape
    cout = w_oihw.shape[0]
    x = jnp.transpose(x_nchw, (0, 2, 3, 1))                  # NHWC
    packed = _upsample_conv_packed(x, w_oihw, bias, row_tile=row_tile,
                                   compute_dtype=compute_dtype)
    # Pixel-shuffle the 4 phases and return to NCHW in one XLA transpose.
    y = packed.reshape(n, h, w, 2, 2, cout)
    return jnp.transpose(y, (0, 5, 1, 3, 2, 4)).reshape(n, cout, 2 * h, 2 * w)


# ---------------------------------------------------------------------------
# Pure-JAX reference (XLA conv) for the correctness check
# ---------------------------------------------------------------------------
def _reference(x_nchw, w_oihw, bias):
    x = jnp.transpose(x_nchw, (0, 2, 3, 1))
    x_up = jnp.repeat(jnp.repeat(x, 2, axis=1), 2, axis=2)
    w_hwio = jnp.transpose(w_oihw, (2, 3, 1, 0))
    y = lax.conv_general_dilated(
        x_up, w_hwio, window_strides=(1, 1), padding="SAME",
        dimension_numbers=("NHWC", "HWIO", "NHWC"),
    ) + bias[None, None, None, :]
    return jnp.transpose(y, (0, 3, 1, 2))


if __name__ == "__main__":
    key = jax.random.PRNGKey(0)
    k_x, k_w, k_b, k_x2, k_w2, k_b2 = jax.random.split(key, 6)

    # --- Small UpSample(C=4) at 16x16: strict float32 check ------------------
    N, C, H, W = 2, 4, 16, 16
    x = jax.random.normal(k_x, (N, C, H, W), dtype=jnp.float32)
    fan_in = C * 3 * 3
    bound = 1.0 / (fan_in ** 0.5)
    wgt = jax.random.uniform(k_w, (C, C, 3, 3), jnp.float32, -bound, bound)
    bs = jax.random.uniform(k_b, (C,), jnp.float32, -bound, bound)
    ref = _reference(x, wgt, bs)

    out_f32 = jax.block_until_ready(
        upsample_conv(x, wgt, bs, compute_dtype=jnp.float32))
    assert out_f32.shape == (N, C, 2 * H, 2 * W)
    assert jnp.allclose(out_f32, ref, atol=1e-4, rtol=1e-4)

    # Multi-tile halo path (4 row tiles).
    out_tiled = jax.block_until_ready(
        upsample_conv(x, wgt, bs, row_tile=4, compute_dtype=jnp.float32))
    assert jnp.allclose(out_tiled, ref, atol=1e-4, rtol=1e-4)

    # Default bf16-operand path (f32 accumulation): looser tolerance.
    out_bf16 = jax.block_until_ready(upsample_conv(x, wgt, bs))
    assert jnp.allclose(out_bf16, ref, atol=5e-2, rtol=5e-2)

    # --- SR3-realistic channel count, bf16 compute, multi-tile halos ---------
    N2, C2, H2, W2 = 1, 64, 16, 16
    x2 = jax.random.normal(k_x2, (N2, C2, H2, W2), dtype=jnp.float32)
    bound2 = 1.0 / ((C2 * 9) ** 0.5)
    wgt2 = jax.random.uniform(k_w2, (C2, C2, 3, 3), jnp.float32, -bound2, bound2)
    bs2 = jax.random.uniform(k_b2, (C2,), jnp.float32, -bound2, bound2)
    ref2 = _reference(x2, wgt2, bs2)
    out2 = jax.block_until_ready(upsample_conv(x2, wgt2, bs2, row_tile=4))
    assert out2.shape == (N2, C2, 2 * H2, 2 * W2)
    assert jnp.allclose(out2, ref2, atol=5e-2, rtol=5e-2)

    print("KERNEL_OK")
</pallas_src>

<mosaic_0001>
module attributes {stable_mosaic.version = 11 : i64} {
  func.func @_upsample_conv_kernel(%arg0: i32, %arg1: i32, %arg2: memref<1x16x24x4xf32, #tpu.memory_space<vmem>>, %arg3: memref<1x1x24x4xf32, #tpu.memory_space<vmem>>, %arg4: memref<1x1x24x4xf32, #tpu.memory_space<vmem>>, %arg5: memref<3x3x4x128xf32, #tpu.memory_space<vmem>>, %arg6: memref<1x128xf32, #tpu.memory_space<vmem>>, %arg7: memref<1x16x16x128xf32, #tpu.memory_space<vmem>>, %arg8: memref<16x16x128xf32, #tpu.memory_space<vmem>>) attributes {dimension_semantics = [#tpu.dimension_semantics<parallel>, #tpu.dimension_semantics<parallel>], iteration_bounds = array<i64: 2, 1>, scalar_prefetch = 0 : i64, scratch_operands = 1 : i64, tpu.core_type = #tpu.core_type<tc>, window_params = [{transform_indices = @transform_0, window_bounds = array<i64: 1, 16, 24, 4>}, {transform_indices = @transform_1, window_bounds = array<i64: 1, 1, 24, 4>}, {transform_indices = @transform_2, window_bounds = array<i64: 1, 1, 24, 4>}, {pipeline_mode = #tpu.pipeline_mode<synchronous>, transform_indices = @transform_3, window_bounds = array<i64: 3, 3, 4, 128>}, {pipeline_mode = #tpu.pipeline_mode<synchronous>, transform_indices = @transform_4, window_bounds = array<i64: 1, 128>}, {transform_indices = @transform_5, window_bounds = array<i64: 1, 16, 16, 128>}]} {
    %c0 = arith.constant 0 : index
    %c0_0 = arith.constant 0 : index
    %c0_1 = arith.constant 0 : index
    %c0_2 = arith.constant 0 : index
    %0 = vector.load %arg2[%c0, %c0_0, %c0_1, %c0_2] : memref<1x16x24x4xf32, #tpu.memory_space<vmem>>, vector<1x16x24x4xf32>
    %1 = vector.shape_cast %0 : vector<1x16x24x4xf32> to vector<16x24x4xf32>
    %cst = arith.constant 0.000000e+00 : f32
    %2 = vector.broadcast %cst : f32 to vector<1x24x4xf32>
    %c0_i32 = arith.constant 0 : i32
    %3 = arith.cmpi sgt, %arg1, %c0_i32 : i32
    %c0_3 = arith.constant 0 : index
    %c0_4 = arith.constant 0 : index
    %c0_5 = arith.constant 0 : index
    %c0_6 = arith.constant 0 : index
    %4 = vector.load %arg3[%c0_3, %c0_4, %c0_5, %c0_6] : memref<1x1x24x4xf32, #tpu.memory_space<vmem>>, vector<1x1x24x4xf32>
    %5 = vector.shape_cast %4 : vector<1x1x24x4xf32> to vector<1x24x4xf32>
    %6 = arith.select %3, %5, %2 : vector<1x24x4xf32>
    %c0_i32_7 = arith.constant 0 : i32
    %7 = arith.cmpi slt, %arg1, %c0_i32_7 : i32
    %c0_8 = arith.constant 0 : index
    %c0_9 = arith.constant 0 : index
    %c0_10 = arith.constant 0 : index
    %c0_11 = arith.constant 0 : index
    %8 = vector.load %arg4[%c0_8, %c0_9, %c0_10, %c0_11] : memref<1x1x24x4xf32, #tpu.memory_space<vmem>>, vector<1x1x24x4xf32>
    %9 = vector.shape_cast %8 : vector<1x1x24x4xf32> to vector<1x24x4xf32>
    %10 = arith.select %7, %9, %2 : vector<1x24x4xf32>
    %c0_12 = arith.constant 0 : index
    %c0_13 = arith.constant 0 : index
    %11 = vector.load %arg6[%c0_12, %c0_13] : memref<1x128xf32, #tpu.memory_space<vmem>>, vector<1x128xf32>
    %12 = vector.shape_cast %11 : vector<1x128xf32> to vector<1x1x128xf32>
    %13 = vector.broadcast %12 : vector<1x1x128xf32> to vector<16x16x128xf32>
    %c0_14 = arith.constant 0 : index
    %c0_15 = arith.constant 0 : index
    %c0_16 = arith.constant 0 : index
    %14 = vector.load %arg8[%c0_14, %c0_15, %c0_16] : memref<16x16x128xf32, #tpu.memory_space<vmem>>, vector<16x16x128xf32>
    tpu.vector_store %arg8[%c0_14, %c0_15, %c0_16], %13 {strides = array<i32>} : memref<16x16x128xf32, #tpu.memory_space<vmem>>, vector<16x16x128xf32>,
    %15 = vector.extract_strided_slice %1 {offsets = [0, 0, 0], sizes = [16, 16, 4], strides = [1, 1, 1]} : vector<16x24x4xf32> to vector<16x16x4xf32>
    %16 = vector.extract_strided_slice %6 {offsets = [0, 0, 0], sizes = [1, 16, 4], strides = [1, 1, 1]} : vector<1x24x4xf32> to vector<1x16x4xf32>
    %17 = vector.extract_strided_slice %10 {offsets = [0, 0, 0], sizes = [1, 16, 4], strides = [1, 1, 1]} : vector<1x24x4xf32> to vector<1x16x4xf32>
    %c0_17 = arith.constant 0 : index
    %c0_18 = arith.constant 0 : index
    %c0_19 = arith.constant 0 : index
    %18 = vector.load %arg8[%c0_17, %c0_18, %c0_19] : memref<16x16x128xf32, #tpu.memory_space<vmem>>, vector<16x16x128xf32>
    %c1 = arith.constant 1 : index
    %c0_20 = arith.constant 0 : index
    %c0_21 = arith.constant 0 : index
    %c0_22 = arith.constant 0 : index
    %19 = vector.load %arg5[%c1, %c0_20, %c0_21, %c0_22] : memref<3x3x4x128xf32, #tpu.memory_space<vmem>>, vector<1x1x4x128xf32>
    %20 = vector.shape_cast %19 : vector<1x1x4x128xf32> to vector<4x128xf32>
    %21 = vector.shape_cast %15 : vector<16x16x4xf32> to vector<256x4xf32>
    %cst_23 = arith.constant dense<0.000000e+00> : vector<256x128xf32>
    %22 = tpu.matmul %21, %20, %cst_23 {dimension_numbers = #tpu.dot_dimension_numbers<[1], [0], [0], [1], [0, 0, 1, 1], [], []>} : vector<256x4xf32>, vector<4x128xf32>, vector<256x128xf32> -> vector<256x128xf32>
    %23 = vector.shape_cast %22 : vector<256x128xf32> to vector<16x16x128xf32>
    %24 = arith.addf %18, %23 : vector<16x16x128xf32>
    %c0_24 = arith.constant 0 : index
    %c0_25 = arith.constant 0 : index
    %c0_26 = arith.constant 0 : index
    %25 = vector.load %arg8[%c0_24, %c0_25, %c0_26] : memref<16x16x128xf32, #tpu.memory_space<vmem>>, vector<16x16x128xf32>
    tpu.vector_store %arg8[%c0_24, %c0_25, %c0_26], %24 {strides = array<i32>} : memref<16x16x128xf32, #tpu.memory_space<vmem>>, vector<16x16x128xf32>,
    %c0_27 = arith.constant 0 : index
    %c0_28 = arith.constant 0 : index
    %c0_29 = arith.constant 0 : index
    %26 = vector.load %arg8[%c0_27, %c0_28, %c0_29] : memref<16x16x128xf32, #tpu.memory_space<vmem>>, vector<1x16x128xf32>
    %c0_30 = arith.constant 0 : index
    %c0_31 = arith.constant 0 : index
    %c0_32 = arith.constant 0 : index
    %c0_33 = arith.constant 0 : index
    %27 = vector.load %arg5[%c0_30, %c0_31, %c0_32, %c0_33] : memref<3x3x4x128xf32, #tpu.memory_space<vmem>>, vector<1x1x4x128xf32>
    %28 = vector.shape_cast %27 : vector<1x1x4x128xf32> to vector<4x128xf32>
    %29 = vector.shape_cast %16 : vector<1x16x4xf32> to vector<16x4xf32>
    %cst_34 = arith.constant dense<0.000000e+00> : vector<16x128xf32>
    %30 = tpu.matmul %29, %28, %cst_34 {dimension_numbers = #tpu.dot_dimension_numbers<[1], [0], [0], [1], [0, 0, 1, 1], [], []>} : vector<16x4xf32>, vector<4x128xf32>, vector<16x128xf32> -> vector<16x128xf32>
    %31 = vector.shape_cast %30 : vector<16x128xf32> to vector<1x16x128xf32>
    %32 = arith.addf %26, %31 : vector<1x16x128xf32>
    %c0_35 = arith.constant 0 : index
    %c0_36 = arith.constant 0 : index
    %c0_37 = arith.constant 0 : index
    %33 = vector.load %arg8[%c0_35, %c0_36, %c0_37] : memref<16x16x128xf32, #tpu.memory_space<vmem>>, vector<1x16x128xf32>
    tpu.vector_store %arg8[%c0_35, %c0_36, %c0_37], %32 {strides = array<i32>} : memref<16x16x128xf32, #tpu.memory_space<vmem>>, vector<1x16x128xf32>,
    %c1_38 = arith.constant 1 : index
    %c0_39 = arith.constant 0 : index
    %c0_40 = arith.constant 0 : index
    %34 = vector.load %arg8[%c1_38, %c0_39, %c0_40] : memref<16x16x128xf32, #tpu.memory_space<vmem>>, vector<15x16x128xf32>
    %35 = vector.extract_strided_slice %15 {offsets = [0, 0, 0], sizes = [15, 16, 4], strides = [1, 1, 1]} : vector<16x16x4xf32> to vector<15x16x4xf32>
    %c0_41 = arith.constant 0 : index
    %c0_42 = arith.constant 0 : index
    %c0_43 = arith.constant 0 : index
    %c0_44 = arith.constant 0 : index
    %36 = vector.load %arg5[%c0_41, %c0_42, %c0_43, %c0_44] : memref<3x3x4x128xf32, #tpu.memory_space<vmem>>, vector<1x1x4x128xf32>
    %37 = vector.shape_cast %36 : vector<1x1x4x128xf32> to vector<4x128xf32>
    %38 = vector.shape_cast %35 : vector<15x16x4xf32> to vector<240x4xf32>
    %cst_45 = arith.constant dense<0.000000e+00> : vector<240x128xf32>
    %39 = tpu.matmul %38, %37, %cst_45 {dimension_numbers = #tpu.dot_dimension_numbers<[1], [0], [0], [1], [0, 0, 1, 1], [], []>} : vector<240x4xf32>, vector<4x128xf32>, vector<240x128xf32> -> vector<240x128xf32>
    %40 = vector.shape_cast %39 : vector<240x128xf32> to vector<15x16x128xf32>
    %41 = arith.addf %34, %40 : vector<15x16x128xf32>
    %c1_46 = arith.constant 1 : index
    %c0_47 = arith.constant 0 : index
    %c0_48 = arith.constant 0 : index
    %42 = vector.load %arg8[%c1_46, %c0_47, %c0_48] : memref<16x16x128xf32, #tpu.memory_space<vmem>>, vector<15x16x128xf32>
    tpu.vector_store %arg8[%c1_46, %c0_47, %c0_48], %41 {strides = array<i32>} : memref<16x16x128xf32, #tpu.memory_space<vmem>>, vector<15x16x128xf32>,
    %c15 = arith.constant 15 : index
    %c0_49 = arith.constant 0 : index
    %c0_50 = arith.constant 0 : index
    %43 = vector.load %arg8[%c15, %c0_49, %c0_50] : memref<16x16x128xf32, #tpu.memory_space<vmem>>, vector<1x16x128xf32>
    %c2 = arith.constant 2 : index
    %c0_51 = arith.constant 0 : index
    %c0_52 = arith.constant 0 : index
    %c0_53 = arith.constant 0 : index
    %44 = vector.load %arg5[%c2, %c0_51, %c0_52, %c0_53] : memref<3x3x4x128xf32, #tpu.memory_space<vmem>>, vector<1x1x4x128xf32>
    %45 = vector.shape_cast %44 : vector<1x1x4x128xf32> to vector<4x128xf32>
    %46 = vector.shape_cast %17 : vector<1x16x4xf32> to vector<16x4xf32>
    %cst_54 = arith.constant dense<0.000000e+00> : vector<16x128xf32>
    %47 = tpu.matmul %46, %45, %cst_54 {dimension_numbers = #tpu.dot_dimension_numbers<[1], [0], [0], [1], [0, 0, 1, 1], [], []>} : vector<16x4xf32>, vector<4x128xf32>, vector<16x128xf32> -> vector<16x128xf32>
    %48 = vector.shape_cast %47 : vector<16x128xf32> to vector<1x16x128xf32>
    %49 = arith.addf %43, %48 : vector<1x16x128xf32>
    %c15_55 = arith.constant 15 : index
    %c0_56 = arith.constant 0 : index
    %c0_57 = arith.constant 0 : index
    %50 = vector.load %arg8[%c15_55, %c0_56, %c0_57] : memref<16x16x128xf32, #tpu.memory_space<vmem>>, vector<1x16x128xf32>
    tpu.vector_store %arg8[%c15_55, %c0_56, %c0_57], %49 {strides = array<i32>} : memref<16x16x128xf32, #tpu.memory_space<vmem>>, vector<1x16x128xf32>,
    %c0_58 = arith.constant 0 : index
    %c0_59 = arith.constant 0 : index
    %c0_60 = arith.constant 0 : index
    %51 = vector.load %arg8[%c0_58, %c0_59, %c0_60] : memref<16x16x128xf32, #tpu.memory_space<vmem>>, vector<15x16x128xf32>
    %52 = vector.extract_strided_slice %15 {offsets = [1, 0, 0], sizes = [15, 16, 4], strides = [1, 1, 1]} : vector<16x16x4xf32> to vector<15x16x4xf32>
    %c2_61 = arith.constant 2 : index
    %c0_62 = arith.constant 0 : index
    %c0_63 = arith.constant 0 : index
    %c0_64 = arith.constant 0 : index
    %53 = vector.load %arg5[%c2_61, %c0_62, %c0_63, %c0_64] : memref<3x3x4x128xf32, #tpu.memory_space<vmem>>, vector<1x1x4x128xf32>
    %54 = vector.shape_cast %53 : vector<1x1x4x128xf32> to vector<4x128xf32>
    %55 = vector.shape_cast %52 : vector<15x16x4xf32> to vector<240x4xf32>
    %cst_65 = arith.constant dense<0.000000e+00> : vector<240x128xf32>
    %56 = tpu.matmul %55, %54, %cst_65 {dimension_numbers = #tpu.dot_dimension_numbers<[1], [0], [0], [1], [0, 0, 1, 1], [], []>} : vector<240x4xf32>, vector<4x128xf32>, vector<240x128xf32> -> vector<240x128xf32>
    %57 = vector.shape_cast %56 : vector<240x128xf32> to vector<15x16x128xf32>
    %58 = arith.addf %51, %57 : vector<15x16x128xf32>
    %c0_66 = arith.constant 0 : index
    %c0_67 = arith.constant 0 : index
    %c0_68 = arith.constant 0 : index
    %59 = vector.load %arg8[%c0_66, %c0_67, %c0_68] : memref<16x16x128xf32, #tpu.memory_space<vmem>>, vector<15x16x128xf32>
    tpu.vector_store %arg8[%c0_66, %c0_67, %c0_68], %58 {strides = array<i32>} : memref<16x16x128xf32, #tpu.memory_space<vmem>>, vector<15x16x128xf32>,
    %60 = vector.extract_strided_slice %1 {offsets = [0, 1, 0], sizes = [16, 16, 4], strides = [1, 1, 1]} : vector<16x24x4xf32> to vector<16x16x4xf32>
    %61 = vector.extract_strided_slice %6 {offsets = [0, 1, 0], sizes = [1, 16, 4], strides = [1, 1, 1]} : vector<1x24x4xf32> to vector<1x16x4xf32>
    %62 = vector.extract_strided_slice %10 {offsets = [0, 1, 0], sizes = [1, 16, 4], strides = [1, 1, 1]} : vector<1x24x4xf32> to vector<1x16x4xf32>
    %c0_69 = arith.constant 0 : index
    %c0_70 = arith.constant 0 : index
    %c0_71 = arith.constant 0 : index
    %63 = vector.load %arg8[%c0_69, %c0_70, %c0_71] : memref<16x16x128xf32, #tpu.memory_space<vmem>>, vector<16x16x128xf32>
    %c1_72 = arith.constant 1 : index
    %c1_73 = arith.constant 1 : index
    %c0_74 = arith.constant 0 : index
    %c0_75 = arith.constant 0 : index
    %64 = vector.load %arg5[%c1_72, %c1_73, %c0_74, %c0_75] : memref<3x3x4x128xf32, #tpu.memory_space<vmem>>, vector<1x1x4x128xf32>
    %65 = vector.shape_cast %64 : vector<1x1x4x128xf32> to vector<4x128xf32>
    %66 = vector.shape_cast %60 : vector<16x16x4xf32> to vector<256x4xf32>
    %cst_76 = arith.constant dense<0.000000e+00> : vector<256x128xf32>
    %67 = tpu.matmul %66, %65, %cst_76 {dimension_numbers = #tpu.dot_dimension_numbers<[1], [0], [0], [1], [0, 0, 1, 1], [], []>} : vector<256x4xf32>, vector<4x128xf32>, vector<256x128xf32> -> vector<256x128xf32>
    %68 = vector.shape_cast %67 : vector<256x128xf32> to vector<16x16x128xf32>
    %69 = arith.addf %63, %68 : vector<16x16x128xf32>
    %c0_77 = arith.constant 0 : index
    %c0_78 = arith.constant 0 : index
    %c0_79 = arith.constant 0 : index
    %70 = vector.load %arg8[%c0_77, %c0_78, %c0_79] : memref<16x16x128xf32, #tpu.memory_space<vmem>>, vector<16x16x128xf32>
    tpu.vector_store %arg8[%c0_77, %c0_78, %c0_79], %69 {strides = array<i32>} : memref<16x16x128xf32, #tpu.memory_space<vmem>>, vector<16x16x128xf32>,
    %c0_80 = arith.constant 0 : index
    %c0_81 = arith.constant 0 : index
    %c0_82 = arith.constant 0 : index
    %71 = vector.load %arg8[%c0_80, %c0_81, %c0_82] : memref<16x16x128xf32, #tpu.memory_space<vmem>>, vector<1x16x128xf32>
    %c0_83 = arith.constant 0 : index
    %c1_84 = arith.constant 1 : index
    %c0_85 = arith.constant 0 : index
    %c0_86 = arith.constant 0 : index
    %72 = vector.load %arg5[%c0_83, %c1_84, %c0_85, %c0_86] : memref<3x3x4x128xf32, #tpu.memory_space<vmem>>, vector<1x1x4x128xf32>
    %73 = vector.shape_cast %72 : vector<1x1x4x128xf32> to vector<4x128xf32>
    %74 = vector.shape_cast %61 : vector<1x16x4xf32> to vector<16x4xf32>
    %cst_87 = arith.constant dense<0.000000e+00> : vector<16x128xf32>
    %75 = tpu.matmul %74, %73, %cst_87 {dimension_numbers = #tpu.dot_dimension_numbers<[1], [0], [0], [1], [0, 0, 1, 1], [], []>} : vector<16x4xf32>, vector<4x128xf32>, vector<16x128xf32> -> vector<16x128xf32>
    %76 = vector.shape_cast %75 : vector<16x128xf32> to vector<1x16x128xf32>
    %77 = arith.addf %71, %76 : vector<1x16x128xf32>
    %c0_88 = arith.constant 0 : index
    %c0_89 = arith.constant 0 : index
    %c0_90 = arith.constant 0 : index
    %78 = vector.load %arg8[%c0_88, %c0_89, %c0_90] : memref<16x16x128xf32, #tpu.memory_space<vmem>>, vector<1x16x128xf32>
    tpu.vector_store %arg8[%c0_88, %c0_89, %c0_90], %77 {strides = array<i32>} : memref<16x16x128xf32, #tpu.memory_space<vmem>>, vector<1x16x128xf32>,
    %c1_91 = arith.constant 1 : index
    %c0_92 = arith.constant 0 : index
    %c0_93 = arith.constant 0 : index
    %79 = vector.load %arg8[%c1_91, %c0_92, %c0_93] : memref<16x16x128xf32, #tpu.memory_space<vmem>>, vector<15x16x128xf32>
    %80 = vector.extract_strided_slice %60 {offsets = [0, 0, 0], sizes = [15, 16, 4], strides = [1, 1, 1]} : vector<16x16x4xf32> to vector<15x16x4xf32>
    %c0_94 = arith.constant 0 : index
    %c1_95 = arith.constant 1 : index
    %c0_96 = arith.constant 0 : index
    %c0_97 = arith.constant 0 : index
    %81 = vector.load %arg5[%c0_94, %c1_95, %c0_96, %c0_97] : memref<3x3x4x128xf32, #tpu.memory_space<vmem>>, vector<1x1x4x128xf32>
    %82 = vector.shape_cast %81 : vector<1x1x4x128xf32> to vector<4x128xf32>
    %83 = vector.shape_cast %80 : vector<15x16x4xf32> to vector<240x4xf32>
    %cst_98 = arith.constant dense<0.000000e+00> : vector<240x128xf32>
    %84 = tpu.matmul %83, %82, %cst_98 {dimension_numbers = #tpu.dot_dimension_numbers<[1], [0], [0], [1], [0, 0, 1, 1], [], []>} : vector<240x4xf32>, vector<4x128xf32>, vector<240x128xf32> -> vector<240x128xf32>
    %85 = vector.shape_cast %84 : vector<240x128xf32> to vector<15x16x128xf32>
    %86 = arith.addf %79, %85 : vector<15x16x128xf32>
    %c1_99 = arith.constant 1 : index
    %c0_100 = arith.constant 0 : index
    %c0_101 = arith.constant 0 : index
    %87 = vector.load %arg8[%c1_99, %c0_100, %c0_101] : memref<16x16x128xf32, #tpu.memory_space<vmem>>, vector<15x16x128xf32>
    tpu.vector_store %arg8[%c1_99, %c0_100, %c0_101], %86 {strides = array<i32>} : memref<16x16x128xf32, #tpu.memory_space<vmem>>, vector<15x16x128xf32>,
    %c15_102 = arith.constant 15 : index
    %c0_103 = arith.constant 0 : index
    %c0_104 = arith.constant 0 : index
    %88 = vector.load %arg8[%c15_102, %c0_103, %c0_104] : memref<16x16x128xf32, #tpu.memory_space<vmem>>, vector<1x16x128xf32>
    %c2_105 = arith.constant 2 : index
    %c1_106 = arith.constant 1 : index
    %c0_107 = arith.constant 0 : index
    %c0_108 = arith.constant 0 : index
    %89 = vector.load %arg5[%c2_105, %c1_106, %c0_107, %c0_108] : memref<3x3x4x128xf32, #tpu.memory_space<vmem>>, vector<1x1x4x128xf32>
    %90 = vector.shape_cast %89 : vector<1x1x4x128xf32> to vector<4x128xf32>
    %91 = vector.shape_cast %62 : vector<1x16x4xf32> to vector<16x4xf32>
    %cst_109 = arith.constant dense<0.000000e+00> : vector<16x128xf32>
    %92 = tpu.matmul %91, %90, %cst_109 {dimension_numbers = #tpu.dot_dimension_numbers<[1], [0], [0], [1], [0, 0, 1, 1], [], []>} : vector<16x4xf32>, vector<4x128xf32>, vector<16x128xf32> -> vector<16x128xf32>
    %93 = vector.shape_cast %92 : vector<16x128xf32> to vector<1x16x128xf32>
    %94 = arith.addf %88, %93 : vector<1x16x128xf32>
    %c15_110 = arith.constant 15 : index
    %c0_111 = arith.constant 0 : index
    %c0_112 = arith.constant 0 : index
    %95 = vector.load %arg8[%c15_110, %c0_111, %c0_112] : memref<16x16x128xf32, #tpu.memory_space<vmem>>, vector<1x16x128xf32>
    tpu.vector_store %arg8[%c15_110, %c0_111, %c0_112], %94 {strides = array<i32>} : memref<16x16x128xf32, #tpu.memory_space<vmem>>, vector<1x16x128xf32>,
    %c0_113 = arith.constant 0 : index
    %c0_114 = arith.constant 0 : index
    %c0_115 = arith.constant 0 : index
    %96 = vector.load %arg8[%c0_113, %c0_114, %c0_115] : memref<16x16x128xf32, #tpu.memory_space<vmem>>, vector<15x16x128xf32>
    %97 = vector.extract_strided_slice %60 {offsets = [1, 0, 0], sizes = [15, 16, 4], strides = [1, 1, 1]} : vector<16x16x4xf32> to vector<15x16x4xf32>
    %c2_116 = arith.constant 2 : index
    %c1_117 = arith.constant 1 : index
    %c0_118 = arith.constant 0 : index
    %c0_119 = arith.constant 0 : index
    %98 = vector.load %arg5[%c2_116, %c1_117, %c0_118, %c0_119] : memref<3x3x4x128xf32, #tpu.memory_space<vmem>>, vector<1x1x4x128xf32>
    %99 = vector.shape_cast %98 : vector<1x1x4x128xf32> to vector<4x128xf32>
    %100 = vector.shape_cast %97 : vector<15x16x4xf32> to vector<240x4xf32>
    %cst_120 = arith.constant dense<0.000000e+00> : vector<240x128xf32>
    %101 = tpu.matmul %100, %99, %cst_120 {dimension_numbers = #tpu.dot_dimension_numbers<[1], [0], [0], [1], [0, 0, 1, 1], [], []>} : vector<240x4xf32>, vector<4x128xf32>, vector<240x128xf32> -> vector<240x128xf32>
    %102 = vector.shape_cast %101 : vector<240x128xf32> to vector<15x16x128xf32>
    %103 = arith.addf %96, %102 : vector<15x16x128xf32>
    %c0_121 = arith.constant 0 : index
    %c0_122 = arith.constant 0 : index
    %c0_123 = arith.constant 0 : index
    %104 = vector.load %arg8[%c0_121, %c0_122, %c0_123] : memref<16x16x128xf32, #tpu.memory_space<vmem>>, vector<15x16x128xf32>
    tpu.vector_store %arg8[%c0_121, %c0_122, %c0_123], %103 {strides = array<i32>} : memref<16x16x128xf32, #tpu.memory_space<vmem>>, vector<15x16x128xf32>,
    %105 = vector.extract_strided_slice %1 {offsets = [0, 2, 0], sizes = [16, 16, 4], strides = [1, 1, 1]} : vector<16x24x4xf32> to vector<16x16x4xf32>
    %106 = vector.extract_strided_slice %6 {offsets = [0, 2, 0], sizes = [1, 16, 4], strides = [1, 1, 1]} : vector<1x24x4xf32> to vector<1x16x4xf32>
    %107 = vector.extract_strided_slice %10 {offsets = [0, 2, 0], sizes = [1, 16, 4], strides = [1, 1, 1]} : vector<1x24x4xf32> to vector<1x16x4xf32>
    %c0_124 = arith.constant 0 : index
    %c0_125 = arith.constant 0 : index
    %c0_126 = arith.constant 0 : index
    %108 = vector.load %arg8[%c0_124, %c0_125, %c0_126] : memref<16x16x128xf32, #tpu.memory_space<vmem>>, vector<16x16x128xf32>
    %c1_127 = arith.constant 1 : index
    %c2_128 = arith.constant 2 : index
    %c0_129 = arith.constant 0 : index
    %c0_130 = arith.constant 0 : index
    %109 = vector.load %arg5[%c1_127, %c2_128, %c0_129, %c0_130] : memref<3x3x4x128xf32, #tpu.memory_space<vmem>>, vector<1x1x4x128xf32>
    %110 = vector.shape_cast %109 : vector<1x1x4x128xf32> to vector<4x128xf32>
    %111 = vector.shape_cast %105 : vector<16x16x4xf32> to vector<256x4xf32>
    %cst_131 = arith.constant dense<0.000000e+00> : vector<256x128xf32>
    %112 = tpu.matmul %111, %110, %cst_131 {dimension_numbers = #tpu.dot_dimension_numbers<[1], [0], [0], [1], [0, 0, 1, 1], [], []>} : vector<256x4xf32>, vector<4x128xf32>, vector<256x128xf32> -> vector<256x128xf32>
    %113 = vector.shape_cast %112 : vector<256x128xf32> to vector<16x16x128xf32>
    %114 = arith.addf %108, %113 : vector<16x16x128xf32>
    %c0_132 = arith.constant 0 : index
    %c0_133 = arith.constant 0 : index
    %c0_134 = arith.constant 0 : index
    %115 = vector.load %arg8[%c0_132, %c0_133, %c0_134] : memref<16x16x128xf32, #tpu.memory_space<vmem>>, vector<16x16x128xf32>
    tpu.vector_store %arg8[%c0_132, %c0_133, %c0_134], %114 {strides = array<i32>} : memref<16x16x128xf32, #tpu.memory_space<vmem>>, vector<16x16x128xf32>,
    %c0_135 = arith.constant 0 : index
    %c0_136 = arith.constant 0 : index
    %c0_137 = arith.constant 0 : index
    %116 = vector.load %arg8[%c0_135, %c0_136, %c0_137] : memref<16x16x128xf32, #tpu.memory_space<vmem>>, vector<1x16x128xf32>
    %c0_138 = arith.constant 0 : index
    %c2_139 = arith.constant 2 : index
    %c0_140 = arith.constant 0 : index
    %c0_141 = arith.constant 0 : index
    %117 = vector.load %arg5[%c0_138, %c2_139, %c0_140, %c0_141] : memref<3x3x4x128xf32, #tpu.memory_space<vmem>>, vector<1x1x4x128xf32>
    %118 = vector.shape_cast %117 : vector<1x1x4x128xf32> to vector<4x128xf32>
    %119 = vector.shape_cast %106 : vector<1x16x4xf32> to vector<16x4xf32>
    %cst_142 = arith.constant dense<0.000000e+00> : vector<16x128xf32>
    %120 = tpu.matmul %119, %118, %cst_142 {dimension_numbers = #tpu.dot_dimension_numbers<[1], [0], [0], [1], [0, 0, 1, 1], [], []>} : vector<16x4xf32>, vector<4x128xf32>, vector<16x128xf32> -> vector<16x128xf32>
    %121 = vector.shape_cast %120 : vector<16x128xf32> to vector<1x16x128xf32>
    %122 = arith.addf %116, %121 : vector<1x16x128xf32>
    %c0_143 = arith.constant 0 : index
    %c0_144 = arith.constant 0 : index
    %c0_145 = arith.constant 0 : index
    %123 = vector.load %arg8[%c0_143, %c0_144, %c0_145] : memref<16x16x128xf32, #tpu.memory_space<vmem>>, vector<1x16x128xf32>
    tpu.vector_store %arg8[%c0_143, %c0_144, %c0_145], %122 {strides = array<i32>} : memref<16x16x128xf32, #tpu.memory_space<vmem>>, vector<1x16x128xf32>,
    %c1_146 = arith.constant 1 : index
    %c0_147 = arith.constant 0 : index
    %c0_148 = arith.constant 0 : index
    %124 = vector.load %arg8[%c1_146, %c0_147, %c0_148] : memref<16x16x128xf32, #tpu.memory_space<vmem>>, vector<15x16x128xf32>
    %125 = vector.extract_strided_slice %105 {offsets = [0, 0, 0], sizes = [15, 16, 4], strides = [1, 1, 1]} : vector<16x16x4xf32> to vector<15x16x4xf32>
    %c0_149 = arith.constant 0 : index
    %c2_150 = arith.constant 2 : index
    %c0_151 = arith.constant 0 : index
    %c0_152 = arith.constant 0 : index
    %126 = vector.load %arg5[%c0_149, %c2_150, %c0_151, %c0_152] : memref<3x3x4x128xf32, #tpu.memory_space<vmem>>, vector<1x1x4x128xf32>
    %127 = vector.shape_cast %126 : vector<1x1x4x128xf32> to vector<4x128xf32>
    %128 = vector.shape_cast %125 : vector<15x16x4xf32> to vector<240x4xf32>
    %cst_153 = arith.constant dense<0.000000e+00> : vector<240x128xf32>
    %129 = tpu.matmul %128, %127, %cst_153 {dimension_numbers = #tpu.dot_dimension_numbers<[1], [0], [0], [1], [0, 0, 1, 1], [], []>} : vector<240x4xf32>, vector<4x128xf32>, vector<240x128xf32> -> vector<240x128xf32>
    %130 = vector.shape_cast %129 : vector<240x128xf32> to vector<15x16x128xf32>
    %131 = arith.addf %124, %130 : vector<15x16x128xf32>
    %c1_154 = arith.constant 1 : index
    %c0_155 = arith.constant 0 : index
    %c0_156 = arith.constant 0 : index
    %132 = vector.load %arg8[%c1_154, %c0_155, %c0_156] : memref<16x16x128xf32, #tpu.memory_space<vmem>>, vector<15x16x128xf32>
    tpu.vector_store %arg8[%c1_154, %c0_155, %c0_156], %131 {strides = array<i32>} : memref<16x16x128xf32, #tpu.memory_space<vmem>>, vector<15x16x128xf32>,
    %c15_157 = arith.constant 15 : index
    %c0_158 = arith.constant 0 : index
    %c0_159 = arith.constant 0 : index
    %133 = vector.load %arg8[%c15_157, %c0_158, %c0_159] : memref<16x16x128xf32, #tpu.memory_space<vmem>>, vector<1x16x128xf32>
    %c2_160 = arith.constant 2 : index
    %c2_161 = arith.constant 2 : index
    %c0_162 = arith.constant 0 : index
    %c0_163 = arith.constant 0 : index
    %134 = vector.load %arg5[%c2_160, %c2_161, %c0_162, %c0_163] : memref<3x3x4x128xf32, #tpu.memory_space<vmem>>, vector<1x1x4x128xf32>
    %135 = vector.shape_cast %134 : vector<1x1x4x128xf32> to vector<4x128xf32>
    %136 = vector.shape_cast %107 : vector<1x16x4xf32> to vector<16x4xf32>
    %cst_164 = arith.constant dense<0.000000e+00> : vector<16x128xf32>
    %137 = tpu.matmul %136, %135, %cst_164 {dimension_numbers = #tpu.dot_dimension_numbers<[1], [0], [0], [1], [0, 0, 1, 1], [], []>} : vector<16x4xf32>, vector<4x128xf32>, vector<16x128xf32> -> vector<16x128xf32>
    %138 = vector.shape_cast %137 : vector<16x128xf32> to vector<1x16x128xf32>
    %139 = arith.addf %133, %138 : vector<1x16x128xf32>
    %c15_165 = arith.constant 15 : index
    %c0_166 = arith.constant 0 : index
    %c0_167 = arith.constant 0 : index
    %140 = vector.load %arg8[%c15_165, %c0_166, %c0_167] : memref<16x16x128xf32, #tpu.memory_space<vmem>>, vector<1x16x128xf32>
    tpu.vector_store %arg8[%c15_165, %c0_166, %c0_167], %139 {strides = array<i32>} : memref<16x16x128xf32, #tpu.memory_space<vmem>>, vector<1x16x128xf32>,
    %c0_168 = arith.constant 0 : index
    %c0_169 = arith.constant 0 : index
    %c0_170 = arith.constant 0 : index
    %141 = vector.load %arg8[%c0_168, %c0_169, %c0_170] : memref<16x16x128xf32, #tpu.memory_space<vmem>>, vector<15x16x128xf32>
    %142 = vector.extract_strided_slice %105 {offsets = [1, 0, 0], sizes = [15, 16, 4], strides = [1, 1, 1]} : vector<16x16x4xf32> to vector<15x16x4xf32>
    %c2_171 = arith.constant 2 : index
    %c2_172 = arith.constant 2 : index
    %c0_173 = arith.constant 0 : index
    %c0_174 = arith.constant 0 : index
    %143 = vector.load %arg5[%c2_171, %c2_172, %c0_173, %c0_174] : memref<3x3x4x128xf32, #tpu.memory_space<vmem>>, vector<1x1x4x128xf32>
    %144 = vector.shape_cast %143 : vector<1x1x4x128xf32> to vector<4x128xf32>
    %145 = vector.shape_cast %142 : vector<15x16x4xf32> to vector<240x4xf32>
    %cst_175 = arith.constant dense<0.000000e+00> : vector<240x128xf32>
    %146 = tpu.matmul %145, %144, %cst_175 {dimension_numbers = #tpu.dot_dimension_numbers<[1], [0], [0], [1], [0, 0, 1, 1], [], []>} : vector<240x4xf32>, vector<4x128xf32>, vector<240x128xf32> -> vector<240x128xf32>
    %147 = vector.shape_cast %146 : vector<240x128xf32> to vector<15x16x128xf32>
    %148 = arith.addf %141, %147 : vector<15x16x128xf32>
    %c0_176 = arith.constant 0 : index
    %c0_177 = arith.constant 0 : index
    %c0_178 = arith.constant 0 : index
    %149 = vector.load %arg8[%c0_176, %c0_177, %c0_178] : memref<16x16x128xf32, #tpu.memory_space<vmem>>, vector<15x16x128xf32>
    tpu.vector_store %arg8[%c0_176, %c0_177, %c0_178], %148 {strides = array<i32>} : memref<16x16x128xf32, #tpu.memory_space<vmem>>, vector<15x16x128xf32>,
    %c0_179 = arith.constant 0 : index
    %c0_180 = arith.constant 0 : index
    %c0_181 = arith.constant 0 : index
    %150 = vector.load %arg8[%c0_179, %c0_180, %c0_181] : memref<16x16x128xf32, #tpu.memory_space<vmem>>, vector<16x16x128xf32>
    %151 = vector.shape_cast %150 : vector<16x16x128xf32> to vector<1x16x16x128xf32>
    %c0_182 = arith.constant 0 : index
    %c0_183 = arith.constant 0 : index
    %c0_184 = arith.constant 0 : index
    %c0_185 = arith.constant 0 : index
    %152 = vector.load %arg7[%c0_182, %c0_183, %c0_184, %c0_185] : memref<1x16x16x128xf32, #tpu.memory_space<vmem>>, vector<1x16x16x128xf32>
    tpu.vector_store %arg7[%c0_182, %c0_183, %c0_184, %c0_185], %151 {strides = array<i32>} : memref<1x16x16x128xf32, #tpu.memory_space<vmem>>, vector<1x16x16x128xf32>,
    return
  }
  func.func @transform_0(%arg0: i32, %arg1: i32) -> (i32, i32, i32, i32) {
    %c0_i32 = arith.constant 0 : i32
    %c0_i32_0 = arith.constant 0 : i32
    %c0_i32_1 = arith.constant 0 : i32
    return %arg0, %arg1, %c0_i32, %c0_i32_0 : i32, i32, i32, i32
  }
  func.func @transform_1(%arg0: i32, %arg1: i32) -> (i32, i32, i32, i32) {
    %c16_i32 = arith.constant 16 : i32
    %0 = arith.muli %arg1, %c16_i32 : i32
    %c1_i32 = arith.constant 1 : i32
    %1 = arith.subi %0, %c1_i32 : i32
    %c0_i32 = arith.constant 0 : i32
    %2 = arith.maxsi %1, %c0_i32 : i32
    %c0_i32_0 = arith.constant 0 : i32
    %c0_i32_1 = arith.constant 0 : i32
    %c0_i32_2 = arith.constant 0 : i32
    return %arg0, %2, %c0_i32_0, %c0_i32_1 : i32, i32, i32, i32
  }
  func.func @transform_2(%arg0: i32, %arg1: i32) -> (i32, i32, i32, i32) {
    %c1_i32 = arith.constant 1 : i32
    %0 = arith.addi %arg1, %c1_i32 : i32
    %c16_i32 = arith.constant 16 : i32
    %1 = arith.muli %0, %c16_i32 : i32
    %c15_i32 = arith.constant 15 : i32
    %2 = arith.minsi %1, %c15_i32 : i32
    %c0_i32 = arith.constant 0 : i32
    %c0_i32_0 = arith.constant 0 : i32
    %c0_i32_1 = arith.constant 0 : i32
    return %arg0, %2, %c0_i32, %c0_i32_0 : i32, i32, i32, i32
  }
  func.func @transform_3(%arg0: i32, %arg1: i32) -> (i32, i32, i32, i32) {
    %c0_i32 = arith.constant 0 : i32
    %c0_i32_0 = arith.constant 0 : i32
    %c0_i32_1 = arith.constant 0 : i32
    %c0_i32_2 = arith.constant 0 : i32
    %c0_i32_3 = arith.constant 0 : i32
    return %c0_i32, %c0_i32_0, %c0_i32_1, %c0_i32_2 : i32, i32, i32, i32
  }
  func.func @transform_4(%arg0: i32, %arg1: i32) -> (i32, i32) {
    %c0_i32 = arith.constant 0 : i32
    %c0_i32_0 = arith.constant 0 : i32
    %c0_i32_1 = arith.constant 0 : i32
    return %c0_i32, %c0_i32_0 : i32, i32
  }
  func.func @transform_5(%arg0: i32, %arg1: i32) -> (i32, i32, i32, i32) {
    %c0_i32 = arith.constant 0 : i32
    %c0_i32_0 = arith.constant 0 : i32
    %c0_i32_1 = arith.constant 0 : i32
    return %arg0, %arg1, %c0_i32, %c0_i32_0 : i32, i32, i32, i32
  }
}

module attributes {stable_mosaic.version = 11 : i64} {
  func.func @_upsample_conv_kernel(%arg0: i32, %arg1: i32, %arg2: memref<1x16x24x4xf32, #tpu.memory_space<vmem>>, %arg3: memref<1x1x24x4xf32, #tpu.memory_space<vmem>>, %arg4: memref<1x1x24x4xf32, #tpu.memory_space<vmem>>, %arg5: memref<3x3x4x128xf32, #tpu.memory_space<vmem>>, %arg6: memref<1x128xf32, #tpu.memory_space<vmem>>, %arg7: memref<1x16x16x128xf32, #tpu.memory_space<vmem>>, %arg8: memref<16x16x128xf32, #tpu.memory_space<vmem>>) attributes {dimension_semantics = [#tpu.dimension_semantics<parallel>, #tpu.dimension_semantics<parallel>], iteration_bounds = array<i64: 2, 1>, scalar_prefetch = 0 : i64, scratch_operands = 1 : i64, tpu.core_type = #tpu.core_type<tc>, window_params = [{transform_indices = @transform_0, window_bounds = array<i64: 1, 16, 24, 4>}, {transform_indices = @transform_1, window_bounds = array<i64: 1, 1, 24, 4>}, {transform_indices = @transform_2, window_bounds = array<i64: 1, 1, 24, 4>}, {pipeline_mode = #tpu.pipeline_mode<synchronous>, transform_indices = @transform_3, window_bounds = array<i64: 3, 3, 4, 128>}, {pipeline_mode = #tpu.pipeline_mode<synchronous>, transform_indices = @transform_4, window_bounds = array<i64: 1, 128>}, {transform_indices = @transform_5, window_bounds = array<i64: 1, 16, 16, 128>}]} {
    %c0 = arith.constant 0 : index
    %c0_0 = arith.constant 0 : index
    %c0_1 = arith.constant 0 : index
    %c0_2 = arith.constant 0 : index
    %0 = vector.load %arg2[%c0, %c0_0, %c0_1, %c0_2] : memref<1x16x24x4xf32, #tpu.memory_space<vmem>>, vector<1x16x24x4xf32>
    %1 = vector.shape_cast %0 : vector<1x16x24x4xf32> to vector<16x24x4xf32>
    %cst = arith.constant 0.000000e+00 : f32
    %2 = vector.broadcast %cst : f32 to vector<1x24x4xf32>
    %c0_i32 = arith.constant 0 : i32
    %3 = arith.cmpi sgt, %arg1, %c0_i32 : i32
    %c0_3 = arith.constant 0 : index
    %c0_4 = arith.constant 0 : index
    %c0_5 = arith.constant 0 : index
    %c0_6 = arith.constant 0 : index
    %4 = vector.load %arg3[%c0_3, %c0_4, %c0_5, %c0_6] : memref<1x1x24x4xf32, #tpu.memory_space<vmem>>, vector<1x1x24x4xf32>
    %5 = vector.shape_cast %4 : vector<1x1x24x4xf32> to vector<1x24x4xf32>
    %6 = arith.select %3, %5, %2 : vector<1x24x4xf32>
    %c0_i32_7 = arith.constant 0 : i32
    %7 = arith.cmpi slt, %arg1, %c0_i32_7 : i32
    %c0_8 = arith.constant 0 : index
    %c0_9 = arith.constant 0 : index
    %c0_10 = arith.constant 0 : index
    %c0_11 = arith.constant 0 : index
    %8 = vector.load %arg4[%c0_8, %c0_9, %c0_10, %c0_11] : memref<1x1x24x4xf32, #tpu.memory_space<vmem>>, vector<1x1x24x4xf32>
    %9 = vector.shape_cast %8 : vector<1x1x24x4xf32> to vector<1x24x4xf32>
    %10 = arith.select %7, %9, %2 : vector<1x24x4xf32>
    %c0_12 = arith.constant 0 : index
    %c0_13 = arith.constant 0 : index
    %11 = vector.load %arg6[%c0_12, %c0_13] : memref<1x128xf32, #tpu.memory_space<vmem>>, vector<1x128xf32>
    %12 = vector.shape_cast %11 : vector<1x128xf32> to vector<1x1x128xf32>
    %13 = vector.broadcast %12 : vector<1x1x128xf32> to vector<16x16x128xf32>
    %c0_14 = arith.constant 0 : index
    %c0_15 = arith.constant 0 : index
    %c0_16 = arith.constant 0 : index
    %14 = vector.load %arg8[%c0_14, %c0_15, %c0_16] : memref<16x16x128xf32, #tpu.memory_space<vmem>>, vector<16x16x128xf32>
    tpu.vector_store %arg8[%c0_14, %c0_15, %c0_16], %13 {strides = array<i32>} : memref<16x16x128xf32, #tpu.memory_space<vmem>>, vector<16x16x128xf32>,
    %15 = vector.extract_strided_slice %1 {offsets = [0, 0, 0], sizes = [16, 16, 4], strides = [1, 1, 1]} : vector<16x24x4xf32> to vector<16x16x4xf32>
    %16 = vector.extract_strided_slice %6 {offsets = [0, 0, 0], sizes = [1, 16, 4], strides = [1, 1, 1]} : vector<1x24x4xf32> to vector<1x16x4xf32>
    %17 = vector.extract_strided_slice %10 {offsets = [0, 0, 0], sizes = [1, 16, 4], strides = [1, 1, 1]} : vector<1x24x4xf32> to vector<1x16x4xf32>
    %c0_17 = arith.constant 0 : index
    %c0_18 = arith.constant 0 : index
    %c0_19 = arith.constant 0 : index
    %18 = vector.load %arg8[%c0_17, %c0_18, %c0_19] : memref<16x16x128xf32, #tpu.memory_space<vmem>>, vector<16x16x128xf32>
    %c1 = arith.constant 1 : index
    %c0_20 = arith.constant 0 : index
    %c0_21 = arith.constant 0 : index
    %c0_22 = arith.constant 0 : index
    %19 = vector.load %arg5[%c1, %c0_20, %c0_21, %c0_22] : memref<3x3x4x128xf32, #tpu.memory_space<vmem>>, vector<1x1x4x128xf32>
    %20 = vector.shape_cast %19 : vector<1x1x4x128xf32> to vector<4x128xf32>
    %21 = vector.shape_cast %15 : vector<16x16x4xf32> to vector<256x4xf32>
    %cst_23 = arith.constant dense<0.000000e+00> : vector<256x128xf32>
    %22 = tpu.matmul %21, %20, %cst_23 {dimension_numbers = #tpu.dot_dimension_numbers<[1], [0], [0], [1], [0, 0, 1, 1], [], []>} : vector<256x4xf32>, vector<4x128xf32>, vector<256x128xf32> -> vector<256x128xf32>
    %23 = vector.shape_cast %22 : vector<256x128xf32> to vector<16x16x128xf32>
    %24 = arith.addf %18, %23 : vector<16x16x128xf32>
    %c0_24 = arith.constant 0 : index
    %c0_25 = arith.constant 0 : index
    %c0_26 = arith.constant 0 : index
    %25 = vector.load %arg8[%c0_24, %c0_25, %c0_26] : memref<16x16x128xf32, #tpu.memory_space<vmem>>, vector<16x16x128xf32>
    tpu.vector_store %arg8[%c0_24, %c0_25, %c0_26], %24 {strides = array<i32>} : memref<16x16x128xf32, #tpu.memory_space<vmem>>, vector<16x16x128xf32>,
    %c0_27 = arith.constant 0 : index
    %c0_28 = arith.constant 0 : index
    %c0_29 = arith.constant 0 : index
    %26 = vector.load %arg8[%c0_27, %c0_28, %c0_29] : memref<16x16x128xf32, #tpu.memory_space<vmem>>, vector<1x16x128xf32>
    %c0_30 = arith.constant 0 : index
    %c0_31 = arith.constant 0 : index
    %c0_32 = arith.constant 0 : index
    %c0_33 = arith.constant 0 : index
    %27 = vector.load %arg5[%c0_30, %c0_31, %c0_32, %c0_33] : memref<3x3x4x128xf32, #tpu.memory_space<vmem>>, vector<1x1x4x128xf32>
    %28 = vector.shape_cast %27 : vector<1x1x4x128xf32> to vector<4x128xf32>
    %29 = vector.shape_cast %16 : vector<1x16x4xf32> to vector<16x4xf32>
    %cst_34 = arith.constant dense<0.000000e+00> : vector<16x128xf32>
    %30 = tpu.matmul %29, %28, %cst_34 {dimension_numbers = #tpu.dot_dimension_numbers<[1], [0], [0], [1], [0, 0, 1, 1], [], []>} : vector<16x4xf32>, vector<4x128xf32>, vector<16x128xf32> -> vector<16x128xf32>
    %31 = vector.shape_cast %30 : vector<16x128xf32> to vector<1x16x128xf32>
    %32 = arith.addf %26, %31 : vector<1x16x128xf32>
    %c0_35 = arith.constant 0 : index
    %c0_36 = arith.constant 0 : index
    %c0_37 = arith.constant 0 : index
    %33 = vector.load %arg8[%c0_35, %c0_36, %c0_37] : memref<16x16x128xf32, #tpu.memory_space<vmem>>, vector<1x16x128xf32>
    tpu.vector_store %arg8[%c0_35, %c0_36, %c0_37], %32 {strides = array<i32>} : memref<16x16x128xf32, #tpu.memory_space<vmem>>, vector<1x16x128xf32>,
    %c1_38 = arith.constant 1 : index
    %c0_39 = arith.constant 0 : index
    %c0_40 = arith.constant 0 : index
    %34 = vector.load %arg8[%c1_38, %c0_39, %c0_40] : memref<16x16x128xf32, #tpu.memory_space<vmem>>, vector<15x16x128xf32>
    %35 = vector.extract_strided_slice %15 {offsets = [0, 0, 0], sizes = [15, 16, 4], strides = [1, 1, 1]} : vector<16x16x4xf32> to vector<15x16x4xf32>
    %c0_41 = arith.constant 0 : index
    %c0_42 = arith.constant 0 : index
    %c0_43 = arith.constant 0 : index
    %c0_44 = arith.constant 0 : index
    %36 = vector.load %arg5[%c0_41, %c0_42, %c0_43, %c0_44] : memref<3x3x4x128xf32, #tpu.memory_space<vmem>>, vector<1x1x4x128xf32>
    %37 = vector.shape_cast %36 : vector<1x1x4x128xf32> to vector<4x128xf32>
    %38 = vector.shape_cast %35 : vector<15x16x4xf32> to vector<240x4xf32>
    %cst_45 = arith.constant dense<0.000000e+00> : vector<240x128xf32>
    %39 = tpu.matmul %38, %37, %cst_45 {dimension_numbers = #tpu.dot_dimension_numbers<[1], [0], [0], [1], [0, 0, 1, 1], [], []>} : vector<240x4xf32>, vector<4x128xf32>, vector<240x128xf32> -> vector<240x128xf32>
    %40 = vector.shape_cast %39 : vector<240x128xf32> to vector<15x16x128xf32>
    %41 = arith.addf %34, %40 : vector<15x16x128xf32>
    %c1_46 = arith.constant 1 : index
    %c0_47 = arith.constant 0 : index
    %c0_48 = arith.constant 0 : index
    %42 = vector.load %arg8[%c1_46, %c0_47, %c0_48] : memref<16x16x128xf32, #tpu.memory_space<vmem>>, vector<15x16x128xf32>
    tpu.vector_store %arg8[%c1_46, %c0_47, %c0_48], %41 {strides = array<i32>} : memref<16x16x128xf32, #tpu.memory_space<vmem>>, vector<15x16x128xf32>,
    %c15 = arith.constant 15 : index
    %c0_49 = arith.constant 0 : index
    %c0_50 = arith.constant 0 : index
    %43 = vector.load %arg8[%c15, %c0_49, %c0_50] : memref<16x16x128xf32, #tpu.memory_space<vmem>>, vector<1x16x128xf32>
    %c2 = arith.constant 2 : index
    %c0_51 = arith.constant 0 : index
    %c0_52 = arith.constant 0 : index
    %c0_53 = arith.constant 0 : index
    %44 = vector.load %arg5[%c2, %c0_51, %c0_52, %c0_53] : memref<3x3x4x128xf32, #tpu.memory_space<vmem>>, vector<1x1x4x128xf32>
    %45 = vector.shape_cast %44 : vector<1x1x4x128xf32> to vector<4x128xf32>
    %46 = vector.shape_cast %17 : vector<1x16x4xf32> to vector<16x4xf32>
    %cst_54 = arith.constant dense<0.000000e+00> : vector<16x128xf32>
    %47 = tpu.matmul %46, %45, %cst_54 {dimension_numbers = #tpu.dot_dimension_numbers<[1], [0], [0], [1], [0, 0, 1, 1], [], []>} : vector<16x4xf32>, vector<4x128xf32>, vector<16x128xf32> -> vector<16x128xf32>
    %48 = vector.shape_cast %47 : vector<16x128xf32> to vector<1x16x128xf32>
    %49 = arith.addf %43, %48 : vector<1x16x128xf32>
    %c15_55 = arith.constant 15 : index
    %c0_56 = arith.constant 0 : index
    %c0_57 = arith.constant 0 : index
    %50 = vector.load %arg8[%c15_55, %c0_56, %c0_57] : memref<16x16x128xf32, #tpu.memory_space<vmem>>, vector<1x16x128xf32>
    tpu.vector_store %arg8[%c15_55, %c0_56, %c0_57], %49 {strides = array<i32>} : memref<16x16x128xf32, #tpu.memory_space<vmem>>, vector<1x16x128xf32>,
    %c0_58 = arith.constant 0 : index
    %c0_59 = arith.constant 0 : index
    %c0_60 = arith.constant 0 : index
    %51 = vector.load %arg8[%c0_58, %c0_59, %c0_60] : memref<16x16x128xf32, #tpu.memory_space<vmem>>, vector<15x16x128xf32>
    %52 = vector.extract_strided_slice %15 {offsets = [1, 0, 0], sizes = [15, 16, 4], strides = [1, 1, 1]} : vector<16x16x4xf32> to vector<15x16x4xf32>
    %c2_61 = arith.constant 2 : index
    %c0_62 = arith.constant 0 : index
    %c0_63 = arith.constant 0 : index
    %c0_64 = arith.constant 0 : index
    %53 = vector.load %arg5[%c2_61, %c0_62, %c0_63, %c0_64] : memref<3x3x4x128xf32, #tpu.memory_space<vmem>>, vector<1x1x4x128xf32>
    %54 = vector.shape_cast %53 : vector<1x1x4x128xf32> to vector<4x128xf32>
    %55 = vector.shape_cast %52 : vector<15x16x4xf32> to vector<240x4xf32>
    %cst_65 = arith.constant dense<0.000000e+00> : vector<240x128xf32>
    %56 = tpu.matmul %55, %54, %cst_65 {dimension_numbers = #tpu.dot_dimension_numbers<[1], [0], [0], [1], [0, 0, 1, 1], [], []>} : vector<240x4xf32>, vector<4x128xf32>, vector<240x128xf32> -> vector<240x128xf32>
    %57 = vector.shape_cast %56 : vector<240x128xf32> to vector<15x16x128xf32>
    %58 = arith.addf %51, %57 : vector<15x16x128xf32>
    %c0_66 = arith.constant 0 : index
    %c0_67 = arith.constant 0 : index
    %c0_68 = arith.constant 0 : index
    %59 = vector.load %arg8[%c0_66, %c0_67, %c0_68] : memref<16x16x128xf32, #tpu.memory_space<vmem>>, vector<15x16x128xf32>
    tpu.vector_store %arg8[%c0_66, %c0_67, %c0_68], %58 {strides = array<i32>} : memref<16x16x128xf32, #tpu.memory_space<vmem>>, vector<15x16x128xf32>,
    %60 = vector.extract_strided_slice %1 {offsets = [0, 1, 0], sizes = [16, 16, 4], strides = [1, 1, 1]} : vector<16x24x4xf32> to vector<16x16x4xf32>
    %61 = vector.extract_strided_slice %6 {offsets = [0, 1, 0], sizes = [1, 16, 4], strides = [1, 1, 1]} : vector<1x24x4xf32> to vector<1x16x4xf32>
    %62 = vector.extract_strided_slice %10 {offsets = [0, 1, 0], sizes = [1, 16, 4], strides = [1, 1, 1]} : vector<1x24x4xf32> to vector<1x16x4xf32>
    %c0_69 = arith.constant 0 : index
    %c0_70 = arith.constant 0 : index
    %c0_71 = arith.constant 0 : index
    %63 = vector.load %arg8[%c0_69, %c0_70, %c0_71] : memref<16x16x128xf32, #tpu.memory_space<vmem>>, vector<16x16x128xf32>
    %c1_72 = arith.constant 1 : index
    %c1_73 = arith.constant 1 : index
    %c0_74 = arith.constant 0 : index
    %c0_75 = arith.constant 0 : index
    %64 = vector.load %arg5[%c1_72, %c1_73, %c0_74, %c0_75] : memref<3x3x4x128xf32, #tpu.memory_space<vmem>>, vector<1x1x4x128xf32>
    %65 = vector.shape_cast %64 : vector<1x1x4x128xf32> to vector<4x128xf32>
    %66 = vector.shape_cast %60 : vector<16x16x4xf32> to vector<256x4xf32>
    %cst_76 = arith.constant dense<0.000000e+00> : vector<256x128xf32>
    %67 = tpu.matmul %66, %65, %cst_76 {dimension_numbers = #tpu.dot_dimension_numbers<[1], [0], [0], [1], [0, 0, 1, 1], [], []>} : vector<256x4xf32>, vector<4x128xf32>, vector<256x128xf32> -> vector<256x128xf32>
    %68 = vector.shape_cast %67 : vector<256x128xf32> to vector<16x16x128xf32>
    %69 = arith.addf %63, %68 : vector<16x16x128xf32>
    %c0_77 = arith.constant 0 : index
    %c0_78 = arith.constant 0 : index
    %c0_79 = arith.constant 0 : index
    %70 = vector.load %arg8[%c0_77, %c0_78, %c0_79] : memref<16x16x128xf32, #tpu.memory_space<vmem>>, vector<16x16x128xf32>
    tpu.vector_store %arg8[%c0_77, %c0_78, %c0_79], %69 {strides = array<i32>} : memref<16x16x128xf32, #tpu.memory_space<vmem>>, vector<16x16x128xf32>,
    %c0_80 = arith.constant 0 : index
    %c0_81 = arith.constant 0 : index
    %c0_82 = arith.constant 0 : index
    %71 = vector.load %arg8[%c0_80, %c0_81, %c0_82] : memref<16x16x128xf32, #tpu.memory_space<vmem>>, vector<1x16x128xf32>
    %c0_83 = arith.constant 0 : index
    %c1_84 = arith.constant 1 : index
    %c0_85 = arith.constant 0 : index
    %c0_86 = arith.constant 0 : index
    %72 = vector.load %arg5[%c0_83, %c1_84, %c0_85, %c0_86] : memref<3x3x4x128xf32, #tpu.memory_space<vmem>>, vector<1x1x4x128xf32>
    %73 = vector.shape_cast %72 : vector<1x1x4x128xf32> to vector<4x128xf32>
    %74 = vector.shape_cast %61 : vector<1x16x4xf32> to vector<16x4xf32>
    %cst_87 = arith.constant dense<0.000000e+00> : vector<16x128xf32>
    %75 = tpu.matmul %74, %73, %cst_87 {dimension_numbers = #tpu.dot_dimension_numbers<[1], [0], [0], [1], [0, 0, 1, 1], [], []>} : vector<16x4xf32>, vector<4x128xf32>, vector<16x128xf32> -> vector<16x128xf32>
    %76 = vector.shape_cast %75 : vector<16x128xf32> to vector<1x16x128xf32>
    %77 = arith.addf %71, %76 : vector<1x16x128xf32>
    %c0_88 = arith.constant 0 : index
    %c0_89 = arith.constant 0 : index
    %c0_90 = arith.constant 0 : index
    %78 = vector.load %arg8[%c0_88, %c0_89, %c0_90] : memref<16x16x128xf32, #tpu.memory_space<vmem>>, vector<1x16x128xf32>
    tpu.vector_store %arg8[%c0_88, %c0_89, %c0_90], %77 {strides = array<i32>} : memref<16x16x128xf32, #tpu.memory_space<vmem>>, vector<1x16x128xf32>,
    %c1_91 = arith.constant 1 : index
    %c0_92 = arith.constant 0 : index
    %c0_93 = arith.constant 0 : index
    %79 = vector.load %arg8[%c1_91, %c0_92, %c0_93] : memref<16x16x128xf32, #tpu.memory_space<vmem>>, vector<15x16x128xf32>
    %80 = vector.extract_strided_slice %60 {offsets = [0, 0, 0], sizes = [15, 16, 4], strides = [1, 1, 1]} : vector<16x16x4xf32> to vector<15x16x4xf32>
    %c0_94 = arith.constant 0 : index
    %c1_95 = arith.constant 1 : index
    %c0_96 = arith.constant 0 : index
    %c0_97 = arith.constant 0 : index
    %81 = vector.load %arg5[%c0_94, %c1_95, %c0_96, %c0_97] : memref<3x3x4x128xf32, #tpu.memory_space<vmem>>, vector<1x1x4x128xf32>
    %82 = vector.shape_cast %81 : vector<1x1x4x128xf32> to vector<4x128xf32>
    %83 = vector.shape_cast %80 : vector<15x16x4xf32> to vector<240x4xf32>
    %cst_98 = arith.constant dense<0.000000e+00> : vector<240x128xf32>
    %84 = tpu.matmul %83, %82, %cst_98 {dimension_numbers = #tpu.dot_dimension_numbers<[1], [0], [0], [1], [0, 0, 1, 1], [], []>} : vector<240x4xf32>, vector<4x128xf32>, vector<240x128xf32> -> vector<240x128xf32>
    %85 = vector.shape_cast %84 : vector<240x128xf32> to vector<15x16x128xf32>
    %86 = arith.addf %79, %85 : vector<15x16x128xf32>
    %c1_99 = arith.constant 1 : index
    %c0_100 = arith.constant 0 : index
    %c0_101 = arith.constant 0 : index
    %87 = vector.load %arg8[%c1_99, %c0_100, %c0_101] : memref<16x16x128xf32, #tpu.memory_space<vmem>>, vector<15x16x128xf32>
    tpu.vector_store %arg8[%c1_99, %c0_100, %c0_101], %86 {strides = array<i32>} : memref<16x16x128xf32, #tpu.memory_space<vmem>>, vector<15x16x128xf32>,
    %c15_102 = arith.constant 15 : index
    %c0_103 = arith.constant 0 : index
    %c0_104 = arith.constant 0 : index
    %88 = vector.load %arg8[%c15_102, %c0_103, %c0_104] : memref<16x16x128xf32, #tpu.memory_space<vmem>>, vector<1x16x128xf32>
    %c2_105 = arith.constant 2 : index
    %c1_106 = arith.constant 1 : index
    %c0_107 = arith.constant 0 : index
    %c0_108 = arith.constant 0 : index
    %89 = vector.load %arg5[%c2_105, %c1_106, %c0_107, %c0_108] : memref<3x3x4x128xf32, #tpu.memory_space<vmem>>, vector<1x1x4x128xf32>
    %90 = vector.shape_cast %89 : vector<1x1x4x128xf32> to vector<4x128xf32>
    %91 = vector.shape_cast %62 : vector<1x16x4xf32> to vector<16x4xf32>
    %cst_109 = arith.constant dense<0.000000e+00> : vector<16x128xf32>
    %92 = tpu.matmul %91, %90, %cst_109 {dimension_numbers = #tpu.dot_dimension_numbers<[1], [0], [0], [1], [0, 0, 1, 1], [], []>} : vector<16x4xf32>, vector<4x128xf32>, vector<16x128xf32> -> vector<16x128xf32>
    %93 = vector.shape_cast %92 : vector<16x128xf32> to vector<1x16x128xf32>
    %94 = arith.addf %88, %93 : vector<1x16x128xf32>
    %c15_110 = arith.constant 15 : index
    %c0_111 = arith.constant 0 : index
    %c0_112 = arith.constant 0 : index
    %95 = vector.load %arg8[%c15_110, %c0_111, %c0_112] : memref<16x16x128xf32, #tpu.memory_space<vmem>>, vector<1x16x128xf32>
    tpu.vector_store %arg8[%c15_110, %c0_111, %c0_112], %94 {strides = array<i32>} : memref<16x16x128xf32, #tpu.memory_space<vmem>>, vector<1x16x128xf32>,
    %c0_113 = arith.constant 0 : index
    %c0_114 = arith.constant 0 : index
    %c0_115 = arith.constant 0 : index
    %96 = vector.load %arg8[%c0_113, %c0_114, %c0_115] : memref<16x16x128xf32, #tpu.memory_space<vmem>>, vector<15x16x128xf32>
    %97 = vector.extract_strided_slice %60 {offsets = [1, 0, 0], sizes = [15, 16, 4], strides = [1, 1, 1]} : vector<16x16x4xf32> to vector<15x16x4xf32>
    %c2_116 = arith.constant 2 : index
    %c1_117 = arith.constant 1 : index
    %c0_118 = arith.constant 0 : index
    %c0_119 = arith.constant 0 : index
    %98 = vector.load %arg5[%c2_116, %c1_117, %c0_118, %c0_119] : memref<3x3x4x128xf32, #tpu.memory_space<vmem>>, vector<1x1x4x128xf32>
    %99 = vector.shape_cast %98 : vector<1x1x4x128xf32> to vector<4x128xf32>
    %100 = vector.shape_cast %97 : vector<15x16x4xf32> to vector<240x4xf32>
    %cst_120 = arith.constant dense<0.000000e+00> : vector<240x128xf32>
    %101 = tpu.matmul %100, %99, %cst_120 {dimension_numbers = #tpu.dot_dimension_numbers<[1], [0], [0], [1], [0, 0, 1, 1], [], []>} : vector<240x4xf32>, vector<4x128xf32>, vector<240x128xf32> -> vector<240x128xf32>
    %102 = vector.shape_cast %101 : vector<240x128xf32> to vector<15x16x128xf32>
    %103 = arith.addf %96, %102 : vector<15x16x128xf32>
    %c0_121 = arith.constant 0 : index
    %c0_122 = arith.constant 0 : index
    %c0_123 = arith.constant 0 : index
    %104 = vector.load %arg8[%c0_121, %c0_122, %c0_123] : memref<16x16x128xf32, #tpu.memory_space<vmem>>, vector<15x16x128xf32>
    tpu.vector_store %arg8[%c0_121, %c0_122, %c0_123], %103 {strides = array<i32>} : memref<16x16x128xf32, #tpu.memory_space<vmem>>, vector<15x16x128xf32>,
    %105 = vector.extract_strided_slice %1 {offsets = [0, 2, 0], sizes = [16, 16, 4], strides = [1, 1, 1]} : vector<16x24x4xf32> to vector<16x16x4xf32>
    %106 = vector.extract_strided_slice %6 {offsets = [0, 2, 0], sizes = [1, 16, 4], strides = [1, 1, 1]} : vector<1x24x4xf32> to vector<1x16x4xf32>
    %107 = vector.extract_strided_slice %10 {offsets = [0, 2, 0], sizes = [1, 16, 4], strides = [1, 1, 1]} : vector<1x24x4xf32> to vector<1x16x4xf32>
    %c0_124 = arith.constant 0 : index
    %c0_125 = arith.constant 0 : index
    %c0_126 = arith.constant 0 : index
    %108 = vector.load %arg8[%c0_124, %c0_125, %c0_126] : memref<16x16x128xf32, #tpu.memory_space<vmem>>, vector<16x16x128xf32>
    %c1_127 = arith.constant 1 : index
    %c2_128 = arith.constant 2 : index
    %c0_129 = arith.constant 0 : index
    %c0_130 = arith.constant 0 : index
    %109 = vector.load %arg5[%c1_127, %c2_128, %c0_129, %c0_130] : memref<3x3x4x128xf32, #tpu.memory_space<vmem>>, vector<1x1x4x128xf32>
    %110 = vector.shape_cast %109 : vector<1x1x4x128xf32> to vector<4x128xf32>
    %111 = vector.shape_cast %105 : vector<16x16x4xf32> to vector<256x4xf32>
    %cst_131 = arith.constant dense<0.000000e+00> : vector<256x128xf32>
    %112 = tpu.matmul %111, %110, %cst_131 {dimension_numbers = #tpu.dot_dimension_numbers<[1], [0], [0], [1], [0, 0, 1, 1], [], []>} : vector<256x4xf32>, vector<4x128xf32>, vector<256x128xf32> -> vector<256x128xf32>
    %113 = vector.shape_cast %112 : vector<256x128xf32> to vector<16x16x128xf32>
    %114 = arith.addf %108, %113 : vector<16x16x128xf32>
    %c0_132 = arith.constant 0 : index
    %c0_133 = arith.constant 0 : index
    %c0_134 = arith.constant 0 : index
    %115 = vector.load %arg8[%c0_132, %c0_133, %c0_134] : memref<16x16x128xf32, #tpu.memory_space<vmem>>, vector<16x16x128xf32>
    tpu.vector_store %arg8[%c0_132, %c0_133, %c0_134], %114 {strides = array<i32>} : memref<16x16x128xf32, #tpu.memory_space<vmem>>, vector<16x16x128xf32>,
    %c0_135 = arith.constant 0 : index
    %c0_136 = arith.constant 0 : index
    %c0_137 = arith.constant 0 : index
    %116 = vector.load %arg8[%c0_135, %c0_136, %c0_137] : memref<16x16x128xf32, #tpu.memory_space<vmem>>, vector<1x16x128xf32>
    %c0_138 = arith.constant 0 : index
    %c2_139 = arith.constant 2 : index
    %c0_140 = arith.constant 0 : index
    %c0_141 = arith.constant 0 : index
    %117 = vector.load %arg5[%c0_138, %c2_139, %c0_140, %c0_141] : memref<3x3x4x128xf32, #tpu.memory_space<vmem>>, vector<1x1x4x128xf32>
    %118 = vector.shape_cast %117 : vector<1x1x4x128xf32> to vector<4x128xf32>
    %119 = vector.shape_cast %106 : vector<1x16x4xf32> to vector<16x4xf32>
    %cst_142 = arith.constant dense<0.000000e+00> : vector<16x128xf32>
    %120 = tpu.matmul %119, %118, %cst_142 {dimension_numbers = #tpu.dot_dimension_numbers<[1], [0], [0], [1], [0, 0, 1, 1], [], []>} : vector<16x4xf32>, vector<4x128xf32>, vector<16x128xf32> -> vector<16x128xf32>
    %121 = vector.shape_cast %120 : vector<16x128xf32> to vector<1x16x128xf32>
    %122 = arith.addf %116, %121 : vector<1x16x128xf32>
    %c0_143 = arith.constant 0 : index
    %c0_144 = arith.constant 0 : index
    %c0_145 = arith.constant 0 : index
    %123 = vector.load %arg8[%c0_143, %c0_144, %c0_145] : memref<16x16x128xf32, #tpu.memory_space<vmem>>, vector<1x16x128xf32>
    tpu.vector_store %arg8[%c0_143, %c0_144, %c0_145], %122 {strides = array<i32>} : memref<16x16x128xf32, #tpu.memory_space<vmem>>, vector<1x16x128xf32>,
    %c1_146 = arith.constant 1 : index
    %c0_147 = arith.constant 0 : index
    %c0_148 = arith.constant 0 : index
    %124 = vector.load %arg8[%c1_146, %c0_147, %c0_148] : memref<16x16x128xf32, #tpu.memory_space<vmem>>, vector<15x16x128xf32>
    %125 = vector.extract_strided_slice %105 {offsets = [0, 0, 0], sizes = [15, 16, 4], strides = [1, 1, 1]} : vector<16x16x4xf32> to vector<15x16x4xf32>
    %c0_149 = arith.constant 0 : index
    %c2_150 = arith.constant 2 : index
    %c0_151 = arith.constant 0 : index
    %c0_152 = arith.constant 0 : index
    %126 = vector.load %arg5[%c0_149, %c2_150, %c0_151, %c0_152] : memref<3x3x4x128xf32, #tpu.memory_space<vmem>>, vector<1x1x4x128xf32>
    %127 = vector.shape_cast %126 : vector<1x1x4x128xf32> to vector<4x128xf32>
    %128 = vector.shape_cast %125 : vector<15x16x4xf32> to vector<240x4xf32>
    %cst_153 = arith.constant dense<0.000000e+00> : vector<240x128xf32>
    %129 = tpu.matmul %128, %127, %cst_153 {dimension_numbers = #tpu.dot_dimension_numbers<[1], [0], [0], [1], [0, 0, 1, 1], [], []>} : vector<240x4xf32>, vector<4x128xf32>, vector<240x128xf32> -> vector<240x128xf32>
    %130 = vector.shape_cast %129 : vector<240x128xf32> to vector<15x16x128xf32>
    %131 = arith.addf %124, %130 : vector<15x16x128xf32>
    %c1_154 = arith.constant 1 : index
    %c0_155 = arith.constant 0 : index
    %c0_156 = arith.constant 0 : index
    %132 = vector.load %arg8[%c1_154, %c0_155, %c0_156] : memref<16x16x128xf32, #tpu.memory_space<vmem>>, vector<15x16x128xf32>
    tpu.vector_store %arg8[%c1_154, %c0_155, %c0_156], %131 {strides = array<i32>} : memref<16x16x128xf32, #tpu.memory_space<vmem>>, vector<15x16x128xf32>,
    %c15_157 = arith.constant 15 : index
    %c0_158 = arith.constant 0 : index
    %c0_159 = arith.constant 0 : index
    %133 = vector.load %arg8[%c15_157, %c0_158, %c0_159] : memref<16x16x128xf32, #tpu.memory_space<vmem>>, vector<1x16x128xf32>
    %c2_160 = arith.constant 2 : index
    %c2_161 = arith.constant 2 : index
    %c0_162 = arith.constant 0 : index
    %c0_163 = arith.constant 0 : index
    %134 = vector.load %arg5[%c2_160, %c2_161, %c0_162, %c0_163] : memref<3x3x4x128xf32, #tpu.memory_space<vmem>>, vector<1x1x4x128xf32>
    %135 = vector.shape_cast %134 : vector<1x1x4x128xf32> to vector<4x128xf32>
    %136 = vector.shape_cast %107 : vector<1x16x4xf32> to vector<16x4xf32>
    %cst_164 = arith.constant dense<0.000000e+00> : vector<16x128xf32>
    %137 = tpu.matmul %136, %135, %cst_164 {dimension_numbers = #tpu.dot_dimension_numbers<[1], [0], [0], [1], [0, 0, 1, 1], [], []>} : vector<16x4xf32>, vector<4x128xf32>, vector<16x128xf32> -> vector<16x128xf32>
    %138 = vector.shape_cast %137 : vector<16x128xf32> to vector<1x16x128xf32>
    %139 = arith.addf %133, %138 : vector<1x16x128xf32>
    %c15_165 = arith.constant 15 : index
    %c0_166 = arith.constant 0 : index
    %c0_167 = arith.constant 0 : index
    %140 = vector.load %arg8[%c15_165, %c0_166, %c0_167] : memref<16x16x128xf32, #tpu.memory_space<vmem>>, vector<1x16x128xf32>
    tpu.vector_store %arg8[%c15_165, %c0_166, %c0_167], %139 {strides = array<i32>} : memref<16x16x128xf32, #tpu.memory_space<vmem>>, vector<1x16x128xf32>,
    %c0_168 = arith.constant 0 : index
    %c0_169 = arith.constant 0 : index
    %c0_170 = arith.constant 0 : index
    %141 = vector.load %arg8[%c0_168, %c0_169, %c0_170] : memref<16x16x128xf32, #tpu.memory_space<vmem>>, vector<15x16x128xf32>
    %142 = vector.extract_strided_slice %105 {offsets = [1, 0, 0], sizes = [15, 16, 4], strides = [1, 1, 1]} : vector<16x16x4xf32> to vector<15x16x4xf32>
    %c2_171 = arith.constant 2 : index
    %c2_172 = arith.constant 2 : index
    %c0_173 = arith.constant 0 : index
    %c0_174 = arith.constant 0 : index
    %143 = vector.load %arg5[%c2_171, %c2_172, %c0_173, %c0_174] : memref<3x3x4x128xf32, #tpu.memory_space<vmem>>, vector<1x1x4x128xf32>
    %144 = vector.shape_cast %143 : vector<1x1x4x128xf32> to vector<4x128xf32>
    %145 = vector.shape_cast %142 : vector<15x16x4xf32> to vector<240x4xf32>
    %cst_175 = arith.constant dense<0.000000e+00> : vector<240x128xf32>
    %146 = tpu.matmul %145, %144, %cst_175 {dimension_numbers = #tpu.dot_dimension_numbers<[1], [0], [0], [1], [0, 0, 1, 1], [], []>} : vector<240x4xf32>, vector<4x128xf32>, vector<240x128xf32> -> vector<240x128xf32>
    %147 = vector.shape_cast %146 : vector<240x128xf32> to vector<15x16x128xf32>
    %148 = arith.addf %141, %147 : vector<15x16x128xf32>
    %c0_176 = arith.constant 0 : index
    %c0_177 = arith.constant 0 : index
    %c0_178 = arith.constant 0 : index
    %149 = vector.load %arg8[%c0_176, %c0_177, %c0_178] : memref<16x16x128xf32, #tpu.memory_space<vmem>>, vector<15x16x128xf32>
    tpu.vector_store %arg8[%c0_176, %c0_177, %c0_178], %148 {strides = array<i32>} : memref<16x16x128xf32, #tpu.memory_space<vmem>>, vector<15x16x128xf32>,
    %c0_179 = arith.constant 0 : index
    %c0_180 = arith.constant 0 : index
    %c0_181 = arith.constant 0 : index
    %150 = vector.load %arg8[%c0_179, %c0_180, %c0_181] : memref<16x16x128xf32, #tpu.memory_space<vmem>>, vector<16x16x128xf32>
    %151 = vector.shape_cast %150 : vector<16x16x128xf32> to vector<1x16x16x128xf32>
    %c0_182 = arith.constant 0 : index
    %c0_183 = arith.constant 0 : index
    %c0_184 = arith.constant 0 : index
    %c0_185 = arith.constant 0 : index
    %152 = vector.load %arg7[%c0_182, %c0_183, %c0_184, %c0_185] : memref<1x16x16x128xf32, #tpu.memory_space<vmem>>, vector<1x16x16x128xf32>
    tpu.vector_store %arg7[%c0_182, %c0_183, %c0_184, %c0_185], %151 {strides = array<i32>} : memref<1x16x16x128xf32, #tpu.memory_space<vmem>>, vector<1x16x16x128xf32>,
    return
  }
  func.func @transform_0(%arg0: i32, %arg1: i32) -> (i32, i32, i32, i32) {
    %c0_i32 = arith.constant 0 : i32
    %c0_i32_0 = arith.constant 0 : i32
    %c0_i32_1 = arith.constant 0 : i32
    return %arg0, %arg1, %c0_i32, %c0_i32_0 : i32, i32, i32, i32
  }
  func.func @transform_1(%arg0: i32, %arg1: i32) -> (i32, i32, i32, i32) {
    %c16_i32 = arith.constant 16 : i32
    %0 = arith.muli %arg1, %c16_i32 : i32
    %c1_i32 = arith.constant 1 : i32
    %1 = arith.subi %0, %c1_i32 : i32
    %c0_i32 = arith.constant 0 : i32
    %2 = arith.maxsi %1, %c0_i32 : i32
    %c0_i32_0 = arith.constant 0 : i32
    %c0_i32_1 = arith.constant 0 : i32
    %c0_i32_2 = arith.constant 0 : i32
    return %arg0, %2, %c0_i32_0, %c0_i32_1 : i32, i32, i32, i32
  }
  func.func @transform_2(%arg0: i32, %arg1: i32) -> (i32, i32, i32, i32) {
    %c1_i32 = arith.constant 1 : i32
    %0 = arith.addi %arg1, %c1_i32 : i32
    %c16_i32 = arith.constant 16 : i32
    %1 = arith.muli %0, %c16_i32 : i32
    %c15_i32 = arith.constant 15 : i32
    %2 = arith.minsi %1, %c15_i32 : i32
    %c0_i32 = arith.constant 0 : i32
    %c0_i32_0 = arith.constant 0 : i32
    %c0_i32_1 = arith.constant 0 : i32
    return %arg0, %2, %c0_i32, %c0_i32_0 : i32, i32, i32, i32
  }
  func.func @transform_3(%arg0: i32, %arg1: i32) -> (i32, i32, i32, i32) {
    %c0_i32 = arith.constant 0 : i32
    %c0_i32_0 = arith.constant 0 : i32
    %c0_i32_1 = arith.constant 0 : i32
    %c0_i32_2 = arith.constant 0 : i32
    %c0_i32_3 = arith.constant 0 : i32
    return %c0_i32, %c0_i32_0, %c0_i32_1, %c0_i32_2 : i32, i32, i32, i32
  }
  func.func @transform_4(%arg0: i32, %arg1: i32) -> (i32, i32) {
    %c0_i32 = arith.constant 0 : i32
    %c0_i32_0 = arith.constant 0 : i32
    %c0_i32_1 = arith.constant 0 : i32
    return %c0_i32, %c0_i32_0 : i32, i32
  }
  func.func @transform_5(%arg0: i32, %arg1: i32) -> (i32, i32, i32, i32) {
    %c0_i32 = arith.constant 0 : i32
    %c0_i32_0 = arith.constant 0 : i32
    %c0_i32_1 = arith.constant 0 : i32
    return %arg0, %arg1, %c0_i32, %c0_i32_0 : i32, i32, i32, i32
  }
}

</mosaic_0001>

<bundles_post_ra>
// kernel: tpu_custom_call.1
= control target key start
LH: loop header
LB: loop body
LE: loop exit
PB: predicated region body
PF: predicated region fallthrough
CT: control target
= control target key end

     0   :  { %10 = vsyncpa [#allocation4], 0  ;;  %s5259_s0 = inlined_call_operand.vmem [shape: f32[2,16,24,4], index: 0, kind: input, shape index: {}]   ;;  %s5260_s1 = inlined_call_operand.vmem [shape: f32[2,16,24,4], index: 1, kind: input, shape index: {}]   ;;  %s5261_s2 = inlined_call_operand.vmem [shape: f32[2,16,24,4], index: 2, kind: input, shape index: {}]   ;;  %s5262_s3 = inlined_call_operand.vmem [shape: f32[3,3,4,128], index: 3, kind: input, shape index: {}]   ;;  %s5263_s4 = inlined_call_operand.vmem [shape: f32[1,128], index: 4, kind: input, shape index: {}]   ;;  %s5264_s5 = inlined_call_operand.hbm [shape: f32[2,16,16,128], index: 5, kind: output, shape index: {}]  }
   0x1   :  { %12 = vsyncpa [#allocation4 + $0x1], 0  ;;  %s3717_s18 = smov 0   ;;  %s3719_s19 = smov 0  }
   0x2   :  { %s3721_s20 = smov 0   ;;  %s3723_s1 = smov 0  }
   0x3   :  { %s3725_s2 = smov 0   ;;  %s3727_s21 = smov 0  }
   0x4 LB: > { %s3199_s22 = sadd.s32 4294967295, %s3682_s21   ;;  %s3200_s23 = sadd.s32 4294967294, %s3682_s21   ;;  %s3682_s21 = sphi %s3727_s21, %s18_s21   ;;  %s3678_s2 = sphi %s3725_s2, %s5569_s2   ;;  %s3674_s1 = sphi %s3723_s1, %s5568_s1   ;;  %s3670_s20 = sphi %s3721_s20, %s5567_s20   ;;  %s3666_s19 = sphi %s3719_s19, %s5566_s19   ;;  %s3662_s18 = sphi %s3717_s18, %s5565_s18  }
   0x5   : > { %s30_s24 = sadd.s32 1, %s3678_s2  ;;  %s181_s25 = sadd.s32 1, %s3670_s20 }
   0x6   : > { %p32_p0 = scmp.ge.s32.totalorder %s30_s24, 2  ;;  %p191_p1 = scmp.ne.s32.totalorder %s3670_s20, %s3666_s19 }
   0x7   : > { %p192_p2 = scmp.eq.s32.totalorder %s3199_s22, 1  ;;  %p197_p3 = scmp.ne.s32.totalorder %s3666_s19, %s3662_s18 }
   0x8   : > { %s5571_s24 = smov (%p32_p0, %s30_s24), 0  ;;  %p198_p5 = scmp.eq.s32.totalorder %s3200_s23, 1 }
   0x9   : > { %p3757_p4 = por %p192_p2, %p191_p1  ;;  %s176_s27 = ssub.s32 %s3678_s2, %s5571_s24 }
   0xa   : > { %p3203_p6 = scmp.ge.s32.totalorder %s3682_s21, 1  ;;  %p179_p7 = scmp.eq.s32.totalorder %s176_s27, 0 }
   0xb   : > { %p3764_p8 = por %p198_p5, %p197_p3  ;;  %p276_p9 = scmp.lt.s32.totalorder %s3682_s21, 3 }
   0xc   : > { %s3770_s29 = scalar_select %p179_p7, %s3670_s20, %s181_s25  }
   0xd   : > { %p277_p10 = pnand %p3203_p6, %p276_p9 }
   0xf   : > { %280 = sbr.rel (%p277_p10) target bundleno = 737 (0x2e1), region = 40 }
  0x14   : > { %v3208_v0 = vld [vmem:[%s5262_s3 + $0xc] sm:$0xf]  ;;  %vm616_vm0 = vcmask 1043456   ;;  %v867_v1 = vld [vmem:[%s5262_s3] sm:$0xf]  ;;  %p336_p11 = scmp.lt.s32.totalorder %s3674_s1, 1 }
  0x15   : > { %3209 = vmatpush.msk.msra.mxu0 %vm616_vm0, %v3208_v0  ;;  %3528 = vmatpush.msk.msra.mxu1 %vm616_vm0, %v3208_v0  ;;  %v3274_v2 = vld [vmem:[%s5262_s3 + $0x18] sm:$0xf]  ;;  %v3342_v3 = vld [vmem:[%s5262_s3 + $0x4] sm:$0xf]  ;;  %v799_v4 = vld [vmem:[%s5262_s3] sm:$0xf] }
  0x16   : > { %3529 = vmatpush.msk.msra.mxu3 %vm616_vm0, %v3208_v0  ;;  %3530 = vmatpush.msk.msra.mxu2 %vm616_vm0, %v867_v1  ;;  %s337_s13 = scalar_select %p336_p11, %s3674_s1, 1  ;;  %vm519_vm1 = vcmask 31744   ;;  %v3308_v14 = vld [vmem:[%s5262_s3 + $0x10] sm:$0xf]  ;;  %v3276_v15 = vld [vmem:[%s5262_s3 + $0x18] sm:$0xf] }
  0x17   : > { %3242 = vmatpush.msk.msrb.mxu1 %vm616_vm0, %v799_v4  ;;  %3243 = vmatpush.msk.msrb.mxu0 %vm616_vm0, %v867_v1  ;;  %v3448_v26 = vld [vmem:[%s5262_s3 + $0x8] sm:$0xf]  ;;  %v3378_v27 = vld [vmem:[%s5262_s3 + $0x1c] sm:$0xf]  ;;  %v5265_v28 = vmov 0.0   ;;  %vm1330_vm2 = vcmask 1046528  }
  0x18   : > { %3275 = vmatpush.msk.msrb.mxu3 %vm616_vm0, %v3274_v2  ;;  %3343 = vmatpush.msk.msrb.mxu2 %vm616_vm0, %v3342_v3  ;;  %s3531_s16 = smul.u32 384, %s337_s13  ;;  %v3382_v29 = vld [vmem:[%s5262_s3 + $0x1c] sm:$0xf]  ;;  %v3982_v42 = vrot.slane %v5265_v28, 1  ;;  %v3488_v45 = vld [vmem:[%s5262_s3 + $0x20] sm:$0xf] }
  0x19   : > { %vm2179_vm3 = vcmask 1045504   ;;  %s332_s9 = sand.u32 1, %s3666_s19   ;;  %s3624_s7 = scalar_lea.hbm %s5264_s5, 512 }
  0x1a   : > { %s3800_s23 = scalar_lea.vmem %s5259_s0, %s3531_s16  ;;  %s3204_s10 = sshll.u32 %s332_s9, 8 }
  0x1b   : > { %v3803_v5 = vld [vmem:[%s3800_s23] sm:$0xff]  ;;  %v3806_v6 = vld [vmem:[%s3800_s23 + $0xf0] sm:$0xff]  ;;  %v3809_v7 = vld [vmem:[%s3800_s23 + $0x138] sm:$0xff]  ;;  %s4918_s11 = scalar_lea.vmem [#allocation3], %s3204_s10  ;;  %s3057_s22 = scalar_lea.sflag [#allocation4], %s332_s9 }
  0x1c   : > { %3210 = vmatmul.msk.f32.vlgmr.msra.gmra.mxu0 %vm519_vm1, %v3803_v5  ;;  %3230 = vmatmul.msk.f32.vlgmr.msra.gmra.mxu1 %vm519_vm1, %v3806_v6  ;;  %v3820_v8 = vld [vmem:[%s3800_s23 + $0x8] sm:$0xff]  ;;  %v3823_v9 = vld [vmem:[%s3800_s23 + $0xf8] sm:$0xff]  ;;  %v3826_v10 = vld [vmem:[%s3800_s23 + $0x140] sm:$0xff]  ;;  %v1331_v31 = vrot.slane %v3803_v5, 1 }
  0x1d   : > { %3236 = vmatmul.msk.f32.vlgmr.msra.gmra.mxu3 %vm519_vm1, %v3809_v7  ;;  %3264 = vmatmul.msk.f32.vlgmr.msra.gmra.mxu2 %vm519_vm1, %v3806_v6  ;;  %v3837_v11 = vld [vmem:[%s3800_s23 + $0x18] sm:$0xff]  ;;  %v3840_v12 = vld [vmem:[%s3800_s23 + $0x108] sm:$0xff]  ;;  %v3843_v13 = vld [vmem:[%s3800_s23 + $0x150] sm:$0xff]  ;;  %v1332_v32 = vrot.slane %v3820_v8, 1 }
  0x1e   : > { %3309 = vmatpush.msk.msra.mxu3 %vm616_vm0, %v3308_v14  ;;  %3277 = vmatpush.msk.msra.mxu1 %vm616_vm0, %v3276_v15  ;;  %v3862_v16 = vld [vmem:[%s3800_s23 + $0x20] sm:$0xff]  ;;  %v3865_v17 = vld [vmem:[%s3800_s23 + $0x110] sm:$0xff]  ;;  %v3868_v18 = vld [vmem:[%s3800_s23 + $0x158] sm:$0xff]  ;;  %v1336_v39 = vrot.slane %v3837_v11, 1 }
  0x1f   : > { %v3879_v19 = vld [vmem:[%s3800_s23 + $0x30] sm:$0xff]  ;;  %v3882_v20 = vld [vmem:[%s3800_s23 + $0x120] sm:$0xff]  ;;  %v3885_v21 = vld [vmem:[%s3800_s23 + $0x168] sm:$0xff]  ;;  %3383 = vmatpush.msk.msra.mxu2 %vm616_vm0, %v3382_v29  ;;  %v3948_v34 = vsel %vm1330_vm2, %v1331_v31, %v1332_v32  ;;  %v1337_v40 = vrot.slane %v3862_v16, 1 }
  0x20   : > { %v3896_v22 = vld [vmem:[%s3800_s23 + $0x38] sm:$0xff]  ;;  %v3899_v23 = vld [vmem:[%s3800_s23 + $0x128] sm:$0xff]  ;;  %v3902_v24 = vld [vmem:[%s3800_s23 + $0x170] sm:$0xff]  ;;  %v1341_v49 = vrot.slane %v3879_v19, 1 }
  0x21   : > { %v3913_v25 = vld [vmem:[%s3800_s23 + $0x48] sm:$0xff]  ;;  %v3934_v30 = vld [vmem:[%s3800_s23 + $0x50] sm:$0xff]  ;;  %v3945_v33 = vld [vmem:[%s3800_s23 + $0x60] sm:$0xff]  ;;  %v3985_v43 = vsel %vm1330_vm2, %v1336_v39, %v1337_v40  ;;  %v1342_v50 = vrot.slane %v3896_v22, 1 }
  0x22   : > { %v3951_v35 = vld [vmem:[%s3800_s23 + $0x10] sm:$0xff]  ;;  %v3963_v37 = vld [vmem:[%s3800_s23 + $0x68] sm:$0xff]  ;;  %v3979_v41 = vld [vmem:[%s3800_s23 + $0x78] sm:$0xff]  ;;  %v1346_v57 = vrot.slane %v3913_v25, 1  ;;  %v1347_v58 = vrot.slane %v3934_v30, 1  ;;  %v1351_v1 = vrot.slane %v3945_v33, 1 }
  0x23   : > { %v1334_v36 = vrot.slane %v3951_v35, 1  ;;  %v3988_v44 = vld [vmem:[%s3800_s23 + $0x28] sm:$0xff]  ;;  %v4004_v47 = vld [vmem:[%s3800_s23 + $0x80] sm:$0xff]  ;;  %v4020_v51 = vld [vmem:[%s3800_s23 + $0x90] sm:$0xff]  ;;  %v4023_v52 = vsel %vm1330_vm2, %v1341_v49, %v1342_v50  ;;  %v1352_v2 = vrot.slane %v3963_v37, 1 }
  0x24   : > { %3211 = vmatmul.msk.f32.gmra.mxu0 %vm519_vm1, %v3820_v8  ;;  %3231 = vmatmul.msk.f32.gmra.mxu1 %vm519_vm1, %v3823_v9  ;;  %v1339_v46 = vrot.slane %v3988_v44, 1  ;;  %5302 = vst [vmem:[#allocation6_spill] sm:$0xff] %v4023_v52  ;;  %v4026_v53 = vld [vmem:[%s3800_s23 + $0x40] sm:$0xff]  ;;  %v4038_v55 = vld [vmem:[%s3800_s23 + $0x98] sm:$0xff]  ;;  %v4054_v59 = vld [vmem:[%s3800_s23 + $0xa8] sm:$0xff]  ;;  %v4057_v60 = vsel %vm1330_vm2, %v1346_v57, %v1347_v58  ;;  %v1357_v49 = vrot.slane %v4004_v47, 1 }
  0x25   : > { %3237 = vmatmul.msk.f32.gmra.mxu3 %vm519_vm1, %v3826_v10  ;;  %3265 = vmatmul.msk.f32.gmra.mxu2 %vm519_vm1, %v3823_v9  ;;  %v3966_v38 = vsel %vm1330_vm2, %v1332_v32, %v1334_v36  ;;  %5303 = vst [vmem:[#allocation7_spill] sm:$0xff] %v4026_v53  ;;  %v1344_v54 = vrot.slane %v4026_v53, 1  ;;  %v4060_v61 = vld [vmem:[%s3800_s23 + $0x58] sm:$0xff]  ;;  %v4072_v63 = vld [vmem:[%s3800_s23 + $0xb0] sm:$0xff]  ;;  %v4092_v14 = vld [vmem:[%s3800_s23 + $0xc0] sm:$0xff]  ;;  %v4095_v15 = vsel %vm1330_vm2, %v1351_v1, %v1352_v2 }
  0x26   : > { %v4007_v48 = vsel %vm1330_vm2, %v1337_v40, %v1339_v46  ;;  %5305 = vst [vmem:[#allocation9_spill] sm:$0xff] %v4057_v60  ;;  %v1349_v62 = vrot.slane %v4060_v61, 1  ;;  %v4116_v39 = vld [vmem:[%s3800_s23 + $0xc8] sm:$0xff]  ;;  %v1356_v46 = vrot.slane %v3979_v41, 1 }
  0x27   : > { %v4041_v56 = vsel %vm1330_vm2, %v1342_v50, %v1344_v54  ;;  %5306 = vst [vmem:[#allocation10_spill] sm:$0xff] %v4060_v61 }
  0x28   : > { %5304 = vst [vmem:[#allocation8_spill] sm:$0xff] %v4041_v56  ;;  %v4075_v0 = vsel %vm1330_vm2, %v1347_v58, %v1349_v62  ;;  %v4142_v62 = vld [vmem:[%s3800_s23 + $0xd8] sm:$0xff]  ;;  %v4145_v1 = vsel %vm1330_vm2, %v1356_v46, %v1357_v49 }
  0x29   : > { %5307 = vst [vmem:[#allocation11_spill] sm:$0xff] %v4075_v0 }
  0x2a   : > { %5309 = vst [vmem:[#allocation13_spill] sm:$0xff] %v4095_v15 }
  0x2b   : > { %5317 = vst [vmem:[#allocation21_spill] sm:$0xff] %v4145_v1 }
  0x2c   : > { %3212 = vmatmul.msk.f32.gmra.mxu0 %vm519_vm1, %v3837_v11  ;;  %3232 = vmatmul.msk.f32.gmra.mxu1 %vm519_vm1, %v3840_v12 }
  0x2d   : > { %3238 = vmatmul.msk.f32.gmra.mxu3 %vm519_vm1, %v3843_v13  ;;  %3266 = vmatmul.msk.f32.gmra.mxu2 %vm519_vm1, %v3840_v12 }
  0x34   : > { %3213 = vmatmul.msk.f32.gmra.mxu0 %vm519_vm1, %v3862_v16  ;;  %3233 = vmatmul.msk.f32.gmra.mxu1 %vm519_vm1, %v3865_v17 }
  0x35   : > { %3239 = vmatmul.msk.f32.gmra.mxu3 %vm519_vm1, %v3868_v18  ;;  %3267 = vmatmul.msk.f32.gmra.mxu2 %vm519_vm1, %v3865_v17 }
  0x3c   : > { %3214 = vmatmul.msk.f32.gmra.mxu0 %vm519_vm1, %v3879_v19  ;;  %3234 = vmatmul.msk.f32.gmra.mxu1 %vm519_vm1, %v3882_v20 }
  0x3d   : > { %3240 = vmatmul.msk.f32.gmra.mxu3 %vm519_vm1, %v3885_v21  ;;  %3268 = vmatmul.msk.f32.gmra.mxu2 %vm519_vm1, %v3882_v20 }
  0x44   : > { %3215 = vmatmul.msk.f32.gmra.mxu0 %vm519_vm1, %v3896_v22  ;;  %3235 = vmatmul.msk.f32.gmra.mxu1 %vm519_vm1, %v3899_v23 }
  0x45   : > { %3241 = vmatmul.msk.f32.gmra.mxu3 %vm519_vm1, %v3902_v24  ;;  %3269 = vmatmul.msk.f32.gmra.mxu2 %vm519_vm1, %v3899_v23 }
  0x4c   : > { %3216 = vmatmul.msk.f32.gmra.mxu0 %vm519_vm1, %v3913_v25  ;;  %825 = vmatmul.f32.vlgmr.msrb.gmra.mxu1 %v5265_v28 }
  0x4d   : > { %3270 = vmatmul.msk.f32.gmra.mxu2 %vm519_vm1, %v3809_v7  ;;  %1068 = vmatmul.f32.vlgmr.msrb.gmra.mxu3 %v5265_v28 }
  0x4e   : > { %3449 = vmatpush.msk.msrb.mxu3 %vm616_vm0, %v3448_v26  ;;  %3379 = vmatpush.msk.msrb.mxu1 %vm616_vm0, %v3378_v27  ;;  %v4098_v26 = vld [vmem:[%s3800_s23 + $0x70] sm:$0xff] }
  0x4f   : > { %5310 = vst [vmem:[#allocation14_spill] sm:$0xff] %v4098_v26  ;;  %v1354_v27 = vrot.slane %v4098_v26, 1 }
  0x51   : > { %v4119_v40 = vsel %vm1330_vm2, %v1352_v2, %v1354_v27  ;;  %v4148_v2 = vld [vmem:[%s3800_s23 + $0x88] sm:$0xff] }
  0x52   : > { %5313 = vst [vmem:[#allocation17_spill] sm:$0xff] %v4119_v40  ;;  %v1359_v27 = vrot.slane %v4148_v2, 1 }
  0x53   : > { %5318 = vst [vmem:[#allocation22_spill] sm:$0xff] %v4148_v2  ;;  %v1362_v2 = vrot.slane %v4038_v55, 1 }
  0x54   : > { %3217 = vmatmul.msk.f32.gmra.mxu0 %vm519_vm1, %v3934_v30  ;;  %828 = vmatmul.f32.gmra.mxu1 %v5265_v28 }
  0x55   : > { %3271 = vmatmul.msk.f32.gmra.mxu2 %vm519_vm1, %v3826_v10  ;;  %1071 = vmatmul.f32.gmra.mxu3 %v5265_v28 }
  0x5c   : > { %3218 = vmatmul.msk.f32.gmra.mxu0 %vm519_vm1, %v3945_v33  ;;  %3278 = vmatmul.msk.f32.vlgmr.msra.gmra.mxu1 %vm519_vm1, %v3837_v11 }
  0x5d   : > { %3272 = vmatmul.msk.f32.gmra.mxu2 %vm519_vm1, %v3843_v13  ;;  %3310 = vmatmul.msk.f32.vlgmr.msra.gmra.mxu3 %vm519_vm1, %v3948_v34 }
  0x64   : > { %3219 = vmatmul.msk.f32.gmra.mxu0 %vm519_vm1, %v3963_v37  ;;  %3279 = vmatmul.msk.f32.gmra.mxu1 %vm519_vm1, %v3862_v16 }
  0x65   : > { %3273 = vmatmul.msk.f32.gmra.mxu2 %vm519_vm1, %v3868_v18  ;;  %3311 = vmatmul.msk.f32.gmra.mxu3 %vm519_vm1, %v3966_v38 }
  0x6c   : > { %3220 = vmatmul.msk.f32.gmra.mxu0 %vm519_vm1, %v3979_v41  ;;  %3280 = vmatmul.msk.f32.gmra.mxu1 %vm519_vm1, %v3879_v19 }
  0x6d   : > { %3312 = vmatmul.msk.f32.gmra.mxu3 %vm519_vm1, %v3985_v43  ;;  %3344 = vmatmul.msk.f32.vlgmr.msrb.gmra.mxu2 %vm519_vm1, %v3982_v42 }
  0x6e   : > { %3489 = vmatpush.msk.msrb.mxu2 %vm616_vm0, %v3488_v45  ;;  %v3346_v45 = vld [vmem:[%s5262_s3 + $0x4] sm:$0xf] }
  0x6f   : > { %3347 = vmatpush.msk.msra.mxu0 %vm616_vm0, %v3346_v45 }
  0x74   : > { %3221 = vmatmul.msk.f32.gmra.mxu0 %vm519_vm1, %v4004_v47  ;;  %3281 = vmatmul.msk.f32.gmra.mxu1 %vm519_vm1, %v3896_v22 }
  0x75   : > { %3313 = vmatmul.msk.f32.gmra.mxu3 %vm519_vm1, %v4007_v48  ;;  %3345 = vmatmul.msk.f32.gmra.mxu2 %vm519_vm1, %v3982_v42 }
  0x7c   : > { %3222 = vmatmul.msk.f32.gmra.mxu0 %vm519_vm1, %v4020_v51  ;;  %3282 = vmatmul.msk.f32.gmra.mxu1 %vm519_vm1, %v3913_v25 }
  0x7d   : > { %3314 = vmatmul.msk.f32.gmra.mxu3 %vm519_vm1, %v4023_v52  ;;  %3384 = vmatmul.msk.f32.vlgmr.msra.gmra.mxu2 %vm519_vm1, %v3985_v43 }
  0x84   : > { %3223 = vmatmul.msk.f32.gmra.mxu0 %vm519_vm1, %v4038_v55  ;;  %3283 = vmatmul.msk.f32.gmra.mxu1 %vm519_vm1, %v3934_v30 }
  0x85   : > { %3315 = vmatmul.msk.f32.gmra.mxu3 %vm519_vm1, %v4041_v56  ;;  %3385 = vmatmul.msk.f32.gmra.mxu2 %vm519_vm1, %v4007_v48 }
  0x8c   : > { %3224 = vmatmul.msk.f32.gmra.mxu0 %vm519_vm1, %v4054_v59  ;;  %3284 = vmatmul.msk.f32.gmra.mxu1 %vm519_vm1, %v3945_v33 }
  0x8d   : > { %3316 = vmatmul.msk.f32.gmra.mxu3 %vm519_vm1, %v4057_v60  ;;  %3386 = vmatmul.msk.f32.gmra.mxu2 %vm519_vm1, %v4023_v52 }
  0x94   : > { %3225 = vmatmul.msk.f32.gmra.mxu0 %vm519_vm1, %v4072_v63  ;;  %3285 = vmatmul.msk.f32.gmra.mxu1 %vm519_vm1, %v3963_v37 }
  0x95   : > { %3317 = vmatmul.msk.f32.gmra.mxu3 %vm519_vm1, %v4075_v0  ;;  %3387 = vmatmul.msk.f32.gmra.mxu2 %vm519_vm1, %v4041_v56 }
  0x99   : > { %v4087_v3 = vpop.f32.mrf.mxu0  ;;  %v4089_v4 = vpop.f32.mrf.mxu1 }
  0x9a   : > { %5308 = vst [vmem:[#allocation12_spill] sm:$0xff] %v4089_v4  ;;  %v4166_v4 = vld [vmem:[%s3800_s23 + $0xe0] sm:$0xff] }
  0x9c   : > { %3226 = vmatmul.msk.f32.gmra.mxu0 %vm519_vm1, %v4092_v14  ;;  %3286 = vmatmul.msk.f32.gmra.mxu1 %vm519_vm1, %v3979_v41 }
  0x9d   : > { %3318 = vmatmul.msk.f32.gmra.mxu3 %vm519_vm1, %v4095_v15  ;;  %3388 = vmatmul.msk.f32.gmra.mxu2 %vm519_vm1, %v4057_v60 }
  0xa0   : > { %v715_v29 = vpop.f32.mrf.mxu3  ;;  %v4109_v31 = vpop.f32.mrf.mxu2 }
  0xa1   : > { %5311 = vst [vmem:[#allocation15_spill] sm:$0xff] %v4109_v31  ;;  %v4111_v32 = vpop.f32.mrf.mxu0  ;;  %v4113_v36 = vpop.f32.mrf.mxu1 }
  0xa2   : > { %5312 = vst [vmem:[#allocation16_spill] sm:$0xff] %v4113_v36 }
  0xa4   : > { %3227 = vmatmul.msk.f32.gmra.mxu0 %vm519_vm1, %v4116_v39  ;;  %3287 = vmatmul.msk.f32.gmra.mxu1 %vm519_vm1, %v4004_v47 }
  0xa5   : > { %3319 = vmatmul.msk.f32.gmra.mxu3 %vm519_vm1, %v4119_v40  ;;  %3389 = vmatmul.msk.f32.gmra.mxu2 %vm519_vm1, %v4075_v0 }
  0xa8   : > { %v718_v50 = vpop.f32.mrf.mxu3  ;;  %v4135_v54 = vpop.f32.mrf.mxu2 }
  0xa9   : > { %5314 = vst [vmem:[#allocation18_spill] sm:$0xff] %v4135_v54  ;;  %v4137_v57 = vpop.f32.mrf.mxu0  ;;  %v4139_v58 = vpop.f32.mrf.mxu1  ;;  %v4191_v54 = vld [vmem:[%s3800_s23 + $0xa0] sm:$0xff] }
  0xaa   : > { %5315 = vst [vmem:[#allocation19_spill] sm:$0xff] %v4137_v57  ;;  %v4169_v57 = vsel %vm1330_vm2, %v1357_v49, %v1359_v27 }
  0xab   : > { %5316 = vst [vmem:[#allocation20_spill] sm:$0xff] %v4139_v58  ;;  %v4274_v58 = vld [vmem:[%s3800_s23 + $0xd0] sm:$0xff] }
  0xac   : > { %3228 = vmatmul.msk.f32.gmra.mxu0 %vm519_vm1, %v4142_v62  ;;  %3288 = vmatmul.msk.f32.gmra.mxu1 %vm519_vm1, %v4020_v51  ;;  %5322 = vst [vmem:[#allocation26_spill] sm:$0xff] %v4169_v57 }
  0xad   : > { %3320 = vmatmul.msk.f32.gmra.mxu3 %vm519_vm1, %v4145_v1  ;;  %3390 = vmatmul.msk.f32.gmra.mxu2 %vm519_vm1, %v4095_v15  ;;  %5327 = vst [vmem:[#allocation31_spill] sm:$0xff] %v4191_v54 }
  0xae   : > { %5341 = vst [vmem:[#allocation45_spill] sm:$0xff] %v4274_v58 }
  0xb0   : > { %v721_v45 = vpop.f32.mrf.mxu3  ;;  %v4159_v28 = vpop.f32.mrf.mxu2 }
  0xb1   : > { %5319 = vst [vmem:[#allocation23_spill] sm:$0xff] %v4159_v28  ;;  %v4161_v46 = vpop.f32.mrf.mxu0  ;;  %v4163_v36 = vpop.f32.mrf.mxu1 }
  0xb2   : > { %5320 = vst [vmem:[#allocation24_spill] sm:$0xff] %v4161_v46  ;;  %v1361_v46 = vrot.slane %v4020_v51, 1 }
  0xb3   : > { %5321 = vst [vmem:[#allocation25_spill] sm:$0xff] %v4163_v36 }
  0xb4   : > { %3229 = vmatmul.msk.f32.gmra.mxu0 %vm519_vm1, %v4166_v4  ;;  %3289 = vmatmul.msk.f32.gmra.mxu1 %vm519_vm1, %v4038_v55  ;;  %v4188_v15 = vsel %vm1330_vm2, %v1361_v46, %v1362_v2  ;;  %v1364_v46 = vrot.slane %v4191_v54, 1 }
  0xb5   : > { %3321 = vmatmul.msk.f32.gmra.mxu3 %vm519_vm1, %v4169_v57  ;;  %3391 = vmatmul.msk.f32.gmra.mxu2 %vm519_vm1, %v4119_v40  ;;  %5326 = vst [vmem:[#allocation30_spill] sm:$0xff] %v4188_v15  ;;  %v4200_v40 = vld [vmem:[%s5263_s4] ss:$0 sm:$0xff] }
  0xb6   : > { %v4215_v31 = vsel %vm1330_vm2, %v1362_v2, %v1364_v46 }
  0xb7   : > { %5331 = vst [vmem:[#allocation35_spill] sm:$0xff] %v4215_v31 }
  0xb8   : > { %v724_v26 = vpop.f32.mrf.mxu3  ;;  %v4181_v28 = vpop.f32.mrf.mxu2 }
  0xb9   : > { %5323 = vst [vmem:[#allocation27_spill] sm:$0xff] %v4181_v28  ;;  %v4183_v49 = vpop.f32.mrf.mxu0  ;;  %v4185_v27 = vpop.f32.mrf.mxu1 }
  0xba   : > { %5324 = vst [vmem:[#allocation28_spill] sm:$0xff] %v4183_v49  ;;  %v759_v49 = vadd.f32 %v4200_v40, %v715_v29  ;;  %v1366_v29 = vrot.slane %v4054_v59, 1 }
  0xbb   : > { %5325 = vst [vmem:[#allocation29_spill] sm:$0xff] %v4185_v27 }
  0xbc   : > { %3244 = vmatmul.msk.f32.vlgmr.msrb.gmra.mxu0 %vm519_vm1, %v3803_v5  ;;  %3290 = vmatmul.msk.f32.gmra.mxu1 %vm519_vm1, %v4054_v59 }
  0xbd   : > { %3322 = vmatmul.msk.f32.gmra.mxu3 %vm519_vm1, %v4188_v15  ;;  %3392 = vmatmul.msk.f32.gmra.mxu2 %vm519_vm1, %v4145_v1 }
  0xc0   : > { %v727_v28 = vpop.f32.mrf.mxu3  ;;  %v960_v27 = vpop.f32.mrf.mxu2 }
  0xc1   : > { %v4208_v0 = vadd.f32 %v960_v27, %v759_v49  ;;  %v4210_v36 = vpop.f32.mrf.mxu0  ;;  %v4212_v61 = vpop.f32.mrf.mxu1  ;;  %v1367_v49 = vrot.slane %v4072_v63, 1  ;;  %v760_v27 = vadd.f32 %v4200_v40, %v718_v50 }
  0xc2   : > { %5329 = vst [vmem:[#allocation33_spill] sm:$0xff] %v4210_v36 }
  0xc3   : > { %5328 = vst [vmem:[#allocation32_spill] sm:$0xff] %v4208_v0  ;;  %v4233_v1 = vsel %vm1330_vm2, %v1366_v29, %v1367_v49 }
  0xc4   : > { %5330 = vst [vmem:[#allocation34_spill] sm:$0xff] %v4212_v61  ;;  %3245 = vmatmul.msk.f32.gmra.mxu0 %vm519_vm1, %v3820_v8  ;;  %3291 = vmatmul.msk.f32.gmra.mxu1 %vm519_vm1, %v4072_v63  ;;  %v4236_v61 = vld [vmem:[%s3800_s23 + $0xb8] sm:$0xff] }
  0xc5   : > { %3323 = vmatmul.msk.f32.gmra.mxu3 %vm519_vm1, %v4215_v31  ;;  %3393 = vmatmul.msk.f32.gmra.mxu2 %vm519_vm1, %v4169_v57  ;;  %5334 = vst [vmem:[#allocation38_spill] sm:$0xff] %v4233_v1  ;;  %v1369_v50 = vrot.slane %v4236_v61, 1 }
  0xc6   : > { %5335 = vst [vmem:[#allocation39_spill] sm:$0xff] %v4236_v61 }
  0xc7   : > { %v4253_v60 = vsel %vm1330_vm2, %v1367_v49, %v1369_v50 }
  0xc8   : > { %v730_v2 = vpop.f32.mrf.mxu3  ;;  %v963_v46 = vpop.f32.mrf.mxu2  ;;  %5338 = vst [vmem:[#allocation42_spill] sm:$0xff] %v4253_v60 }
  0xc9   : > { %v4228_v36 = vadd.f32 %v963_v46, %v760_v27  ;;  %v4230_v54 = vpop.f32.mrf.mxu0  ;;  %v826_v0 = vpop.f32.mrf.mxu1  ;;  %v761_v27 = vadd.f32 %v4200_v40, %v721_v45  ;;  %v1371_v45 = vrot.slane %v4092_v14, 1 }
  0xca   : > { %5333 = vst [vmem:[#allocation37_spill] sm:$0xff] %v4230_v54 }
  0xcb   : > { %5332 = vst [vmem:[#allocation36_spill] sm:$0xff] %v4228_v36 }
  0xcc   : > { %3246 = vmatmul.msk.f32.gmra.mxu0 %vm519_vm1, %v3837_v11  ;;  %3292 = vmatmul.msk.f32.gmra.mxu1 %vm519_vm1, %v4092_v14 }
  0xcd   : > { %3324 = vmatmul.msk.f32.gmra.mxu3 %vm519_vm1, %v4233_v1  ;;  %3394 = vmatmul.msk.f32.gmra.mxu2 %vm519_vm1, %v4188_v15 }
  0xd0   : > { %v966_v29 = vpop.f32.mrf.mxu2  ;;  %v1069_v46 = vpop.f32.mrf.mxu3 }
  0xd1   : > { %v4248_v54 = vadd.f32 %v966_v29, %v761_v27  ;;  %v4250_v36 = vpop.f32.mrf.mxu0  ;;  %v829_v57 = vpop.f32.mrf.mxu1  ;;  %v1372_v27 = vrot.slane %v4116_v39, 1  ;;  %v762_v29 = vadd.f32 %v4200_v40, %v724_v26  ;;  %v1374_v26 = vrot.slane %v4274_v58, 1 }
  0xd2   : > { %5337 = vst [vmem:[#allocation41_spill] sm:$0xff] %v4250_v36 }
  0xd3   : > { %5336 = vst [vmem:[#allocation40_spill] sm:$0xff] %v4248_v54  ;;  %v4271_v15 = vsel %vm1330_vm2, %v1371_v45, %v1372_v27  ;;  %v4289_v56 = vsel %vm1330_vm2, %v1372_v27, %v1374_v26  ;;  %v1377_v27 = vrot.slane %v4166_v4, 1 }
  0xd4   : > { %3247 = vmatmul.msk.f32.gmra.mxu0 %vm519_vm1, %v3862_v16  ;;  %3293 = vmatmul.msk.f32.gmra.mxu1 %vm519_vm1, %v4116_v39 }
  0xd5   : > { %3325 = vmatmul.msk.f32.gmra.mxu3 %vm519_vm1, %v4253_v60  ;;  %3395 = vmatmul.msk.f32.gmra.mxu2 %vm519_vm1, %v4215_v31 }
  0xd8   : > { %v969_v49 = vpop.f32.mrf.mxu2  ;;  %v1072_v50 = vpop.f32.mrf.mxu3 }
  0xd9   : > { %v4266_v36 = vadd.f32 %v969_v49, %v762_v29  ;;  %v4268_v61 = vpop.f32.mrf.mxu0  ;;  %v1130_v54 = vpop.f32.mrf.mxu1  ;;  %v763_v29 = vadd.f32 %v4200_v40, %v727_v28  ;;  %v1376_v28 = vrot.slane %v4142_v62, 1 }
  0xda   : > { %5340 = vst [vmem:[#allocation44_spill] sm:$0xff] %v4268_v61 }
  0xdb   : > { %5339 = vst [vmem:[#allocation43_spill] sm:$0xff] %v4266_v36 }
  0xdc   : > { %3248 = vmatmul.msk.f32.gmra.mxu0 %vm519_vm1, %v3879_v19  ;;  %3294 = vmatmul.msk.f32.gmra.mxu1 %vm519_vm1, %v4142_v62 }
  0xdd   : > { %3326 = vmatmul.msk.f32.gmra.mxu3 %vm519_vm1, %v4271_v15  ;;  %3396 = vmatmul.msk.f32.gmra.mxu2 %vm519_vm1, %v4233_v1  ;;  %v4314_v1 = vld [vmem:[%s3800_s23 + $0xe8] sm:$0xff] }
  0xe0   : > { %v972_v45 = vpop.f32.mrf.mxu2  ;;  %v1495_v49 = vpop.f32.mrf.mxu3 }
  0xe1   : > { %v1006_v61 = vadd.f32 %v972_v45, %v763_v29  ;;  %v4286_v36 = vpop.f32.mrf.mxu0  ;;  %v1133_v31 = vpop.f32.mrf.mxu1  ;;  %v733_v29 = vadd.f32 %v4200_v40, %v4087_v3 }
  0xe2   : > { %5342 = vst [vmem:[#allocation46_spill] sm:$0xff] %v4286_v36 }
  0xe3   : > { %v4291_v53 = vadd.f32 %v1069_v46, %v1006_v61  ;;  %v764_v61 = vadd.f32 %v4200_v40, %v730_v2  ;;  %v1379_v2 = vrot.slane %v4314_v1, 1 }
  0xe4   : > { %3249 = vmatmul.msk.f32.gmra.mxu0 %vm519_vm1, %v3896_v22  ;;  %3295 = vmatmul.msk.f32.gmra.mxu1 %vm519_vm1, %v4166_v4 }
  0xe5   : > { %5343 = vst [vmem:[#allocation47_spill] sm:$0xff] %v4291_v53  ;;  %3327 = vmatmul.msk.f32.gmra.mxu3 %vm519_vm1, %v4289_v56  ;;  %3397 = vmatmul.msk.f32.gmra.mxu2 %vm519_vm1, %v4253_v60  ;;  %v4311_v53 = vsel %vm1330_vm2, %v1376_v28, %v1377_v27  ;;  %v832_v60 = vadd.f32 %v826_v0, %v733_v29 }
  0xe7   : > { %v1220_v3 = vadd.f32 %v1130_v54, %v832_v60  ;;  %v4336_v60 = vsel %vm1330_vm2, %v1377_v27, %v1379_v2  ;;  %v1382_v27 = vrot.slane %v3823_v9, 1 }
  0xe8   : > { %v975_v46 = vpop.f32.mrf.mxu2  ;;  %v1498_v26 = vpop.f32.mrf.mxu3 }
  0xe9   : > { %v1007_v45 = vadd.f32 %v975_v46, %v764_v61  ;;  %v4306_v36 = vpop.f32.mrf.mxu0  ;;  %v4308_v58 = vpop.f32.mrf.mxu1  ;;  %v1591_v0 = vadd.f32 %v1495_v49, %v1220_v3  ;;  %v734_v61 = vadd.f32 %v4200_v40, %v4111_v32  ;;  %v1381_v32 = vrot.slane %v3806_v6, 1 }
  0xea   : > { %5344 = vst [vmem:[#allocation48_spill] sm:$0xff] %v4306_v36 }
  0xeb   : > { %v4316_v52 = vadd.f32 %v1072_v50, %v1007_v45  ;;  %v833_v54 = vadd.f32 %v829_v57, %v734_v61 }
  0xec   : > { %3250 = vmatmul.msk.f32.gmra.mxu0 %vm519_vm1, %v3913_v25  ;;  %3296 = vmatmul.msk.f32.gmra.mxu1 %vm519_vm1, %v3806_v6 }
  0xed   : > { %3328 = vmatmul.msk.f32.gmra.mxu3 %vm519_vm1, %v4311_v53  ;;  %3398 = vmatmul.msk.f32.gmra.mxu2 %vm519_vm1, %v4271_v15  ;;  %v1221_v49 = vadd.f32 %v1133_v31, %v833_v54  ;;  %v4355_v31 = vsel %vm1330_vm2, %v1381_v32, %v1382_v27  ;;  %v4358_v54 = vld [vmem:[%s3800_s23 + $0x100] sm:$0xff] }
  0xee   : > { %v1384_v6 = vrot.slane %v4358_v54, 1 }
  0xef   : > { %v1592_v3 = vadd.f32 %v1498_v26, %v1221_v49 }
  0xf0   : > { %v4327_v28 = vpop.f32.mrf.mxu3  ;;  %v1689_v50 = vpop.f32.mrf.mxu2 }
  0xf1   : > { %v1695_v46 = vadd.f32 %v1689_v50, %v1591_v0  ;;  %v4331_v29 = vpop.f32.mrf.mxu0  ;;  %v4333_v45 = vpop.f32.mrf.mxu1 }
  0xf2   : > { %5345 = vst [vmem:[#allocation49_spill] sm:$0xff] %v4331_v29 }
  0xf4   : > { %3251 = vmatmul.msk.f32.gmra.mxu0 %vm519_vm1, %v3934_v30  ;;  %3297 = vmatmul.msk.f32.gmra.mxu1 %vm519_vm1, %v3823_v9 }
  0xf5   : > { %3329 = vmatmul.msk.f32.gmra.mxu3 %vm519_vm1, %v4336_v60  ;;  %3399 = vmatmul.msk.f32.gmra.mxu2 %vm519_vm1, %v4289_v56 }
  0xf8   : > { %v4348_v2 = vpop.f32.mrf.mxu3  ;;  %v1692_v57 = vpop.f32.mrf.mxu2 }
  0xf9   : > { %v1696_v0 = vadd.f32 %v1692_v57, %v1592_v3  ;;  %v4350_v50 = vpop.f32.mrf.mxu0  ;;  %v4352_v61 = vpop.f32.mrf.mxu1  ;;  %v4378_v57 = vsel %vm1330_vm2, %v1382_v27, %v1384_v6 }
  0xfa   : > { %5346 = vst [vmem:[#allocation50_spill] sm:$0xff] %v4350_v50 }
  0xfc   : > { %3252 = vmatmul.msk.f32.gmra.mxu0 %vm519_vm1, %v3945_v33  ;;  %3298 = vmatmul.msk.f32.gmra.mxu1 %vm519_vm1, %v3840_v12 }
  0xfd   : > { %3330 = vmatmul.msk.f32.gmra.mxu3 %vm519_vm1, %v4355_v31  ;;  %3400 = vmatmul.msk.f32.gmra.mxu2 %vm519_vm1, %v4311_v53 }
 0x100   : > { %v4369_v9 = vpop.f32.mrf.mxu3  ;;  %v1995_v26 = vpop.f32.mrf.mxu2 }
 0x101   : > { %v4371_v49 = vadd.f32 %v1995_v26, %v1695_v46  ;;  %v4373_v32 = vpop.f32.mrf.mxu0  ;;  %v4375_v3 = vpop.f32.mrf.mxu1  ;;  %v1386_v46 = vrot.slane %v3840_v12, 1  ;;  %v1387_v26 = vrot.slane %v3865_v17, 1 }
 0x102   : > { %5347 = vst [vmem:[#allocation51_spill] sm:$0xff] %v4373_v32 }
 0x103   : > { %5348 = vst [vmem:[#allocation52_spill] sm:$0xff] %v4375_v3  ;;  %v4399_v36 = vsel %vm1330_vm2, %v1386_v46, %v1387_v26  ;;  %v4402_v3 = vld [vmem:[%s3800_s23 + $0x118] sm:$0xff] }
 0x104   : > { %3253 = vmatmul.msk.f32.gmra.mxu0 %vm519_vm1, %v3963_v37  ;;  %3299 = vmatmul.msk.f32.gmra.mxu1 %vm519_vm1, %v3865_v17  ;;  %5352 = vst [vmem:[#allocation56_spill] sm:$0xff] %v4399_v36  ;;  %v1389_v12 = vrot.slane %v4402_v3, 1 }
 0x105   : > { %3331 = vmatmul.msk.f32.gmra.mxu3 %vm519_vm1, %v4378_v57  ;;  %3401 = vmatmul.msk.f32.gmra.mxu2 %vm519_vm1, %v4336_v60  ;;  %5353 = vst [vmem:[#allocation57_spill] sm:$0xff] %v4402_v3 }
 0x108   : > { %v4390_v32 = vpop.f32.mrf.mxu3  ;;  %v1998_v27 = vpop.f32.mrf.mxu2 }
 0x109   : > { %5349 = vst [vmem:[#allocation53_spill] sm:$0xff] %v4390_v32  ;;  %v4392_v6 = vadd.f32 %v1998_v27, %v1696_v0  ;;  %v4394_v50 = vpop.f32.mrf.mxu0  ;;  %v4396_v29 = vpop.f32.mrf.mxu1  ;;  %v4446_v32 = vld [vmem:[%s3800_s23 + $0x130] sm:$0xff] }
 0x10a   : > { %5350 = vst [vmem:[#allocation54_spill] sm:$0xff] %v4394_v50  ;;  %v4422_v50 = vsel %vm1330_vm2, %v1387_v26, %v1389_v12 }
 0x10b   : > { %5351 = vst [vmem:[#allocation55_spill] sm:$0xff] %v4396_v29 }
 0x10c   : > { %3254 = vmatmul.msk.f32.gmra.mxu0 %vm519_vm1, %v3979_v41  ;;  %3300 = vmatmul.msk.f32.gmra.mxu1 %vm519_vm1, %v3882_v20  ;;  %5357 = vst [vmem:[#allocation61_spill] sm:$0xff] %v4422_v50 }
 0x10d   : > { %3332 = vmatmul.msk.f32.gmra.mxu3 %vm519_vm1, %v4399_v36  ;;  %3402 = vmatmul.msk.f32.gmra.mxu2 %vm519_vm1, %v4355_v31  ;;  %5362 = vst [vmem:[#allocation66_spill] sm:$0xff] %v4446_v32 }
 0x110   : > { %v4413_v17 = vpop.f32.mrf.mxu3  ;;  %v4415_v0 = vpop.f32.mrf.mxu2 }
 0x111   : > { %5354 = vst [vmem:[#allocation58_spill] sm:$0xff] %v4413_v17  ;;  %v4417_v46 = vpop.f32.mrf.mxu0  ;;  %v4419_v27 = vpop.f32.mrf.mxu1  ;;  %v1391_v17 = vrot.slane %v3882_v20, 1  ;;  %v1394_v20 = vrot.slane %v4446_v32, 1 }
 0x112   : > { %5355 = vst [vmem:[#allocation59_spill] sm:$0xff] %v4417_v46  ;;  %v1392_v46 = vrot.slane %v3899_v23, 1 }
 0x113   : > { %5356 = vst [vmem:[#allocation60_spill] sm:$0xff] %v4419_v27 }
 0x114   : > { %3255 = vmatmul.msk.f32.gmra.mxu0 %vm519_vm1, %v4004_v47  ;;  %3301 = vmatmul.msk.f32.gmra.mxu1 %vm519_vm1, %v3899_v23  ;;  %v4443_v3 = vsel %vm1330_vm2, %v1391_v17, %v1392_v46 }
 0x115   : > { %3333 = vmatmul.msk.f32.gmra.mxu3 %vm519_vm1, %v4422_v50  ;;  %3403 = vmatmul.msk.f32.gmra.mxu2 %vm519_vm1, %v4378_v57  ;;  %5361 = vst [vmem:[#allocation65_spill] sm:$0xff] %v4443_v3 }
 0x118   : > { %v4434_v27 = vpop.f32.mrf.mxu3  ;;  %v4436_v26 = vpop.f32.mrf.mxu2 }
 0x119   : > { %5358 = vst [vmem:[#allocation62_spill] sm:$0xff] %v4434_v27  ;;  %v4438_v12 = vpop.f32.mrf.mxu0  ;;  %v4440_v29 = vpop.f32.mrf.mxu1  ;;  %v4466_v27 = vsel %vm1330_vm2, %v1392_v46, %v1394_v20 }
 0x11a   : > { %5359 = vst [vmem:[#allocation63_spill] sm:$0xff] %v4438_v12 }
 0x11b   : > { %5360 = vst [vmem:[#allocation64_spill] sm:$0xff] %v4440_v29 }
 0x11c   : > { %3256 = vmatmul.msk.f32.gmra.mxu0 %vm519_vm1, %v4020_v51  ;;  %3302 = vmatmul.msk.f32.gmra.mxu1 %vm519_vm1, %v3809_v7  ;;  %5367 = vst [vmem:[#allocation71_spill] sm:$0xff] %v4466_v27 }
 0x11d   : > { %3334 = vmatmul.msk.f32.gmra.mxu3 %vm519_vm1, %v4443_v3  ;;  %3404 = vmatmul.msk.f32.gmra.mxu2 %vm519_vm1, %v4399_v36 }
 0x120   : > { %v4457_v23 = vpop.f32.mrf.mxu3  ;;  %v4459_v17 = vpop.f32.mrf.mxu2 }
 0x121   : > { %5363 = vst [vmem:[#allocation67_spill] sm:$0xff] %v4457_v23  ;;  %v4461_v12 = vpop.f32.mrf.mxu0  ;;  %v4463_v29 = vpop.f32.mrf.mxu1  ;;  %v1396_v23 = vrot.slane %v3809_v7, 1 }
 0x122   : > { %5364 = vst [vmem:[#allocation68_spill] sm:$0xff] %v4459_v17  ;;  %v4490_v17 = vld [vmem:[%s3800_s23 + $0x148] sm:$0xff] }
 0x123   : > { %5365 = vst [vmem:[#allocation69_spill] sm:$0xff] %v4461_v12  ;;  %v1397_v12 = vrot.slane %v3826_v10, 1  ;;  %v1399_v7 = vrot.slane %v4490_v17, 1 }
 0x124   : > { %5366 = vst [vmem:[#allocation70_spill] sm:$0xff] %v4463_v29  ;;  %3257 = vmatmul.msk.f32.gmra.mxu0 %vm519_vm1, %v4038_v55  ;;  %3303 = vmatmul.msk.f32.gmra.mxu1 %vm519_vm1, %v3826_v10 }
 0x125   : > { %3335 = vmatmul.msk.f32.gmra.mxu3 %vm519_vm1, %v4466_v27  ;;  %3405 = vmatmul.msk.f32.gmra.mxu2 %vm519_vm1, %v4422_v50  ;;  %v4487_v36 = vsel %vm1330_vm2, %v1396_v23, %v1397_v12  ;;  %5372 = vst [vmem:[#allocation76_spill] sm:$0xff] %v4490_v17  ;;  %v4514_v50 = vsel %vm1330_vm2, %v1397_v12, %v1399_v7 }
 0x126   : > { %5371 = vst [vmem:[#allocation75_spill] sm:$0xff] %v4487_v36 }
 0x127   : > { %5376 = vst [vmem:[#allocation80_spill] sm:$0xff] %v4514_v50 }
 0x128   : > { %v4478_v29 = vpop.f32.mrf.mxu3  ;;  %v4480_v46 = vpop.f32.mrf.mxu2 }
 0x129   : > { %5368 = vst [vmem:[#allocation72_spill] sm:$0xff] %v4478_v29  ;;  %v4482_v20 = vpop.f32.mrf.mxu0  ;;  %v4484_v32 = vpop.f32.mrf.mxu1 }
 0x12a   : > { %5369 = vst [vmem:[#allocation73_spill] sm:$0xff] %v4482_v20  ;;  %v3414_v20 = vld [vmem:[%s5262_s3 + $0x14] sm:$0xf] }
 0x12b   : > { %5370 = vst [vmem:[#allocation74_spill] sm:$0xff] %v4484_v32  ;;  %3415 = vmatpush.msk.msra.mxu1 %vm616_vm0, %v3414_v20 }
 0x12c   : > { %3258 = vmatmul.msk.f32.gmra.mxu0 %vm519_vm1, %v4054_v59  ;;  %3304 = vmatmul.msk.f32.gmra.mxu1 %vm519_vm1, %v3843_v13 }
 0x12d   : > { %3336 = vmatmul.msk.f32.gmra.mxu3 %vm519_vm1, %v4487_v36  ;;  %3406 = vmatmul.msk.f32.gmra.mxu2 %vm519_vm1, %v4443_v3  ;;  %v4538_v3 = vld [vmem:[%s3800_s23 + $0x160] sm:$0xff] }
 0x12e   : > { %5381 = vst [vmem:[#allocation85_spill] sm:$0xff] %v4538_v3 }
 0x130   : > { %v4501_v10 = vpop.f32.mrf.mxu3  ;;  %v4503_v23 = vpop.f32.mrf.mxu2 }
 0x131   : > { %5373 = vst [vmem:[#allocation77_spill] sm:$0xff] %v4501_v10  ;;  %v4508_v32 = vpop.f32.mrf.mxu0  ;;  %v4510_v29 = vpop.f32.mrf.mxu1 }
 0x132   : > { %5374 = vst [vmem:[#allocation78_spill] sm:$0xff] %v4508_v32  ;;  %v1401_v32 = vrot.slane %v3843_v13, 1  ;;  %v3452_v13 = vld [vmem:[%s5262_s3 + $0x8] sm:$0xf] }
 0x133   : > { %5375 = vst [vmem:[#allocation79_spill] sm:$0xff] %v4510_v29  ;;  %v1402_v29 = vrot.slane %v3868_v18, 1  ;;  %3453 = vmatpush.msk.msra.mxu3 %vm616_vm0, %v3452_v13  ;;  %v3484_v13 = vld [vmem:[%s5262_s3 + $0x20] sm:$0xf] }
 0x134   : > { %3259 = vmatmul.msk.f32.gmra.mxu0 %vm519_vm1, %v4072_v63  ;;  %3305 = vmatmul.msk.f32.gmra.mxu1 %vm519_vm1, %v3868_v18  ;;  %v1404_v18 = vrot.slane %v4538_v3, 1 }
 0x135   : > { %3337 = vmatmul.msk.f32.gmra.mxu3 %vm519_vm1, %v4514_v50  ;;  %3407 = vmatmul.msk.f32.gmra.mxu2 %vm519_vm1, %v4466_v27  ;;  %v4535_v17 = vsel %vm1330_vm2, %v1401_v32, %v1402_v29 }
 0x136   : > { %5380 = vst [vmem:[#allocation84_spill] sm:$0xff] %v4535_v17  ;;  %3485 = vmatpush.msk.msrb.mxu0 %vm616_vm0, %v3484_v13 }
 0x138   : > { %v4526_v20 = vpop.f32.mrf.mxu3  ;;  %v4528_v12 = vpop.f32.mrf.mxu2 }
 0x139   : > { %5377 = vst [vmem:[#allocation81_spill] sm:$0xff] %v4526_v20  ;;  %v4530_v7 = vpop.f32.mrf.mxu0  ;;  %v4532_v10 = vpop.f32.mrf.mxu1 }
 0x13a   : > { %5378 = vst [vmem:[#allocation82_spill] sm:$0xff] %v4528_v12  ;;  %v4562_v12 = vsel %vm1330_vm2, %v1402_v29, %v1404_v18  ;;  %v1407_v29 = vrot.slane %v3902_v24, 1 }
 0x13b   : > { %5379 = vst [vmem:[#allocation83_spill] sm:$0xff] %v4532_v10 }
 0x13c   : > { %3260 = vmatmul.msk.f32.gmra.mxu0 %vm519_vm1, %v4092_v14  ;;  %3306 = vmatmul.msk.f32.gmra.mxu1 %vm519_vm1, %v3885_v21  ;;  %5385 = vst [vmem:[#allocation89_spill] sm:$0xff] %v4562_v12 }
 0x13d   : > { %3338 = vmatmul.msk.f32.gmra.mxu3 %vm519_vm1, %v4535_v17  ;;  %3408 = vmatmul.msk.f32.gmra.mxu2 %vm519_vm1, %v4487_v36 }
 0x140   : > { %v4553_v32 = vpop.f32.mrf.mxu3  ;;  %v4555_v10 = vpop.f32.mrf.mxu2 }
 0x141   : > { %5382 = vst [vmem:[#allocation86_spill] sm:$0xff] %v4553_v32  ;;  %v4557_v20 = vpop.f32.mrf.mxu0  ;;  %v4559_v27 = vpop.f32.mrf.mxu1 }
 0x142   : > { %5383 = vst [vmem:[#allocation87_spill] sm:$0xff] %v4555_v10  ;;  %v4588_v10 = vld [vmem:[%s3800_s23 + $0x178] sm:$0xff] }
 0x143   : > { %5384 = vst [vmem:[#allocation88_spill] sm:$0xff] %v4559_v27  ;;  %v1406_v27 = vrot.slane %v3885_v21, 1  ;;  %v1409_v21 = vrot.slane %v4588_v10, 1 }
 0x144   : > { %3261 = vmatmul.msk.f32.gmra.mxu0 %vm519_vm1, %v4116_v39  ;;  %3307 = vmatmul.msk.f32.gmra.mxu1 %vm519_vm1, %v3902_v24  ;;  %5388 = vst [vmem:[#allocation92_spill] sm:$0xff] %v4588_v10  ;;  %v2181_v10 = vrot.slane %v3820_v8, 2  ;;  %v2183_v8 = vrot.slane %v3951_v35, 2  ;;  %v2186_v35 = vrot.slane %v3862_v16, 2 }
 0x145   : > { %3339 = vmatmul.msk.f32.gmra.mxu3 %vm519_vm1, %v4562_v12  ;;  %3409 = vmatmul.msk.f32.gmra.mxu2 %vm519_vm1, %v4514_v50  ;;  %v1408_v50 = vsel %vm1330_vm2, %v1406_v27, %v1407_v29 }
 0x148   : > { %v4578_v18 = vpop.f32.mrf.mxu3  ;;  %v4580_v32 = vpop.f32.mrf.mxu2 }
 0x149   : > { %5386 = vst [vmem:[#allocation90_spill] sm:$0xff] %v4578_v18  ;;  %v4582_v3 = vpop.f32.mrf.mxu0  ;;  %v4584_v36 = vpop.f32.mrf.mxu1  ;;  %v1410_v18 = vsel %vm1330_vm2, %v1407_v29, %v1409_v21 }
 0x14a   : > { %5387 = vst [vmem:[#allocation91_spill] sm:$0xff] %v4584_v36 }
 0x14c   : > { %3262 = vmatmul.msk.f32.gmra.mxu0 %vm519_vm1, %v4142_v62  ;;  %3380 = vmatmul.msk.f32.vlgmr.msrb.gmra.mxu1 %vm519_vm1, %v3982_v42 }
 0x14d   : > { %3340 = vmatmul.msk.f32.gmra.mxu3 %vm519_vm1, %v1408_v50  ;;  %3410 = vmatmul.msk.f32.gmra.mxu2 %vm519_vm1, %v4535_v17  ;;  %v2180_v17 = vrot.slane %v3803_v5, 2 }
 0x150   : > { %v4598_v24 = vpop.f32.mrf.mxu3  ;;  %v4600_v13 = vpop.f32.mrf.mxu2 }
 0x151   : > { %5389 = vst [vmem:[#allocation93_spill] sm:$0xff] %v4598_v24  ;;  %v4602_v27 = vpop.f32.mrf.mxu0  ;;  %v4604_v36 = vpop.f32.mrf.mxu1 }
 0x152   : > { %5390 = vst [vmem:[#allocation94_spill] sm:$0xff] %v4600_v13  ;;  %v5395_v13 = vmov 0.0  }
 0x153   : > { %5391 = vst [vmem:[#allocation95_spill] sm:$0xff] %v4604_v36  ;;  %v4626_v5 = vrot.slane %v5395_v13, 2 }
 0x154   : > { %3263 = vmatmul.msk.f32.gmra.mxu0 %vm519_vm1, %v4166_v4  ;;  %3381 = vmatmul.msk.f32.gmra.mxu1 %vm519_vm1, %v3982_v42  ;;  %v2182_v42 = vsel %vm2179_vm3, %v2180_v17, %v2181_v10 }
 0x155   : > { %3341 = vmatmul.msk.f32.gmra.mxu3 %vm519_vm1, %v1410_v18  ;;  %3411 = vmatmul.msk.f32.gmra.mxu2 %vm519_vm1, %v4562_v12  ;;  %5396 = vst [vmem:[#allocation99_spill] sm:$0xff] %v4626_v5  ;;  %v2184_v12 = vsel %vm2179_vm3, %v2181_v10, %v2183_v8 }
 0x158   : > { %v4616_v24 = vpop.f32.mrf.mxu3  ;;  %v4618_v36 = vpop.f32.mrf.mxu2 }
 0x159   : > { %5392 = vst [vmem:[#allocation96_spill] sm:$0xff] %v4616_v24  ;;  %v4620_v29 = vpop.f32.mrf.mxu0  ;;  %v4622_v21 = vpop.f32.mrf.mxu1 }
 0x15a   : > { %5393 = vst [vmem:[#allocation97_spill] sm:$0xff] %v4618_v36 }
 0x15b   : > { %5394 = vst [vmem:[#allocation98_spill] sm:$0xff] %v4622_v21 }
 0x15c   : > { %3348 = vmatmul.msk.f32.vlgmr.msra.gmra.mxu0 %vm519_vm1, %v3948_v34  ;;  %3416 = vmatmul.msk.f32.vlgmr.msra.gmra.mxu1 %vm519_vm1, %v2182_v42  ;;  %v2185_v34 = vrot.slane %v3837_v11, 2  ;;  %v2188_v11 = vrot.slane %v3988_v44, 2  ;;  %v2191_v44 = vrot.slane %v3896_v22, 2 }
 0x15d   : > { %3412 = vmatmul.msk.f32.gmra.mxu2 %vm519_vm1, %v1408_v50  ;;  %3450 = vmatmul.msk.f32.vlgmr.msrb.gmra.mxu3 %vm519_vm1, %v4626_v5 }
 0x160   : > { %v4635_v24 = vpop.f32.mrf.mxu3  ;;  %v4637_v21 = vpop.f32.mrf.mxu2 }
 0x161   : > { %5397 = vst [vmem:[#allocation100_spill] sm:$0xff] %v4635_v24  ;;  %v4639_v17 = vpop.f32.mrf.mxu0  ;;  %v4641_v13 = vpop.f32.mrf.mxu1 }
 0x162   : > { %5398 = vst [vmem:[#allocation101_spill] sm:$0xff] %v4637_v21 }
 0x163   : > { %5399 = vst [vmem:[#allocation102_spill] sm:$0xff] %v4641_v13 }
 0x164   : > { %3349 = vmatmul.msk.f32.gmra.mxu0 %vm519_vm1, %v3966_v38  ;;  %3417 = vmatmul.msk.f32.gmra.mxu1 %vm519_vm1, %v2184_v12  ;;  %v2187_v38 = vsel %vm2179_vm3, %v2185_v34, %v2186_v35  ;;  %v2189_v34 = vsel %vm2179_vm3, %v2186_v35, %v2188_v11  ;;  %v5409_v11 = vld [vmem:[#allocation6_spill] sm:$0xff] }
 0x165   : > { %3413 = vmatmul.msk.f32.gmra.mxu2 %vm519_vm1, %v1410_v18  ;;  %3451 = vmatmul.msk.f32.gmra.mxu3 %vm519_vm1, %v4626_v5  ;;  %v5422_v5 = vld [vmem:[#allocation25_spill] sm:$0xff] }
 0x168   : > { %v4652_v50 = vpop.f32.mrf.mxu3  ;;  %v4654_v24 = vpop.f32.mrf.mxu2 }
 0x169   : > { %5400 = vst [vmem:[#allocation103_spill] sm:$0xff] %v4652_v50  ;;  %v4656_v13 = vpop.f32.mrf.mxu0  ;;  %v4658_v10 = vpop.f32.mrf.mxu1 }
 0x16a   : > { %5401 = vst [vmem:[#allocation104_spill] sm:$0xff] %v4654_v24 }
 0x16b   : > { %5402 = vst [vmem:[#allocation105_spill] sm:$0xff] %v4658_v10 }
 0x16c   : > { %3350 = vmatmul.msk.f32.gmra.mxu0 %vm519_vm1, %v3985_v43  ;;  %3418 = vmatmul.msk.f32.gmra.mxu1 %vm519_vm1, %v2187_v38  ;;  %v2190_v43 = vrot.slane %v3879_v19, 2  ;;  %v5410_v19 = vld [vmem:[#allocation7_spill] sm:$0xff] }
 0x16d   : > { %3454 = vmatmul.msk.f32.vlgmr.msra.gmra.mxu3 %vm519_vm1, %v2182_v42  ;;  %3490 = vmatmul.msk.f32.vlgmr.msrb.gmra.mxu2 %vm519_vm1, %v2187_v38  ;;  %v2193_v22 = vrot.slane %v5410_v19, 2 }
 0x170   : > { %v4667_v16 = vpop.f32.mrf.mxu3  ;;  %v4669_v18 = vpop.f32.mrf.mxu2 }
 0x171   : > { %5403 = vst [vmem:[#allocation106_spill] sm:$0xff] %v4667_v16  ;;  %v4671_v8 = vpop.f32.mrf.mxu0  ;;  %v4673_v10 = vpop.f32.mrf.mxu1 }
 0x172   : > { %5404 = vst [vmem:[#allocation107_spill] sm:$0xff] %v4669_v18  ;;  %v5418_v18 = vld [vmem:[#allocation9_spill] sm:$0xff] }
 0x173   : > { %5405 = vst [vmem:[#allocation108_spill] sm:$0xff] %v4673_v10 }
 0x174   : > { %3351 = vmatmul.msk.f32.gmra.mxu0 %vm519_vm1, %v4007_v48  ;;  %3419 = vmatmul.msk.f32.gmra.mxu1 %vm519_vm1, %v2189_v34  ;;  %v2192_v48 = vsel %vm2179_vm3, %v2190_v43, %v2191_v44  ;;  %v2194_v43 = vsel %vm2179_vm3, %v2191_v44, %v2193_v22 }
 0x175   : > { %3455 = vmatmul.msk.f32.gmra.mxu3 %vm519_vm1, %v2184_v12  ;;  %3491 = vmatmul.msk.f32.gmra.mxu2 %vm519_vm1, %v2189_v34 }
 0x178   : > { %v4683_v42 = vpop.f32.mrf.mxu3  ;;  %v4685_v16 = vpop.f32.mrf.mxu2 }
 0x179   : > { %5406 = vst [vmem:[#allocation109_spill] sm:$0xff] %v4683_v42  ;;  %v4687_v10 = vpop.f32.mrf.mxu0  ;;  %v4689_v35 = vpop.f32.mrf.mxu1 }
 0x17a   : > { %5407 = vst [vmem:[#allocation110_spill] sm:$0xff] %v4685_v16  ;;  %v5414_v16 = vld [vmem:[#allocation8_spill] sm:$0xff] }
 0x17b   : > { %5408 = vst [vmem:[#allocation111_spill] sm:$0xff] %v4689_v35 }
 0x17c   : > { %3352 = vmatmul.msk.f32.gmra.mxu0 %vm519_vm1, %v5409_v11  ;;  %3420 = vmatmul.msk.f32.gmra.mxu1 %vm519_vm1, %v2192_v48  ;;  %v2196_v11 = vrot.slane %v3934_v30, 2  ;;  %v5420_v30 = vld [vmem:[#allocation10_spill] sm:$0xff] }
 0x17d   : > { %3456 = vmatmul.msk.f32.gmra.mxu3 %vm519_vm1, %v2187_v38  ;;  %3492 = vmatmul.msk.f32.gmra.mxu2 %vm519_vm1, %v2192_v48  ;;  %v2195_v38 = vrot.slane %v3913_v25, 2  ;;  %v5419_v25 = vld [vmem:[#allocation15_spill] sm:$0xff] }
 0x180   : > { %v4698_v12 = vpop.f32.mrf.mxu3  ;;  %v4700_v42 = vpop.f32.mrf.mxu2 }
 0x181   : > { %5411 = vst [vmem:[#allocation6_spill] sm:$0xff] %v4698_v12  ;;  %v4702_v50 = vpop.f32.mrf.mxu0  ;;  %v4704_v35 = vpop.f32.mrf.mxu1 }
 0x182   : > { %5412 = vst [vmem:[#allocation7_spill] sm:$0xff] %v4700_v42  ;;  %v2197_v42 = vsel %vm2179_vm3, %v2195_v38, %v2196_v11  ;;  %v756_v38 = vadd.f32 %v4200_v40, %v5422_v5  ;;  %v2200_v5 = vrot.slane %v3945_v33, 2  ;;  %v5430_v33 = vld [vmem:[#allocation23_spill] sm:$0xff] }
 0x183   : > { %5413 = vst [vmem:[#allocation112_spill] sm:$0xff] %v4704_v35  ;;  %v5417_v35 = vld [vmem:[#allocation20_spill] sm:$0xff] }
 0x184   : > { %3353 = vmatmul.msk.f32.gmra.mxu0 %vm519_vm1, %v5414_v16  ;;  %3421 = vmatmul.msk.f32.gmra.mxu1 %vm519_vm1, %v2194_v43  ;;  %v755_v44 = vadd.f32 %v4200_v40, %v5417_v35 }
 0x185   : > { %3457 = vmatmul.msk.f32.gmra.mxu3 %vm519_vm1, %v2189_v34  ;;  %3493 = vmatmul.msk.f32.gmra.mxu2 %vm519_vm1, %v2194_v43 }
 0x186   : > { %v998_v34 = vadd.f32 %v5419_v25, %v755_v44  ;;  %v5424_v25 = vld [vmem:[#allocation11_spill] sm:$0xff] }
 0x188   : > { %v4714_v19 = vpop.f32.mrf.mxu3  ;;  %v4716_v12 = vpop.f32.mrf.mxu2 }
 0x189   : > { %5415 = vst [vmem:[#allocation8_spill] sm:$0xff] %v4714_v19  ;;  %v4720_v22 = vpop.f32.mrf.mxu0  ;;  %v1196_v16 = vpop.f32.mrf.mxu1  ;;  %v2198_v19 = vrot.slane %v5420_v30, 2 }
 0x18a   : > { %5416 = vst [vmem:[#allocation113_spill] sm:$0xff] %v4716_v12  ;;  %v1242_v12 = vadd.f32 %v1196_v16, %v998_v34 }
 0x18b   : > { %v2199_v44 = vsel %vm2179_vm3, %v2196_v11, %v2198_v19  ;;  %v5427_v11 = vld [vmem:[#allocation29_spill] sm:$0xff] }
 0x18c   : > { %3354 = vmatmul.msk.f32.gmra.mxu0 %vm519_vm1, %v5418_v18  ;;  %3422 = vmatmul.msk.f32.gmra.mxu1 %vm519_vm1, %v2197_v42  ;;  %v757_v19 = vadd.f32 %v4200_v40, %v5427_v11 }
 0x18d   : > { %3458 = vmatmul.msk.f32.gmra.mxu3 %vm519_vm1, %v2192_v48  ;;  %3494 = vmatmul.msk.f32.gmra.mxu2 %vm519_vm1, %v2197_v42  ;;  %v5425_v48 = vld [vmem:[#allocation18_spill] sm:$0xff] }
 0x18e   : > { %v999_v16 = vadd.f32 %v5425_v48, %v756_v38  ;;  %v5429_v48 = vld [vmem:[#allocation13_spill] sm:$0xff] }
 0x190   : > { %v1561_v35 = vpop.f32.mrf.mxu3  ;;  %v4730_v24 = vpop.f32.mrf.mxu2 }
 0x191   : > { %5421 = vst [vmem:[#allocation20_spill] sm:$0xff] %v4730_v24  ;;  %v4734_v21 = vadd.f32 %v1561_v35, %v1242_v12  ;;  %v4736_v18 = vpop.f32.mrf.mxu0  ;;  %v1199_v36 = vpop.f32.mrf.mxu1  ;;  %v2201_v12 = vrot.slane %v3963_v37, 2  ;;  %v1000_v37 = vadd.f32 %v5430_v33, %v757_v19  ;;  %v5434_v33 = vld [vmem:[#allocation17_spill] sm:$0xff] }
 0x192   : > { %v1243_v34 = vadd.f32 %v1199_v36, %v999_v16  ;;  %v5431_v36 = vld [vmem:[#allocation14_spill] sm:$0xff] }
 0x193   : > { %5423 = vst [vmem:[#allocation9_spill] sm:$0xff] %v4734_v21  ;;  %v2203_v16 = vrot.slane %v5431_v36, 2 }
 0x194   : > { %3355 = vmatmul.msk.f32.gmra.mxu0 %vm519_vm1, %v5424_v25  ;;  %3423 = vmatmul.msk.f32.gmra.mxu1 %vm519_vm1, %v2199_v44 }
 0x195   : > { %3459 = vmatmul.msk.f32.gmra.mxu3 %vm519_vm1, %v2194_v43  ;;  %3495 = vmatmul.msk.f32.gmra.mxu2 %vm519_vm1, %v2199_v44  ;;  %v2202_v43 = vsel %vm2179_vm3, %v2200_v5, %v2201_v12  ;;  %v2204_v19 = vsel %vm2179_vm3, %v2201_v12, %v2203_v16 }
 0x198   : > { %v1564_v30 = vpop.f32.mrf.mxu3  ;;  %v4747_v35 = vpop.f32.mrf.mxu2 }
 0x199   : > { %5426 = vst [vmem:[#allocation15_spill] sm:$0xff] %v4747_v35  ;;  %v4751_v25 = vadd.f32 %v1564_v30, %v1243_v34  ;;  %v4753_v21 = vpop.f32.mrf.mxu0  ;;  %v1202_v38 = vpop.f32.mrf.mxu1 }
 0x19a   : > { %v1244_v34 = vadd.f32 %v1202_v38, %v1000_v37  ;;  %v2206_v37 = vrot.slane %v4004_v47, 2 }
 0x19b   : > { %5428 = vst [vmem:[#allocation10_spill] sm:$0xff] %v4751_v25  ;;  %v5432_v25 = vld [vmem:[#allocation34_spill] sm:$0xff] }
 0x19c   : > { %3356 = vmatmul.msk.f32.gmra.mxu0 %vm519_vm1, %v5429_v48  ;;  %3424 = vmatmul.msk.f32.gmra.mxu1 %vm519_vm1, %v2202_v43  ;;  %v758_v5 = vadd.f32 %v4200_v40, %v5432_v25  ;;  %v2205_v25 = vrot.slane %v3979_v41, 2  ;;  %v5438_v41 = vld [vmem:[#allocation22_spill] sm:$0xff] }
 0x19d   : > { %3460 = vmatmul.msk.f32.gmra.mxu3 %vm519_vm1, %v2197_v42  ;;  %3496 = vmatmul.msk.f32.gmra.mxu2 %vm519_vm1, %v2202_v43  ;;  %v5435_v42 = vld [vmem:[#allocation27_spill] sm:$0xff]  ;;  %v2208_v47 = vrot.slane %v5438_v41, 2  ;;  %v5443_v41 = vld [vmem:[#allocation36_spill] sm:$0xff] }
 0x19e   : > { %v1001_v38 = vadd.f32 %v5435_v42, %v758_v5  ;;  %v5437_v5 = vld [vmem:[#allocation21_spill] sm:$0xff] }
 0x1a0   : > { %v1567_v30 = vpop.f32.mrf.mxu3  ;;  %v4763_v11 = vpop.f32.mrf.mxu2 }
 0x1a1   : > { %v4767_v35 = vadd.f32 %v1567_v30, %v1244_v34  ;;  %v4769_v48 = vpop.f32.mrf.mxu0  ;;  %v1205_v24 = vpop.f32.mrf.mxu1 }
 0x1a2   : > { %v1245_v36 = vadd.f32 %v1205_v24, %v1001_v38  ;;  %v5439_v24 = vld [vmem:[#allocation32_spill] sm:$0xff] }
 0x1a3   : > { %5433 = vst [vmem:[#allocation25_spill] sm:$0xff] %v4767_v35  ;;  %v2207_v35 = vsel %vm2179_vm3, %v2205_v25, %v2206_v37 }
 0x1a4   : > { %3357 = vmatmul.msk.f32.gmra.mxu0 %vm519_vm1, %v5434_v33  ;;  %3425 = vmatmul.msk.f32.gmra.mxu1 %vm519_vm1, %v2204_v19 }
 0x1a5   : > { %3461 = vmatmul.msk.f32.gmra.mxu3 %vm519_vm1, %v2199_v44  ;;  %3497 = vmatmul.msk.f32.gmra.mxu2 %vm519_vm1, %v2204_v19 }
 0x1a8   : > { %v1570_v34 = vpop.f32.mrf.mxu3  ;;  %v4780_v30 = vpop.f32.mrf.mxu2 }
 0x1a9   : > { %v4782_v12 = vadd.f32 %v1570_v34, %v1245_v36  ;;  %v4784_v16 = vpop.f32.mrf.mxu0  ;;  %v1208_v33 = vpop.f32.mrf.mxu1 }
 0x1aa   : > { %v1246_v44 = vadd.f32 %v1208_v33, %v5439_v24  ;;  %v2211_v33 = vrot.slane %v4038_v55, 2 }
 0x1ab   : > { %5436 = vst [vmem:[#allocation11_spill] sm:$0xff] %v4782_v12  ;;  %v5442_v12 = vld [vmem:[#allocation26_spill] sm:$0xff] }
 0x1ac   : > { %3358 = vmatmul.msk.f32.gmra.mxu0 %vm519_vm1, %v5437_v5  ;;  %3426 = vmatmul.msk.f32.gmra.mxu1 %vm519_vm1, %v2207_v35  ;;  %v2209_v5 = vsel %vm2179_vm3, %v2206_v37, %v2208_v47 }
 0x1ad   : > { %3462 = vmatmul.msk.f32.gmra.mxu3 %vm519_vm1, %v2202_v43  ;;  %3498 = vmatmul.msk.f32.gmra.mxu2 %vm519_vm1, %v2207_v35  ;;  %v2210_v43 = vrot.slane %v4020_v51, 2  ;;  %v5447_v51 = vld [vmem:[#allocation31_spill] sm:$0xff] }
 0x1ae   : > { %v2213_v55 = vrot.slane %v5447_v51, 2  ;;  %v5451_v51 = vld [vmem:[#allocation43_spill] sm:$0xff] }
 0x1af   : > { %v2212_v47 = vsel %vm2179_vm3, %v2210_v43, %v2211_v33 }
 0x1b0   : > { %v1573_v42 = vpop.f32.mrf.mxu3  ;;  %v4794_v38 = vpop.f32.mrf.mxu2 }
 0x1b1   : > { %5440 = vst [vmem:[#allocation18_spill] sm:$0xff] %v4794_v38  ;;  %v4796_v36 = vadd.f32 %v1573_v42, %v1246_v44  ;;  %v4798_v34 = vpop.f32.mrf.mxu0  ;;  %v1211_v25 = vpop.f32.mrf.mxu1  ;;  %v5446_v38 = vld [vmem:[#allocation30_spill] sm:$0xff] }
 0x1b2   : > { %v1247_v24 = vadd.f32 %v1211_v25, %v5443_v41 }
 0x1b3   : > { %5441 = vst [vmem:[#allocation29_spill] sm:$0xff] %v4796_v36 }
 0x1b4   : > { %3359 = vmatmul.msk.f32.gmra.mxu0 %vm519_vm1, %v5442_v12  ;;  %3427 = vmatmul.msk.f32.gmra.mxu1 %vm519_vm1, %v2209_v5 }
 0x1b5   : > { %3463 = vmatmul.msk.f32.gmra.mxu3 %vm519_vm1, %v2204_v19  ;;  %3499 = vmatmul.msk.f32.gmra.mxu2 %vm519_vm1, %v2209_v5  ;;  %v5448_v19 = vld [vmem:[#allocation40_spill] sm:$0xff] }
 0x1b8   : > { %v1576_v44 = vpop.f32.mrf.mxu3  ;;  %v4809_v42 = vpop.f32.mrf.mxu2 }
 0x1b9   : > { %5444 = vst [vmem:[#allocation13_spill] sm:$0xff] %v4809_v42  ;;  %v4811_v36 = vadd.f32 %v1576_v44, %v1247_v24  ;;  %v4813_v37 = vpop.f32.mrf.mxu0  ;;  %v1214_v12 = vpop.f32.mrf.mxu1  ;;  %v5450_v42 = vld [vmem:[#allocation35_spill] sm:$0xff] }
 0x1ba   : > { %v1248_v25 = vadd.f32 %v1214_v12, %v5448_v19  ;;  %v2216_v12 = vrot.slane %v4072_v63, 2 }
 0x1bb   : > { %5445 = vst [vmem:[#allocation23_spill] sm:$0xff] %v4811_v36 }
 0x1bc   : > { %3360 = vmatmul.msk.f32.gmra.mxu0 %vm519_vm1, %v5446_v38  ;;  %3428 = vmatmul.msk.f32.gmra.mxu1 %vm519_vm1, %v2212_v47  ;;  %v2214_v38 = vsel %vm2179_vm3, %v2211_v33, %v2213_v55 }
 0x1bd   : > { %3464 = vmatmul.msk.f32.gmra.mxu3 %vm519_vm1, %v2207_v35  ;;  %3500 = vmatmul.msk.f32.gmra.mxu2 %vm519_vm1, %v2212_v47  ;;  %v2215_v35 = vrot.slane %v4054_v59, 2  ;;  %v5455_v59 = vld [vmem:[#allocation39_spill] sm:$0xff] }
 0x1be   : > { %v2218_v63 = vrot.slane %v5455_v59, 2  ;;  %v2221_v59 = vrot.slane %v4116_v39, 2 }
 0x1bf   : > { %v2217_v55 = vsel %vm2179_vm3, %v2215_v35, %v2216_v12 }
 0x1c0   : > { %v1579_v41 = vpop.f32.mrf.mxu3  ;;  %v4823_v24 = vpop.f32.mrf.mxu2 }
 0x1c1   : > { %v4825_v44 = vadd.f32 %v1579_v41, %v1248_v25  ;;  %v4827_v36 = vpop.f32.mrf.mxu0  ;;  %v1217_v43 = vpop.f32.mrf.mxu1 }
 0x1c2   : > { %v1249_v19 = vadd.f32 %v1217_v43, %v5451_v51 }
 0x1c3   : > { %5449 = vst [vmem:[#allocation14_spill] sm:$0xff] %v4825_v44 }
 0x1c4   : > { %3361 = vmatmul.msk.f32.gmra.mxu0 %vm519_vm1, %v5450_v42  ;;  %3429 = vmatmul.msk.f32.gmra.mxu1 %vm519_vm1, %v2214_v38 }
 0x1c5   : > { %3465 = vmatmul.msk.f32.gmra.mxu3 %vm519_vm1, %v2209_v5  ;;  %3501 = vmatmul.msk.f32.gmra.mxu2 %vm519_vm1, %v2214_v38  ;;  %v5454_v5 = vld [vmem:[#allocation38_spill] sm:$0xff] }
 0x1c8   : > { %v1582_v25 = vpop.f32.mrf.mxu3  ;;  %v4838_v41 = vpop.f32.mrf.mxu2 }
 0x1c9   : > { %v4840_v44 = vadd.f32 %v1582_v25, %v1249_v19  ;;  %v4842_v33 = vpop.f32.mrf.mxu0  ;;  %v4844_v42 = vpop.f32.mrf.mxu1  ;;  %v5457_v19 = vld [vmem:[#allocation47_spill] sm:$0xff] }
 0x1ca   : > { %5453 = vst [vmem:[#allocation17_spill] sm:$0xff] %v4844_v42  ;;  %v5460_v42 = vld [vmem:[#allocation42_spill] sm:$0xff] }
 0x1cb   : > { %5452 = vst [vmem:[#allocation34_spill] sm:$0xff] %v4840_v44 }
 0x1cc   : > { %3362 = vmatmul.msk.f32.gmra.mxu0 %vm519_vm1, %v5454_v5  ;;  %3430 = vmatmul.msk.f32.gmra.mxu1 %vm519_vm1, %v2217_v55  ;;  %v2219_v5 = vsel %vm2179_vm3, %v2216_v12, %v2218_v63 }
 0x1cd   : > { %3466 = vmatmul.msk.f32.gmra.mxu3 %vm519_vm1, %v2212_v47  ;;  %3502 = vmatmul.msk.f32.gmra.mxu2 %vm519_vm1, %v2217_v55  ;;  %v2220_v47 = vrot.slane %v4092_v14, 2  ;;  %v5463_v14 = vld [vmem:[#allocation45_spill] sm:$0xff] }
 0x1ce   : > { %v2223_v39 = vrot.slane %v5463_v14, 2 }
 0x1d0   : > { %v1585_v43 = vpop.f32.mrf.mxu3  ;;  %v4853_v51 = vpop.f32.mrf.mxu2 }
 0x1d1   : > { %5456 = vst [vmem:[#allocation27_spill] sm:$0xff] %v4853_v51  ;;  %v4856_v25 = vadd.f32 %v1585_v43, %v5457_v19  ;;  %v4858_v44 = vpop.f32.mrf.mxu0  ;;  %v4860_v35 = vpop.f32.mrf.mxu1 }
 0x1d2   : > { %5459 = vst [vmem:[#allocation22_spill] sm:$0xff] %v4860_v35 }
 0x1d3   : > { %5458 = vst [vmem:[#allocation21_spill] sm:$0xff] %v4856_v25 }
 0x1d4   : > { %3363 = vmatmul.msk.f32.gmra.mxu0 %vm519_vm1, %v5460_v42  ;;  %3431 = vmatmul.msk.f32.gmra.mxu1 %vm519_vm1, %v2219_v5  ;;  %v2222_v42 = vsel %vm2179_vm3, %v2220_v47, %v2221_v59  ;;  %v2224_v47 = vsel %vm2179_vm3, %v2221_v59, %v2223_v39 }
 0x1d5   : > { %3467 = vmatmul.msk.f32.gmra.mxu3 %vm519_vm1, %v2214_v38  ;;  %3503 = vmatmul.msk.f32.gmra.mxu2 %vm519_vm1, %v2219_v5 }
 0x1d8   : > { %v1588_v43 = vpop.f32.mrf.mxu3  ;;  %v4870_v19 = vpop.f32.mrf.mxu2 }
 0x1d9   : > { %5461 = vst [vmem:[#allocation32_spill] sm:$0xff] %v4870_v19  ;;  %v4873_v35 = vadd.f32 %v1588_v43, %v4316_v52  ;;  %v1750_v12 = vpop.f32.mrf.mxu0  ;;  %v2344_v63 = vpop.f32.mrf.mxu1 }
 0x1db   : > { %5462 = vst [vmem:[#allocation26_spill] sm:$0xff] %v4873_v35 }
 0x1dc   : > { %3364 = vmatmul.msk.f32.gmra.mxu0 %vm519_vm1, %v4271_v15  ;;  %3432 = vmatmul.msk.f32.gmra.mxu1 %vm519_vm1, %v2222_v42  ;;  %v2225_v15 = vrot.slane %v4142_v62, 2  ;;  %v2228_v62 = vrot.slane %v4314_v1, 2 }
 0x1dd   : > { %3468 = vmatmul.msk.f32.gmra.mxu3 %vm519_vm1, %v2217_v55  ;;  %3504 = vmatmul.msk.f32.gmra.mxu2 %vm519_vm1, %v2222_v42  ;;  %v2226_v55 = vrot.slane %v4166_v4, 2  ;;  %v2440_v4 = vadd.f32 %v2344_v63, %v4371_v49  ;;  %v5467_v63 = vld [vmem:[#allocation24_spill] sm:$0xff] }
 0x1df   : > { %v2227_v39 = vsel %vm2179_vm3, %v2225_v15, %v2226_v55  ;;  %v2229_v49 = vsel %vm2179_vm3, %v2226_v55, %v2228_v62  ;;  %v3591_v55 = vld [vmem:[%s3800_s23 + $0xf0] sm:$0xff] }
 0x1e0   : > { %v4882_v38 = vpop.f32.mrf.mxu2  ;;  %v2537_v25 = vpop.f32.mrf.mxu3 }
 0x1e1   : > { %5464 = vst [vmem:[#allocation36_spill] sm:$0xff] %v4882_v38  ;;  %v4884_v52 = vpop.f32.mrf.mxu0  ;;  %v2347_v43 = vpop.f32.mrf.mxu1  ;;  %v2543_v15 = vadd.f32 %v2537_v25, %v2440_v4  ;;  %v3592_v4 = vld [vmem:[%s3800_s23 + $0xf8] sm:$0xff] }
 0x1e2   : > { %v2441_v25 = vadd.f32 %v2347_v43, %v4392_v6  ;;  %v2231_v62 = vrot.slane %v3592_v4, 2  ;;  %v5468_v43 = vld [vmem:[#allocation28_spill] sm:$0xff] }
 0x1e4   : > { %3365 = vmatmul.msk.f32.gmra.mxu0 %vm519_vm1, %v4289_v56  ;;  %3433 = vmatmul.msk.f32.gmra.mxu1 %vm519_vm1, %v2224_v47  ;;  %v5466_v56 = vld [vmem:[#allocation19_spill] sm:$0xff] }
 0x1e5   : > { %3469 = vmatmul.msk.f32.gmra.mxu3 %vm519_vm1, %v2219_v5  ;;  %3505 = vmatmul.msk.f32.gmra.mxu2 %vm519_vm1, %v2224_v47  ;;  %v735_v19 = vadd.f32 %v4200_v40, %v5466_v56 }
 0x1e7   : > { %v978_v5 = vadd.f32 %v4530_v7, %v735_v19 }
 0x1e8   : > { %v4894_v14 = vpop.f32.mrf.mxu2  ;;  %v2540_v35 = vpop.f32.mrf.mxu3 }
 0x1e9   : > { %5465 = vst [vmem:[#allocation30_spill] sm:$0xff] %v4894_v14  ;;  %v4896_v38 = vpop.f32.mrf.mxu0  ;;  %v2350_v59 = vpop.f32.mrf.mxu1  ;;  %v1222_v56 = vadd.f32 %v4308_v58, %v978_v5  ;;  %v2230_v5 = vrot.slane %v3591_v55, 2 }
 0x1eb   : > { %v1593_v1 = vadd.f32 %v4327_v28, %v1222_v56  ;;  %v2544_v28 = vadd.f32 %v2540_v35, %v2441_v25  ;;  %v2232_v6 = vsel %vm2179_vm3, %v2230_v5, %v2231_v62 }
 0x1ec   : > { %3366 = vmatmul.msk.f32.gmra.mxu0 %vm519_vm1, %v4311_v53  ;;  %3434 = vmatmul.msk.f32.gmra.mxu1 %vm519_vm1, %v2227_v39 }
 0x1ed   : > { %3470 = vmatmul.msk.f32.gmra.mxu3 %vm519_vm1, %v2222_v42  ;;  %3506 = vmatmul.msk.f32.gmra.mxu2 %vm519_vm1, %v2227_v39  ;;  %v736_v42 = vadd.f32 %v4200_v40, %v5467_v63 }
 0x1ef   : > { %v979_v58 = vadd.f32 %v4557_v20, %v736_v42 }
 0x1f0   : > { %v2598_v14 = vpop.f32.mrf.mxu3  ;;  %v2842_v7 = vpop.f32.mrf.mxu2 }
 0x1f1   : > { %v2932_v19 = vadd.f32 %v2842_v7, %v2543_v15  ;;  %v4913_v53 = vpop.f32.mrf.mxu0  ;;  %v2353_v51 = vpop.f32.mrf.mxu1  ;;  %v1840_v15 = vadd.f32 %v1750_v12, %v1593_v1 }
 0x1f3   : > { %3024 = vst [vmem:[%s4918_s11] sm:$0xff] %v2932_v19  ;;  %v2087_v42 = vadd.f32 %v4415_v0, %v1840_v15 }
 0x1f4   : > { %3367 = vmatmul.msk.f32.gmra.mxu0 %vm519_vm1, %v4336_v60  ;;  %3435 = vmatmul.msk.f32.gmra.mxu1 %vm519_vm1, %v2229_v49  ;;  %v1223_v60 = vadd.f32 %v4333_v45, %v979_v58 }
 0x1f5   : > { %3471 = vmatmul.msk.f32.gmra.mxu3 %vm519_vm1, %v2224_v47  ;;  %3507 = vmatmul.msk.f32.gmra.mxu2 %vm519_vm1, %v2229_v49  ;;  %v737_v47 = vadd.f32 %v4200_v40, %v5468_v43  ;;  %v2442_v35 = vadd.f32 %v2350_v59, %v2087_v42  ;;  %v2233_v40 = vrot.slane %v4358_v54, 2  ;;  %v5469_v54 = vld [vmem:[#allocation33_spill] sm:$0xff] }
 0x1f6   : > { %v1594_v45 = vadd.f32 %v4348_v2, %v1223_v60 }
 0x1f7   : > { %v980_v55 = vadd.f32 %v4582_v3, %v737_v47  ;;  %v2688_v12 = vadd.f32 %v2598_v14, %v2442_v35  ;;  %v2234_v59 = vsel %vm2179_vm3, %v2231_v62, %v2233_v40  ;;  %v3594_v62 = vld [vmem:[%s3800_s23 + $0x108] sm:$0xff] }
 0x1f8   : > { %v2601_v56 = vpop.f32.mrf.mxu3  ;;  %v2845_v7 = vpop.f32.mrf.mxu2  ;;  %v1841_v0 = vadd.f32 %v4884_v52, %v1594_v45  ;;  %v2235_v15 = vrot.slane %v3594_v62, 2  ;;  %v5472_v45 = vld [vmem:[#allocation68_spill] sm:$0xff] }
 0x1f9   : > { %v2933_v19 = vadd.f32 %v2845_v7, %v2544_v28  ;;  %v4932_v63 = vpop.f32.mrf.mxu0  ;;  %v2356_v20 = vpop.f32.mrf.mxu1  ;;  %v1224_v3 = vadd.f32 %v4352_v61, %v980_v55  ;;  %v3595_v28 = vld [vmem:[%s3800_s23 + $0x110] sm:$0xff] }
 0x1fa   : > { %v2088_v61 = vadd.f32 %v4436_v26, %v1841_v0  ;;  %v2236_v26 = vrot.slane %v3595_v28, 2 }
 0x1fb   : > { %3025 = vst [vmem:[%s4918_s11 + $0x8] sm:$0xff] %v2933_v19  ;;  %v1595_v14 = vadd.f32 %v4369_v9, %v1224_v3  ;;  %v5475_v3 = vld [vmem:[#allocation57_spill] sm:$0xff] }
 0x1fc   : > { %3368 = vmatmul.msk.f32.gmra.mxu0 %vm519_vm1, %v4355_v31  ;;  %3436 = vmatmul.msk.f32.gmra.mxu1 %vm519_vm1, %v2232_v6  ;;  %v2443_v4 = vadd.f32 %v2353_v51, %v2088_v61  ;;  %v2237_v51 = vsel %vm2179_vm3, %v2235_v15, %v2236_v26 }
 0x1fd   : > { %3472 = vmatmul.msk.f32.gmra.mxu3 %vm519_vm1, %v2227_v39  ;;  %3508 = vmatmul.msk.f32.gmra.mxu2 %vm519_vm1, %v2232_v6  ;;  %v4955_v39 = vld [vmem:[%s5263_s4] ss:$0 sm:$0xff]  ;;  %v1842_v7 = vadd.f32 %v4896_v38, %v1595_v14  ;;  %v5473_v38 = vld [vmem:[#allocation56_spill] sm:$0xff] }
 0x1fe   : > { %v738_v52 = vadd.f32 %v4955_v39, %v5469_v54  ;;  %v2689_v9 = vadd.f32 %v2601_v56, %v2443_v4  ;;  %v5474_v56 = vld [vmem:[#allocation53_spill] sm:$0xff] }
 0x1ff   : > { %v2089_v35 = vadd.f32 %v5472_v45, %v1842_v7  ;;  %v5479_v7 = vld [vmem:[#allocation61_spill] sm:$0xff] }
 0x200   : > { %v2604_v1 = vpop.f32.mrf.mxu3  ;;  %v2848_v58 = vpop.f32.mrf.mxu2  ;;  %v981_v5 = vadd.f32 %v4602_v27, %v738_v52  ;;  %v5476_v52 = vld [vmem:[#allocation55_spill] sm:$0xff] }
 0x201   : > { %v2934_v31 = vadd.f32 %v2848_v58, %v2688_v12  ;;  %v4949_v25 = vpop.f32.mrf.mxu0  ;;  %v2359_v2 = vpop.f32.mrf.mxu1  ;;  %v2444_v12 = vadd.f32 %v2356_v20, %v2089_v35  ;;  %v2238_v58 = vrot.slane %v5475_v3, 2  ;;  %v5480_v35 = vld [vmem:[#allocation60_spill] sm:$0xff] }
 0x203   : > { %3026 = vst [vmem:[%s4918_s11 + $0x10] sm:$0xff] %v2934_v31  ;;  %v2690_v54 = vadd.f32 %v2604_v1, %v2444_v12  ;;  %v2239_v20 = vsel %vm2179_vm3, %v2236_v26, %v2238_v58  ;;  %v3596_v26 = vld [vmem:[%s3800_s23 + $0x120] sm:$0xff] }
 0x204   : > { %3369 = vmatmul.msk.f32.gmra.mxu0 %vm519_vm1, %v4378_v57  ;;  %3437 = vmatmul.msk.f32.gmra.mxu1 %vm519_vm1, %v2234_v59  ;;  %v5470_v57 = vld [vmem:[#allocation52_spill] sm:$0xff] }
 0x205   : > { %3473 = vmatmul.msk.f32.gmra.mxu3 %vm519_vm1, %v2229_v49  ;;  %3509 = vmatmul.msk.f32.gmra.mxu2 %vm519_vm1, %v2234_v59  ;;  %v1225_v43 = vadd.f32 %v5470_v57, %v981_v5  ;;  %v5471_v49 = vld [vmem:[#allocation37_spill] sm:$0xff]  ;;  %v2240_v57 = vrot.slane %v3596_v26, 2 }
 0x206   : > { %v739_v55 = vadd.f32 %v4955_v39, %v5471_v49 }
 0x207   : > { %v1596_v0 = vadd.f32 %v5474_v56, %v1225_v43  ;;  %v3597_v43 = vld [vmem:[%s3800_s23 + $0x128] sm:$0xff] }
 0x208   : > { %v2607_v60 = vpop.f32.mrf.mxu3  ;;  %v2851_v19 = vpop.f32.mrf.mxu2  ;;  %v982_v40 = vadd.f32 %v4620_v29, %v739_v55 }
 0x209   : > { %v2935_v47 = vadd.f32 %v2851_v19, %v2689_v9  ;;  %v4972_v42 = vpop.f32.mrf.mxu0  ;;  %v2362_v27 = vpop.f32.mrf.mxu1  ;;  %v1843_v31 = vadd.f32 %v4913_v53, %v1596_v0  ;;  %v5478_v53 = vld [vmem:[#allocation58_spill] sm:$0xff] }
 0x20a   : > { %v1226_v29 = vadd.f32 %v5476_v52, %v982_v40 }
 0x20b   : > { %3027 = vst [vmem:[%s4918_s11 + $0x18] sm:$0xff] %v2935_v47  ;;  %v2090_v28 = vadd.f32 %v4480_v46, %v1843_v31  ;;  %v2241_v46 = vrot.slane %v3597_v43, 2  ;;  %v3598_v43 = vld [vmem:[%s3800_s23 + $0x138] sm:$0xff] }
 0x20c   : > { %3370 = vmatmul.msk.f32.gmra.mxu0 %vm519_vm1, %v5473_v38  ;;  %3438 = vmatmul.msk.f32.gmra.mxu1 %vm519_vm1, %v2237_v51  ;;  %v1597_v1 = vadd.f32 %v5478_v53, %v1226_v29 }
 0x20d   : > { %3474 = vmatmul.msk.f32.gmra.mxu3 %vm519_vm1, %v2232_v6  ;;  %3510 = vmatmul.msk.f32.gmra.mxu2 %vm519_vm1, %v2237_v51  ;;  %v5477_v6 = vld [vmem:[#allocation41_spill] sm:$0xff]  ;;  %v2445_v19 = vadd.f32 %v2359_v2, %v2090_v28  ;;  %v2242_v2 = vsel %vm2179_vm3, %v2240_v57, %v2241_v46 }
 0x20e   : > { %v740_v15 = vadd.f32 %v4955_v39, %v5477_v6  ;;  %v1844_v47 = vadd.f32 %v4932_v63, %v1597_v1  ;;  %v5482_v63 = vld [vmem:[#allocation65_spill] sm:$0xff] }
 0x20f   : > { %v2691_v49 = vadd.f32 %v2607_v60, %v2445_v19  ;;  %v5483_v60 = vld [vmem:[#allocation62_spill] sm:$0xff]  ;;  %v5489_v19 = vld [vmem:[#allocation71_spill] sm:$0xff] }
 0x210   : > { %v2610_v61 = vpop.f32.mrf.mxu3  ;;  %v2854_v14 = vpop.f32.mrf.mxu2  ;;  %v983_v9 = vadd.f32 %v4639_v17, %v740_v15  ;;  %v2091_v12 = vadd.f32 %v4503_v23, %v1844_v47  ;;  %v3599_v47 = vld [vmem:[%s3800_s23 + $0x140] sm:$0xff] }
 0x211   : > { %v2936_v5 = vadd.f32 %v2854_v14, %v2690_v54  ;;  %v4989_v4 = vpop.f32.mrf.mxu0  ;;  %v2365_v62 = vpop.f32.mrf.mxu1  ;;  %v5484_v54 = vld [vmem:[#allocation66_spill] sm:$0xff]  ;;  %v5485_v14 = vld [vmem:[#allocation64_spill] sm:$0xff] }
 0x212   : > { %v1227_v40 = vadd.f32 %v5480_v35, %v983_v9  ;;  %v2446_v31 = vadd.f32 %v2362_v27, %v2091_v12  ;;  %v2243_v52 = vrot.slane %v5484_v54, 2 }
 0x213   : > { %3028 = vst [vmem:[%s4918_s11 + $0x20] sm:$0xff] %v2936_v5 }
 0x214   : > { %3371 = vmatmul.msk.f32.gmra.mxu0 %vm519_vm1, %v5479_v7  ;;  %3439 = vmatmul.msk.f32.gmra.mxu1 %vm519_vm1, %v2239_v20  ;;  %v1598_v58 = vadd.f32 %v5483_v60, %v1227_v40  ;;  %v2692_v29 = vadd.f32 %v2610_v61, %v2446_v31  ;;  %v2244_v27 = vsel %vm2179_vm3, %v2241_v46, %v2243_v52  ;;  %v5487_v7 = vld [vmem:[#allocation82_spill] sm:$0xff]  ;;  %v2245_v46 = vrot.slane %v3598_v43, 2  ;;  %v5492_v60 = vld [vmem:[#allocation87_spill] sm:$0xff]  ;;  %v3600_v43 = vld [vmem:[%s3800_s23 + $0x150] sm:$0xff] }
 0x215   : > { %3475 = vmatmul.msk.f32.gmra.mxu3 %vm519_vm1, %v2234_v59  ;;  %3511 = vmatmul.msk.f32.gmra.mxu2 %vm519_vm1, %v2239_v20  ;;  %v5481_v59 = vld [vmem:[#allocation44_spill] sm:$0xff] }
 0x216   : > { %v741_v0 = vadd.f32 %v4955_v39, %v5481_v59  ;;  %v1845_v23 = vadd.f32 %v4949_v25, %v1598_v58  ;;  %v5488_v25 = vld [vmem:[#allocation67_spill] sm:$0xff]  ;;  %v5490_v59 = vld [vmem:[#allocation70_spill] sm:$0xff] }
 0x218   : > { %v2613_v55 = vpop.f32.mrf.mxu3  ;;  %v2857_v45 = vpop.f32.mrf.mxu2  ;;  %v984_v3 = vadd.f32 %v4656_v13, %v741_v0  ;;  %v2092_v9 = vadd.f32 %v5487_v7, %v1845_v23  ;;  %v5495_v23 = vld [vmem:[#allocation76_spill] sm:$0xff] }
 0x219   : > { %v2937_v38 = vadd.f32 %v2857_v45, %v2691_v49  ;;  %v5007_v56 = vpop.f32.mrf.mxu0  ;;  %v2368_v17 = vpop.f32.mrf.mxu1  ;;  %v2246_v49 = vrot.slane %v3599_v47, 2  ;;  %v3601_v47 = vld [vmem:[%s3800_s23 + $0x158] sm:$0xff] }
 0x21a   : > { %v1228_v13 = vadd.f32 %v5485_v14, %v984_v3  ;;  %v2447_v57 = vadd.f32 %v2365_v62, %v2092_v9 }
 0x21b   : > { %3029 = vst [vmem:[%s4918_s11 + $0x28] sm:$0xff] %v2937_v38  ;;  %v2247_v62 = vsel %vm2179_vm3, %v2245_v46, %v2246_v49  ;;  %v2250_v46 = vrot.slane %v3600_v43, 2 }
 0x21c   : > { %3372 = vmatmul.msk.f32.gmra.mxu0 %vm519_vm1, %v5482_v63  ;;  %3440 = vmatmul.msk.f32.gmra.mxu1 %vm519_vm1, %v2242_v2  ;;  %v1599_v61 = vadd.f32 %v5488_v25, %v1228_v13  ;;  %v2693_v35 = vadd.f32 %v2613_v55, %v2447_v57  ;;  %v5494_v55 = vld [vmem:[#allocation72_spill] sm:$0xff] }
 0x21d   : > { %3476 = vmatmul.msk.f32.gmra.mxu3 %vm519_vm1, %v2237_v51  ;;  %3512 = vmatmul.msk.f32.gmra.mxu2 %vm519_vm1, %v2242_v2  ;;  %v5486_v51 = vld [vmem:[#allocation46_spill] sm:$0xff] }
 0x21e   : > { %v742_v1 = vadd.f32 %v4955_v39, %v5486_v51  ;;  %v1846_v45 = vadd.f32 %v4972_v42, %v1599_v61  ;;  %v5493_v42 = vld [vmem:[#allocation75_spill] sm:$0xff] }
 0x220   : > { %v2616_v5 = vpop.f32.mrf.mxu3  ;;  %v2860_v6 = vpop.f32.mrf.mxu2  ;;  %v985_v26 = vadd.f32 %v4671_v8, %v742_v1  ;;  %v2093_v58 = vadd.f32 %v5492_v60, %v1846_v45  ;;  %v5502_v60 = vld [vmem:[#allocation94_spill] sm:$0xff] }
 0x221   : > { %v2938_v15 = vadd.f32 %v2860_v6, %v2692_v29  ;;  %v5024_v28 = vpop.f32.mrf.mxu0  ;;  %v2371_v53 = vpop.f32.mrf.mxu1  ;;  %v2248_v29 = vrot.slane %v5495_v23, 2  ;;  %v5496_v6 = vld [vmem:[#allocation74_spill] sm:$0xff] }
 0x222   : > { %v1229_v0 = vadd.f32 %v5490_v59, %v985_v26  ;;  %v2448_v52 = vadd.f32 %v2368_v17, %v2093_v58  ;;  %v5500_v59 = vld [vmem:[#allocation79_spill] sm:$0xff] }
 0x223   : > { %3030 = vst [vmem:[%s4918_s11 + $0x30] sm:$0xff] %v2938_v15  ;;  %v2249_v17 = vsel %vm2179_vm3, %v2246_v49, %v2248_v29 }
 0x224   : > { %3373 = vmatmul.msk.f32.gmra.mxu0 %vm519_vm1, %v5489_v19  ;;  %3441 = vmatmul.msk.f32.gmra.mxu1 %vm519_vm1, %v2244_v27  ;;  %v1600_v54 = vadd.f32 %v5494_v55, %v1229_v0  ;;  %v2694_v13 = vadd.f32 %v2616_v5, %v2448_v52  ;;  %v5499_v19 = vld [vmem:[#allocation80_spill] sm:$0xff] }
 0x225   : > { %3477 = vmatmul.msk.f32.gmra.mxu3 %vm519_vm1, %v2239_v20  ;;  %3513 = vmatmul.msk.f32.gmra.mxu2 %vm519_vm1, %v2244_v27  ;;  %v5491_v20 = vld [vmem:[#allocation48_spill] sm:$0xff] }
 0x226   : > { %v743_v63 = vadd.f32 %v4955_v39, %v5491_v20  ;;  %v1847_v14 = vadd.f32 %v4989_v4, %v1600_v54  ;;  %v5498_v4 = vld [vmem:[#allocation77_spill] sm:$0xff] }
 0x227   : > { %v5505_v54 = vld [vmem:[#allocation85_spill] sm:$0xff] }
 0x228   : > { %v2619_v40 = vpop.f32.mrf.mxu3  ;;  %v2863_v38 = vpop.f32.mrf.mxu2  ;;  %v986_v31 = vadd.f32 %v4687_v10, %v743_v63  ;;  %v2094_v61 = vadd.f32 %v4580_v32, %v1847_v14  ;;  %v2251_v32 = vrot.slane %v3601_v47, 2  ;;  %v2253_v52 = vrot.slane %v5505_v54, 2 }
 0x229   : > { %v2939_v12 = vadd.f32 %v2863_v38, %v2693_v35  ;;  %v5042_v3 = vpop.f32.mrf.mxu0  ;;  %v2374_v8 = vpop.f32.mrf.mxu1 }
 0x22a   : > { %v1230_v10 = vadd.f32 %v5496_v6, %v986_v31  ;;  %v2449_v57 = vadd.f32 %v2371_v53, %v2094_v61  ;;  %v2252_v53 = vsel %vm2179_vm3, %v2250_v46, %v2251_v32  ;;  %v5503_v31 = vld [vmem:[#allocation84_spill] sm:$0xff]  ;;  %v5506_v6 = vld [vmem:[#allocation83_spill] sm:$0xff] }
 0x22b   : > { %3031 = vst [vmem:[%s4918_s11 + $0x38] sm:$0xff] %v2939_v12 }
 0x22c   : > { %3374 = vmatmul.msk.f32.gmra.mxu0 %vm519_vm1, %v5493_v42  ;;  %3442 = vmatmul.msk.f32.gmra.mxu1 %vm519_vm1, %v2247_v62  ;;  %v1601_v5 = vadd.f32 %v5498_v4, %v1230_v10  ;;  %v2695_v45 = vadd.f32 %v2619_v40, %v2449_v57  ;;  %v5504_v40 = vld [vmem:[#allocation81_spill] sm:$0xff]  ;;  %v3602_v4 = vld [vmem:[%s3800_s23 + $0x168] sm:$0xff]  ;;  %v5510_v57 = vld [vmem:[#allocation86_spill] sm:$0xff] }
 0x22d   : > { %3478 = vmatmul.msk.f32.gmra.mxu3 %vm519_vm1, %v2242_v2  ;;  %3514 = vmatmul.msk.f32.gmra.mxu2 %vm519_vm1, %v2247_v62  ;;  %v5497_v2 = vld [vmem:[#allocation49_spill] sm:$0xff] }
 0x22e   : > { %v744_v25 = vadd.f32 %v4955_v39, %v5497_v2  ;;  %v1848_v49 = vadd.f32 %v5007_v56, %v1601_v5  ;;  %v5507_v2 = vld [vmem:[#allocation51_spill] sm:$0xff]  ;;  %v5509_v5 = vld [vmem:[#allocation89_spill] sm:$0xff] }
 0x230   : > { %v2622_v15 = vpop.f32.mrf.mxu3  ;;  %v2866_v51 = vpop.f32.mrf.mxu2  ;;  %v987_v26 = vadd.f32 %v4702_v50, %v744_v25  ;;  %v2095_v58 = vadd.f32 %v5502_v60, %v1848_v49  ;;  %v5508_v25 = vld [vmem:[#allocation97_spill] sm:$0xff] }
 0x231   : > { %v2940_v1 = vadd.f32 %v2866_v51, %v2694_v13  ;;  %v5059_v7 = vpop.f32.mrf.mxu0  ;;  %v2377_v9 = vpop.f32.mrf.mxu1 }
 0x232   : > { %v1231_v0 = vadd.f32 %v5500_v59, %v987_v26  ;;  %v2450_v55 = vadd.f32 %v2374_v8, %v2095_v58  ;;  %v2254_v8 = vsel %vm2179_vm3, %v2251_v32, %v2253_v52 }
 0x233   : > { %3032 = vst [vmem:[%s4918_s11 + $0x40] sm:$0xff] %v2940_v1 }
 0x234   : > { %3375 = vmatmul.msk.f32.gmra.mxu0 %vm519_vm1, %v5499_v19  ;;  %3443 = vmatmul.msk.f32.gmra.mxu1 %vm519_vm1, %v2249_v17  ;;  %v1602_v42 = vadd.f32 %v5504_v40, %v1231_v0  ;;  %v2696_v29 = vadd.f32 %v2622_v15, %v2450_v55  ;;  %v3603_v15 = vld [vmem:[%s3800_s23 + $0x170] sm:$0xff]  ;;  %s3527_s23 = sshll.u32 %s3674_s1, 8  ;;  %s3072_s1 = sshll.u32 %s4918_s11, 4  ;;  %s3073_s1 = int_to_ptr.vmem [resolvable:$true] %s3072_s1 }
 0x235   : > { %3479 = vmatmul.msk.f32.gmra.mxu3 %vm519_vm1, %v2244_v27  ;;  %3515 = vmatmul.msk.f32.gmra.mxu2 %vm519_vm1, %v2249_v17  ;;  %v5501_v27 = vld [vmem:[#allocation50_spill] sm:$0xff]  ;;  %v2256_v19 = vrot.slane %v3603_v15, 2  ;;  %v5516_v40 = vld [vmem:[#allocation92_spill] sm:$0xff]  ;;  %s3071_s16 = scalar_lea.hbm %s5264_s5, %s3527_s23 }
 0x236   : > { %v745_v63 = vadd.f32 %v4955_v39, %v5501_v27  ;;  %v1849_v23 = vadd.f32 %v5024_v28, %v1602_v42  ;;  %v2255_v28 = vrot.slane %v3602_v4, 2  ;;  %v2258_v42 = vrot.slane %v5516_v40, 2  ;;  %s3074_s17 = sshll.u32 %s3071_s16, 4  ;;  %s3075_s17 = int_to_ptr.hbm [resolvable:$true] %s3074_s17 }
 0x237   : > { %s3618_s25 = sshra.s32 %s3075_s17, 4  ;;  %s3619_s25 = int_to_ptr.hbm [resolvable:$true] %s3618_s25 }
 0x238   : > { %v2625_v35 = vpop.f32.mrf.mxu3  ;;  %v2869_v38 = vpop.f32.mrf.mxu2  ;;  %v988_v56 = vadd.f32 %v4720_v22, %v745_v63  ;;  %v2096_v61 = vadd.f32 %v5508_v25, %v1849_v23  ;;  %v5512_v63 = vld [vmem:[#allocation54_spill] sm:$0xff]  ;;  %s3620_s27 = scalar_lea.hbm %s3619_s25, 256  ;;  %p3625_p1 = scmp.lt.s32.totalorder %s3619_s25, %s5264_s5 }
 0x239   : > { %v2941_v12 = vadd.f32 %v2869_v38, %v2695_v45  ;;  %v5077_v20 = vpop.f32.mrf.mxu0  ;;  %v2380_v50 = vpop.f32.mrf.mxu1  ;;  %v5511_v38 = vld [vmem:[#allocation88_spill] sm:$0xff]  ;;  %v747_v60 = vadd.f32 %v4955_v39, %v5512_v63  ;;  %v5525_v63 = vld [vmem:[#allocation98_spill] sm:$0xff]  ;;  %p3621_p12 = scmp.ne.s32.totalorder %s3619_s25, %s3620_s27  ;;  %p3626_p2 = scmp.lt.s32.totalorder %s3624_s7, %s3620_s27 }
 0x23a   : > { %v1232_v10 = vadd.f32 %v5506_v6, %v988_v56  ;;  %v2451_v46 = vadd.f32 %v2377_v9, %v2096_v61  ;;  %v5513_v9 = vld [vmem:[#allocation101_spill] sm:$0xff] }
 0x23b   : > { %3033 = vst [vmem:[%s4918_s11 + $0x48] sm:$0xff] %v2941_v12  ;;  %p3622_p13 = pnand %p3621_p12, %p3757_p4  ;;  %p3627_p3 = por %p3626_p2, %p3625_p1 }
 0x23c   : > { %3376 = vmatmul.msk.f32.gmra.mxu0 %vm519_vm1, %v5503_v31  ;;  %3444 = vmatmul.msk.f32.gmra.mxu1 %vm519_vm1, %v2252_v53  ;;  %v1603_v43 = vadd.f32 %v5510_v57, %v1232_v10  ;;  %v2697_v32 = vadd.f32 %v2625_v35, %v2451_v46  ;;  %v5515_v35 = vld [vmem:[#allocation90_spill] sm:$0xff] }
 0x23d   : > { %3480 = vmatmul.msk.f32.gmra.mxu3 %vm519_vm1, %v2247_v62  ;;  %3516 = vmatmul.msk.f32.gmra.mxu2 %vm519_vm1, %v2252_v53  ;;  %v746_v62 = vadd.f32 %v4955_v39, %v5507_v2  ;;  %v5518_v2 = vld [vmem:[#allocation59_spill] sm:$0xff]  ;;  %p3623_p0 = pneg %p3622_p13 }
 0x23e   : > { %v1850_v47 = vadd.f32 %v5042_v3, %v1603_v43  ;;  %v990_v3 = vadd.f32 %v4753_v21, %v747_v60 }
 0x23f   : > { %v989_v26 = vadd.f32 %v4736_v18, %v746_v62  ;;  %v2257_v18 = vsel %vm2179_vm3, %v2255_v28, %v2256_v19  ;;  %p3628_p5 = pnand %p3627_p3, %p3623_p0 }
 0x240   : > { %v2628_v14 = vpop.f32.mrf.mxu3  ;;  %v2872_v13 = vpop.f32.mrf.mxu2  ;;  %v2097_v58 = vadd.f32 %v5513_v9, %v1850_v47  ;;  %v5522_v47 = vld [vmem:[#allocation63_spill] sm:$0xff] }
 0x241   : > { %v2942_v22 = vadd.f32 %v2872_v13, %v2696_v29  ;;  %v5094_v51 = vpop.f32.mrf.mxu0  ;;  %v2383_v1 = vpop.f32.mrf.mxu1  ;;  %v1233_v59 = vadd.f32 %v5511_v38, %v989_v26  ;;  %v5517_v29 = vld [vmem:[#allocation91_spill] sm:$0xff] }
 0x242   : > { %v2452_v56 = vadd.f32 %v2380_v50, %v2097_v58  ;;  %v1234_v13 = vadd.f32 %v5517_v29, %v990_v3  ;;  %v748_v50 = vadd.f32 %v4955_v39, %v5518_v2  ;;  %v5526_v3 = vld [vmem:[#allocation69_spill] sm:$0xff] }
 0x243   : > { %3034 = vst [vmem:[%s4918_s11 + $0x50] sm:$0xff] %v2942_v22  ;;  %v1604_v31 = vadd.f32 %v5515_v35, %v1233_v59  ;;  %v2259_v22 = vsel %vm2179_vm3, %v2256_v19, %v2258_v42  ;;  %v5521_v19 = vld [vmem:[#allocation95_spill] sm:$0xff]  ;;  %v750_v35 = vadd.f32 %v4955_v39, %v5526_v3  ;;  %v5530_v2 = vld [vmem:[#allocation73_spill] sm:$0xff]  ;;  %v5539_v3 = vld [vmem:[#allocation20_spill] sm:$0xff] }
 0x244   : > { %3377 = vmatmul.msk.f32.gmra.mxu0 %vm519_vm1, %v5509_v5  ;;  %3445 = vmatmul.msk.f32.gmra.mxu1 %vm519_vm1, %v2254_v8  ;;  %v2698_v54 = vadd.f32 %v2628_v14, %v2452_v56  ;;  %v5520_v14 = vld [vmem:[#allocation93_spill] sm:$0xff] }
 0x245   : > { %3481 = vmatmul.msk.f32.gmra.mxu3 %vm519_vm1, %v2249_v17  ;;  %3517 = vmatmul.msk.f32.gmra.mxu2 %vm519_vm1, %v2254_v8  ;;  %v5514_v17 = vld [vmem:[#allocation99_spill] sm:$0xff]  ;;  %v1851_v55 = vadd.f32 %v5059_v7, %v1604_v31  ;;  %v991_v7 = vadd.f32 %v4769_v48, %v748_v50  ;;  %v1605_v25 = vadd.f32 %v5520_v14, %v1234_v13  ;;  %v5527_v31 = vld [vmem:[#allocation110_spill] sm:$0xff] }
 0x246   : > { %v749_v48 = vadd.f32 %v4955_v39, %v5522_v47  ;;  %v751_v50 = vadd.f32 %v4955_v39, %v5530_v2 }
 0x247   : > { %v1852_v4 = vadd.f32 %v5077_v20, %v1605_v25  ;;  %v1235_v26 = vadd.f32 %v5521_v19, %v991_v7  ;;  %v5532_v7 = vld [vmem:[#allocation103_spill] sm:$0xff] }
 0x248   : > { %v2631_v49 = vpop.f32.mrf.mxu3  ;;  %v2875_v45 = vpop.f32.mrf.mxu2 }
 0x249   : > { %v2943_v0 = vadd.f32 %v2875_v45, %v2697_v32  ;;  %v1792_v12 = vpop.f32.mrf.mxu0  ;;  %v2386_v27 = vpop.f32.mrf.mxu1  ;;  %v5523_v32 = vld [vmem:[#allocation107_spill] sm:$0xff]  ;;  %v5524_v45 = vld [vmem:[#allocation96_spill] sm:$0xff] }
 0x24a   : > { %v1606_v38 = vadd.f32 %v5524_v45, %v1235_v26 }
 0x24b   : > { %3035 = vst [vmem:[%s4918_s11 + $0x58] sm:$0xff] %v2943_v0 }
 0x24c   : > { %3446 = vmatmul.msk.f32.gmra.mxu1 %vm519_vm1, %v2257_v18  ;;  %3486 = vmatmul.msk.f32.vlgmr.msrb.gmra.mxu0 %vm519_vm1, %v5514_v17 }
 0x24d   : > { %3482 = vmatmul.msk.f32.gmra.mxu3 %vm519_vm1, %v2252_v53  ;;  %3518 = vmatmul.msk.f32.gmra.mxu2 %vm519_vm1, %v2257_v18  ;;  %v5519_v53 = vld [vmem:[#allocation104_spill] sm:$0xff] }
 0x24e   : > { %v2098_v62 = vadd.f32 %v5519_v53, %v1851_v55  ;;  %v5531_v53 = vld [vmem:[#allocation7_spill] sm:$0xff] }
 0x250   : > { %v2634_v52 = vpop.f32.mrf.mxu3  ;;  %v2878_v23 = vpop.f32.mrf.mxu2  ;;  %v2453_v61 = vadd.f32 %v2383_v1, %v2098_v62  ;;  %v2099_v1 = vadd.f32 %v5523_v32, %v1852_v4 }
 0x251   : > { %v2944_v6 = vadd.f32 %v2878_v23, %v2698_v54  ;;  %v1795_v10 = vpop.f32.mrf.mxu0  ;;  %v2389_v21 = vpop.f32.mrf.mxu1  ;;  %v5529_v23 = vld [vmem:[#allocation102_spill] sm:$0xff] }
 0x252   : > { %v2699_v28 = vadd.f32 %v2631_v49, %v2453_v61  ;;  %v2454_v20 = vadd.f32 %v2386_v27, %v2099_v1  ;;  %v1853_v49 = vadd.f32 %v5094_v51, %v1606_v38  ;;  %v5528_v27 = vld [vmem:[#allocation100_spill] sm:$0xff]  ;;  %v5536_v1 = vld [vmem:[#allocation106_spill] sm:$0xff] }
 0x253   : > { %3036 = vst [vmem:[%s4918_s11 + $0x60] sm:$0xff] %v2944_v6 }
 0x254   : > { %3447 = vmatmul.msk.f32.gmra.mxu1 %vm519_vm1, %v2259_v22  ;;  %3487 = vmatmul.msk.f32.gmra.mxu0 %vm519_vm1, %v5514_v17  ;;  %v2700_v59 = vadd.f32 %v2634_v52, %v2454_v20  ;;  %v2100_v56 = vadd.f32 %v5527_v31, %v1853_v49  ;;  %v5537_v49 = vld [vmem:[#allocation108_spill] sm:$0xff]  ;;  %v5540_v31 = vld [vmem:[#allocation109_spill] sm:$0xff] }
 0x255   : > { %3483 = vmatmul.msk.f32.gmra.mxu3 %vm519_vm1, %v2254_v8  ;;  %3519 = vmatmul.msk.f32.gmra.mxu2 %vm519_vm1, %v2259_v22  ;;  %v992_v8 = vadd.f32 %v4784_v16, %v749_v48  ;;  %v993_v16 = vadd.f32 %v4798_v34, %v750_v35  ;;  %v994_v34 = vadd.f32 %v4813_v37, %v751_v50  ;;  %v5535_v48 = vld [vmem:[#allocation113_spill] sm:$0xff]  ;;  %v5544_v50 = vld [vmem:[#allocation6_spill] sm:$0xff] }
 0x256   : > { %v2455_v51 = vadd.f32 %v2389_v21, %v2100_v56 }
 0x257   : > { %v1236_v60 = vadd.f32 %v5525_v63, %v992_v8  ;;  %v1237_v29 = vadd.f32 %v5529_v23, %v993_v16  ;;  %v5542_v23 = vld [vmem:[#allocation16_spill] sm:$0xff] }
 0x258   : > { %v2637_v5 = vpop.f32.mrf.mxu3  ;;  %v2881_v15 = vpop.f32.mrf.mxu2 }
 0x259   : > { %v2945_v57 = vadd.f32 %v2881_v15, %v2699_v28  ;;  %v1798_v43 = vpop.f32.mrf.mxu0  ;;  %v2392_v46 = vpop.f32.mrf.mxu1  ;;  %v1607_v40 = vadd.f32 %v5528_v27, %v1236_v60  ;;  %v2701_v55 = vadd.f32 %v2637_v5, %v2455_v51  ;;  %v1608_v21 = vadd.f32 %v5532_v7, %v1237_v29  ;;  %v5533_v28 = vld [vmem:[#allocation105_spill] sm:$0xff]  ;;  %v5538_v60 = vld [vmem:[#allocation12_spill] sm:$0xff]  ;;  %v5541_v51 = vld [vmem:[#allocation111_spill] sm:$0xff] }
 0x25a   : > { %v1238_v5 = vadd.f32 %v5533_v28, %v994_v34  ;;  %v754_v29 = vadd.f32 %v4955_v39, %v5542_v23  ;;  %v5552_v23 = vld [vmem:[#allocation11_spill] sm:$0xff] }
 0x25b   : > { %3037 = vst [vmem:[%s4918_s11 + $0x68] sm:$0xff] %v2945_v57  ;;  %v1854_v42 = vadd.f32 %v1792_v12, %v1607_v40  ;;  %v1855_v14 = vadd.f32 %v1795_v10, %v1608_v21  ;;  %v5534_v57 = vld [vmem:[#allocation78_spill] sm:$0xff]  ;;  %v5545_v21 = vld [vmem:[#allocation112_spill] sm:$0xff] }
 0x25c   : > { %v752_v47 = vadd.f32 %v4955_v39, %v5534_v57 }
 0x25d   : > { %v2101_v62 = vadd.f32 %v5531_v53, %v1854_v42  ;;  %v2102_v32 = vadd.f32 %v5535_v48, %v1855_v14 }
 0x25e   : > { %v995_v37 = vadd.f32 %v4827_v36, %v752_v47 }
 0x25f   : > { %v2456_v12 = vadd.f32 %v2392_v46, %v2101_v62  ;;  %v1609_v46 = vadd.f32 %v5536_v1, %v1238_v5  ;;  %v5547_v1 = vld [vmem:[#allocation9_spill] sm:$0xff] }
 0x260   : > { %v2640_v0 = vpop.f32.mrf.mxu3  ;;  %v2884_v18 = vpop.f32.mrf.mxu2 }
 0x261   : > { %v2946_v9 = vadd.f32 %v2884_v18, %v2700_v59  ;;  %v1801_v58 = vpop.f32.mrf.mxu0  ;;  %v2395_v17 = vpop.f32.mrf.mxu1  ;;  %v2702_v25 = vadd.f32 %v2640_v0, %v2456_v12  ;;  %v1856_v8 = vadd.f32 %v1798_v43, %v1609_v46  ;;  %v1239_v59 = vadd.f32 %v5537_v49, %v995_v37 }
 0x262   : > { %v2457_v10 = vadd.f32 %v2395_v17, %v2102_v32 }
 0x263   : > { %3038 = vst [vmem:[%s4918_s11 + $0x70] sm:$0xff] %v2946_v9  ;;  %v753_v9 = vadd.f32 %v4955_v39, %v5538_v60  ;;  %v2103_v35 = vadd.f32 %v5539_v3, %v1856_v8  ;;  %v1610_v17 = vadd.f32 %v5540_v31, %v1239_v59 }
 0x265   : > { %v996_v36 = vadd.f32 %v4842_v33, %v753_v9  ;;  %v1857_v56 = vadd.f32 %v1801_v58, %v1610_v17  ;;  %v997_v33 = vadd.f32 %v4858_v44, %v754_v29 }
 0x267   : > { %v1240_v42 = vadd.f32 %v5541_v51, %v996_v36  ;;  %v1241_v12 = vadd.f32 %v5545_v21, %v997_v33  ;;  %v5550_v36 = vld [vmem:[#allocation13_spill] sm:$0xff] }
 0x268   : > { %v2643_v54 = vpop.f32.mrf.mxu3  ;;  %v2887_v52 = vpop.f32.mrf.mxu2 }
 0x269   : > { %v2947_v13 = vadd.f32 %v2887_v52, %v2701_v55  ;;  %v1804_v6 = vpop.f32.mrf.mxu0  ;;  %v2398_v22 = vpop.f32.mrf.mxu1  ;;  %v2703_v45 = vadd.f32 %v2643_v54, %v2457_v10 }
 0x26a   : > { %v2458_v43 = vadd.f32 %v2398_v22, %v2103_v35  ;;  %v1611_v22 = vadd.f32 %v5544_v50, %v1240_v42 }
 0x26b   : > { %3039 = vst [vmem:[%s4918_s11 + $0x78] sm:$0xff] %v2947_v13  ;;  %v5543_v13 = vld [vmem:[#allocation15_spill] sm:$0xff] }
 0x26c   : > { %v2104_v2 = vadd.f32 %v5543_v13, %v1857_v56  ;;  %v1858_v53 = vadd.f32 %v1804_v6, %v1611_v22 }
 0x26e   : > { %v2105_v39 = vadd.f32 %v4763_v11, %v1858_v53 }
 0x270   : > { %v2646_v61 = vpop.f32.mrf.mxu3  ;;  %v2890_v4 = vpop.f32.mrf.mxu2 }
 0x271   : > { %v2948_v15 = vadd.f32 %v2890_v4, %v2702_v25  ;;  %v1807_v19 = vpop.f32.mrf.mxu0  ;;  %v2401_v26 = vpop.f32.mrf.mxu1  ;;  %v2704_v16 = vadd.f32 %v2646_v61, %v2458_v43  ;;  %v5546_v4 = vld [vmem:[#allocation8_spill] sm:$0xff]  ;;  %v5551_v43 = vld [vmem:[#allocation25_spill] sm:$0xff] }
 0x272   : > { %v2459_v58 = vadd.f32 %v2401_v26, %v2104_v2  ;;  %v1612_v28 = vadd.f32 %v5546_v4, %v1241_v12 }
 0x273   : > { %3040 = vst [vmem:[%s4918_s11 + $0x80] sm:$0xff] %v2948_v15 }
 0x274   : > { %v1859_v44 = vadd.f32 %v1807_v19, %v1612_v28 }
 0x276   : > { %v2106_v32 = vadd.f32 %v4780_v30, %v1859_v44 }
 0x278   : > { %v2649_v38 = vpop.f32.mrf.mxu3  ;;  %v2893_v20 = vpop.f32.mrf.mxu2 }
 0x279   : > { %v2949_v0 = vadd.f32 %v2893_v20, %v2703_v45  ;;  %v1810_v18 = vpop.f32.mrf.mxu0  ;;  %v2404_v63 = vpop.f32.mrf.mxu1  ;;  %v2705_v62 = vadd.f32 %v2649_v38, %v2459_v58  ;;  %v5548_v20 = vld [vmem:[#allocation18_spill] sm:$0xff] }
 0x27a   : > { %v2460_v5 = vadd.f32 %v2404_v63, %v2105_v39  ;;  %v1860_v46 = vadd.f32 %v1810_v18, %v5547_v1  ;;  %v5557_v1 = vld [vmem:[#allocation14_spill] sm:$0xff] }
 0x27b   : > { %3041 = vst [vmem:[%s4918_s11 + $0x88] sm:$0xff] %v2949_v0  ;;  %v5549_v0 = vld [vmem:[#allocation10_spill] sm:$0xff] }
 0x27c   : > { %v2107_v49 = vadd.f32 %v5548_v20, %v1860_v46 }
 0x280   : > { %v2652_v27 = vpop.f32.mrf.mxu3  ;;  %v2896_v40 = vpop.f32.mrf.mxu2 }
 0x281   : > { %v2950_v55 = vadd.f32 %v2896_v40, %v2704_v16  ;;  %v1813_v54 = vpop.f32.mrf.mxu0  ;;  %v2407_v52 = vpop.f32.mrf.mxu1  ;;  %v2706_v15 = vadd.f32 %v2652_v27, %v2460_v5  ;;  %v5555_v5 = vld [vmem:[#allocation23_spill] sm:$0xff] }
 0x282   : > { %v2461_v37 = vadd.f32 %v2407_v52, %v2106_v32  ;;  %v1861_v63 = vadd.f32 %v1813_v54, %v5549_v0 }
 0x283   : > { %3042 = vst [vmem:[%s4918_s11 + $0x90] sm:$0xff] %v2950_v55 }
 0x284   : > { %v2108_v31 = vadd.f32 %v5550_v36, %v1861_v63  ;;  %v5560_v63 = vld [vmem:[#allocation17_spill] sm:$0xff] }
 0x288   : > { %v2655_v34 = vpop.f32.mrf.mxu3  ;;  %v2899_v7 = vpop.f32.mrf.mxu2 }
 0x289   : > { %v2951_v14 = vadd.f32 %v2899_v7, %v2705_v62  ;;  %v1816_v25 = vpop.f32.mrf.mxu0  ;;  %v2410_v61 = vpop.f32.mrf.mxu1  ;;  %v2707_v10 = vadd.f32 %v2655_v34, %v2461_v37  ;;  %v5553_v34 = vld [vmem:[#allocation29_spill] sm:$0xff] }
 0x28a   : > { %v2462_v59 = vadd.f32 %v2410_v61, %v2107_v49  ;;  %v1862_v56 = vadd.f32 %v1816_v25, %v5551_v43  ;;  %v5554_v61 = vld [vmem:[#allocation27_spill] sm:$0xff]  ;;  %v5559_v49 = vld [vmem:[#allocation36_spill] sm:$0xff] }
 0x28b   : > { %3043 = vst [vmem:[%s4918_s11 + $0x98] sm:$0xff] %v2951_v14 }
 0x28c   : > { %v2109_v54 = vadd.f32 %v4823_v24, %v1862_v56 }
 0x290   : > { %v2658_v57 = vpop.f32.mrf.mxu3  ;;  %v2902_v6 = vpop.f32.mrf.mxu2 }
 0x291   : > { %v2952_v26 = vadd.f32 %v2902_v6, %v2706_v15  ;;  %v1819_v47 = vpop.f32.mrf.mxu0  ;;  %v2413_v48 = vpop.f32.mrf.mxu1  ;;  %v2708_v60 = vadd.f32 %v2658_v57, %v2462_v59 }
 0x292   : > { %v2463_v17 = vadd.f32 %v2413_v48, %v2108_v31  ;;  %v1863_v29 = vadd.f32 %v1819_v47, %v5552_v23  ;;  %v5556_v47 = vld [vmem:[#allocation32_spill] sm:$0xff] }
 0x293   : > { %3044 = vst [vmem:[%s4918_s11 + $0xa0] sm:$0xff] %v2952_v26 }
 0x294   : > { %v2110_v53 = vadd.f32 %v4838_v41, %v1863_v29 }
 0x298   : > { %v2661_v11 = vpop.f32.mrf.mxu3  ;;  %v2905_v8 = vpop.f32.mrf.mxu2 }
 0x299   : > { %v2953_v45 = vadd.f32 %v2905_v8, %v2707_v10  ;;  %v1822_v38 = vpop.f32.mrf.mxu0  ;;  %v2416_v19 = vpop.f32.mrf.mxu1  ;;  %v2709_v16 = vadd.f32 %v2661_v11, %v2463_v17  ;;  %v5562_v17 = vld [vmem:[#allocation26_spill] sm:$0xff] }
 0x29a   : > { %v2464_v52 = vadd.f32 %v2416_v19, %v2109_v54  ;;  %v1864_v7 = vadd.f32 %v1822_v38, %v5553_v34  ;;  %v5564_v54 = vld [vmem:[#allocation22_spill] sm:$0xff] }
 0x29b   : > { %3045 = vst [vmem:[%s4918_s11 + $0xa8] sm:$0xff] %v2953_v45  ;;  %v5558_v45 = vld [vmem:[#allocation21_spill] sm:$0xff] }
 0x29c   : > { %v2111_v39 = vadd.f32 %v5554_v61, %v1864_v7 }
 0x2a0   : > { %v2664_v9 = vpop.f32.mrf.mxu3  ;;  %v2908_v30 = vpop.f32.mrf.mxu2 }
 0x2a1   : > { %v2954_v3 = vadd.f32 %v2908_v30, %v2708_v60  ;;  %v1825_v35 = vpop.f32.mrf.mxu0  ;;  %v2419_v18 = vpop.f32.mrf.mxu1  ;;  %v2710_v13 = vadd.f32 %v2664_v9, %v2464_v52  ;;  %v5561_v30 = vld [vmem:[#allocation34_spill] sm:$0xff] }
 0x2a2   : > { %v2465_v62 = vadd.f32 %v2419_v18, %v2110_v53  ;;  %v1865_v44 = vadd.f32 %v1825_v35, %v5555_v5 }
 0x2a3   : > { %3046 = vst [vmem:[%s4918_s11 + $0xb0] sm:$0xff] %v2954_v3 }
 0x2a4   : > { %v2112_v48 = vadd.f32 %v5556_v47, %v1865_v44 }
 0x2a8   : > { %v2667_v27 = vpop.f32.mrf.mxu3  ;;  %v2911_v40 = vpop.f32.mrf.mxu2 }
 0x2a9   : > { %v2955_v51 = vadd.f32 %v2911_v40, %v2709_v16  ;;  %v1828_v42 = vpop.f32.mrf.mxu0  ;;  %v2422_v55 = vpop.f32.mrf.mxu1  ;;  %v2711_v21 = vadd.f32 %v2667_v27, %v2465_v62  ;;  %v5563_v27 = vld [vmem:[#allocation30_spill] sm:$0xff] }
 0x2aa   : > { %v2466_v28 = vadd.f32 %v2422_v55, %v2111_v39  ;;  %v1866_v46 = vadd.f32 %v1828_v42, %v5557_v1 }
 0x2ab   : > { %3047 = vst [vmem:[%s4918_s11 + $0xb8] sm:$0xff] %v2955_v51 }
 0x2ac   : > { %v2113_v59 = vadd.f32 %v5559_v49, %v1866_v46 }
 0x2b0   : > { %v2670_v2 = vpop.f32.mrf.mxu3  ;;  %v2914_v33 = vpop.f32.mrf.mxu2 }
 0x2b1   : > { %v2956_v50 = vadd.f32 %v2914_v33, %v2710_v13  ;;  %v1831_v22 = vpop.f32.mrf.mxu0  ;;  %v2425_v58 = vpop.f32.mrf.mxu1  ;;  %v2712_v15 = vadd.f32 %v2670_v2, %v2466_v28 }
 0x2b2   : > { %v2467_v32 = vadd.f32 %v2425_v58, %v2112_v48  ;;  %v1867_v3 = vadd.f32 %v1831_v22, %v5561_v30 }
 0x2b3   : > { %3048 = vst [vmem:[%s4918_s11 + $0xc0] sm:$0xff] %v2956_v50 }
 0x2b4   : > { %v2114_v40 = vadd.f32 %v5563_v27, %v1867_v3 }
 0x2b8   : > { %v2673_v24 = vpop.f32.mrf.mxu3  ;;  %v2917_v12 = vpop.f32.mrf.mxu2 }
 0x2b9   : > { %v2957_v14 = vadd.f32 %v2917_v12, %v2711_v21  ;;  %v2428_v25 = vpop.f32.mrf.mxu1  ;;  %v1834_v4 = vpop.f32.mrf.mxu0  ;;  %v2713_v10 = vadd.f32 %v2673_v24, %v2467_v32 }
 0x2ba   : > { %v1868_v38 = vadd.f32 %v1834_v4, %v5558_v45  ;;  %v2468_v0 = vadd.f32 %v2428_v25, %v2113_v59 }
 0x2bb   : > { %3049 = vst [vmem:[%s4918_s11 + $0xc8] sm:$0xff] %v2957_v14 }
 0x2bc   : > { %v1940_v60 = vadd.f32 %v5560_v63, %v1868_v38 }
 0x2c0   : > { %v2676_v57 = vpop.f32.mrf.mxu3  ;;  %v2920_v41 = vpop.f32.mrf.mxu2 }
 0x2c1   : > { %v2958_v6 = vadd.f32 %v2920_v41, %v2712_v15  ;;  %v2431_v26 = vpop.f32.mrf.mxu1  ;;  %v1837_v37 = vpop.f32.mrf.mxu0  ;;  %v2714_v35 = vadd.f32 %v2676_v57, %v2468_v0 }
 0x2c2   : > { %v1869_v43 = vadd.f32 %v1837_v37, %v5562_v17  ;;  %v2469_v55 = vadd.f32 %v2431_v26, %v2114_v40 }
 0x2c3   : > { %3050 = vst [vmem:[%s4918_s11 + $0xd0] sm:$0xff] %v2958_v6 }
 0x2c4   : > { %v1941_v52 = vadd.f32 %v5564_v54, %v1869_v43 }
 0x2c8   : > { %v2679_v11 = vpop.f32.mrf.mxu3  ;;  %v2923_v8 = vpop.f32.mrf.mxu2 }
 0x2c9   : > { %v2959_v19 = vadd.f32 %v2923_v8, %v2713_v10  ;;  %v2434_v20 = vpop.f32.mrf.mxu1  ;;  %v2781_v9 = vpop.f32.mrf.mxu0  ;;  %v2715_v23 = vadd.f32 %v2679_v11, %v2469_v55 }
 0x2ca   : > { %v2470_v18 = vadd.f32 %v2434_v20, %v1940_v60 }
 0x2cb   : > { %3051 = vst [vmem:[%s4918_s11 + $0xd8] sm:$0xff] %v2959_v19 }
 0x2d0   : > { %v2682_v36 = vpop.f32.mrf.mxu3  ;;  %v2926_v31 = vpop.f32.mrf.mxu2 }
 0x2d1   : > { %v2716_v56 = vadd.f32 %v2682_v36, %v2470_v18  ;;  %v2960_v16 = vadd.f32 %v2926_v31, %v2714_v35  ;;  %v2437_v42 = vpop.f32.mrf.mxu1  ;;  %v2784_v13 = vpop.f32.mrf.mxu0 }
 0x2d2   : > { %v2471_v29 = vadd.f32 %v2437_v42, %v1941_v52 }
 0x2d3   : > { %3052 = vst [vmem:[%s4918_s11 + $0xe0] sm:$0xff] %v2960_v16  ;;  %v2787_v51 = vadd.f32 %v2781_v9, %v2716_v56 }
 0x2d5   : > { %3054 = vst [vmem:[%s4918_s11 + $0xf0] sm:$0xff] %v2787_v51 }
 0x2d8   : > { %v2685_v2 = vpop.f32.mrf.mxu3  ;;  %v2929_v33 = vpop.f32.mrf.mxu2 }
 0x2d9   : > { %v2717_v50 = vadd.f32 %v2685_v2, %v2471_v29  ;;  %v2961_v22 = vadd.f32 %v2929_v33, %v2715_v23 }
 0x2db   : > { %3053 = vst [vmem:[%s4918_s11 + $0xe8] sm:$0xff] %v2961_v22  ;;  %v2788_v58 = vadd.f32 %v2784_v13, %v2717_v50 }
 0x2dd   : > { %3055 = vst [vmem:[%s4918_s11 + $0xf8] sm:$0xff] %v2788_v58 }
 0x2de   : > { %3631 = shalt.err (!%p3628_p5)
}
 0x2df   : > { %s3685_s9 = smov 128   ;;  %s3686_s11 = smov 8  }
 0x2e0   : > { %3532 = dma.vmem_to_hbm [thread:$0]  (%p3757_p4), %s3073_s1, 4096, %s3075_s17, %s3057_s22, %s3685_s9, %s3685_s9, %s3686_s11  }
 0x2e1 PF: > { %p3538_p6 = scmp.ge.s32.totalorder %s3682_s21, 2  ;;  %s3089_s12 = sand.u32 1, %s3662_s18  }
 0x2e2   : > { %s3090_s13 = scalar_lea.sflag [#allocation4], %s3089_s12 }
 0x2e3   : > { %p3535_p7 = pnand %p3538_p6, %p3764_p8 }
 0x2e5   : > { %p3536_p9 = pneg %p3535_p7 }
 0x2e7   : > { %3657 = dma.done.wait (%p3536_p9), %s3090_s13, 4096  }
 0x2e8   : > { %3659 = vsyncadd (%p3536_p9), %s3090_s13, 4294963200  ;;  %s18_s21 = sadd.s32 1, %s3682_s21   ;;  %s5565_s18 = smov %s3666_s19 }
 0x2e9   : > { %p15_p10 = scmp.ge.s32.totalorder %s18_s21, 4   ;;  %s5566_s19 = smov %s3670_s20 }
 0x2ea   : > { %s5567_s20 = smov %s3770_s29  ;;  %s5568_s1 = smov %s3678_s2 }
 0x2eb   : > { %s5569_s2 = smov %s5571_s24  ;;  %17 = sbr.rel (!%p15_p10) target bundleno = 4 (0x4), region = 91 }
 0x2f0   :  { %3096 = vsyncpa [#allocation4], 1 }
 0x2f1   :  { %3098 = vsyncpa [#allocation4 + $0x1], 1 }

// kernel: tpu_custom_call.1
= control target key start
LH: loop header
LB: loop body
LE: loop exit
PB: predicated region body
PF: predicated region fallthrough
CT: control target
= control target key end

     0   :  { %10 = vsyncpa [#allocation4], 0  ;;  %s5259_s0 = inlined_call_operand.vmem [shape: f32[2,16,24,4], index: 0, kind: input, shape index: {}]   ;;  %s5260_s1 = inlined_call_operand.vmem [shape: f32[2,16,24,4], index: 1, kind: input, shape index: {}]   ;;  %s5261_s2 = inlined_call_operand.vmem [shape: f32[2,16,24,4], index: 2, kind: input, shape index: {}]   ;;  %s5262_s3 = inlined_call_operand.vmem [shape: f32[3,3,4,128], index: 3, kind: input, shape index: {}]   ;;  %s5263_s4 = inlined_call_operand.vmem [shape: f32[1,128], index: 4, kind: input, shape index: {}]   ;;  %s5264_s5 = inlined_call_operand.hbm [shape: f32[2,16,16,128], index: 5, kind: output, shape index: {}]  }
   0x1   :  { %12 = vsyncpa [#allocation4 + $0x1], 0  ;;  %s3717_s18 = smov 0   ;;  %s3719_s19 = smov 0  }
   0x2   :  { %s3721_s20 = smov 0   ;;  %s3723_s1 = smov 0  }
   0x3   :  { %s3725_s2 = smov 0   ;;  %s3727_s21 = smov 0  }
   0x4 LB: > { %s3199_s22 = sadd.s32 4294967295, %s3682_s21   ;;  %s3200_s23 = sadd.s32 4294967294, %s3682_s21   ;;  %s3682_s21 = sphi %s3727_s21, %s18_s21   ;;  %s3678_s2 = sphi %s3725_s2, %s5569_s2   ;;  %s3674_s1 = sphi %s3723_s1, %s5568_s1   ;;  %s3670_s20 = sphi %s3721_s20, %s5567_s20   ;;  %s3666_s19 = sphi %s3719_s19, %s5566_s19   ;;  %s3662_s18 = sphi %s3717_s18, %s5565_s18  }
   0x5   : > { %s30_s24 = sadd.s32 1, %s3678_s2  ;;  %s181_s25 = sadd.s32 1, %s3670_s20 }
   0x6   : > { %p32_p0 = scmp.ge.s32.totalorder %s30_s24, 2  ;;  %p191_p1 = scmp.ne.s32.totalorder %s3670_s20, %s3666_s19 }
   0x7   : > { %p192_p2 = scmp.eq.s32.totalorder %s3199_s22, 1  ;;  %p197_p3 = scmp.ne.s32.totalorder %s3666_s19, %s3662_s18 }
   0x8   : > { %s5571_s24 = smov (%p32_p0, %s30_s24), 0  ;;  %p198_p5 = scmp.eq.s32.totalorder %s3200_s23, 1 }
   0x9   : > { %p3757_p4 = por %p192_p2, %p191_p1  ;;  %s176_s27 = ssub.s32 %s3678_s2, %s5571_s24 }
   0xa   : > { %p3203_p6 = scmp.ge.s32.totalorder %s3682_s21, 1  ;;  %p179_p7 = scmp.eq.s32.totalorder %s176_s27, 0 }
   0xb   : > { %p3764_p8 = por %p198_p5, %p197_p3  ;;  %p276_p9 = scmp.lt.s32.totalorder %s3682_s21, 3 }
   0xc   : > { %s3770_s29 = scalar_select %p179_p7, %s3670_s20, %s181_s25  }
   0xd   : > { %p277_p10 = pnand %p3203_p6, %p276_p9 }
   0xf   : > { %280 = sbr.rel (%p277_p10) target bundleno = 737 (0x2e1), region = 40 }
  0x14   : > { %v3208_v0 = vld [vmem:[%s5262_s3 + $0xc] sm:$0xf]  ;;  %vm616_vm0 = vcmask 1043456   ;;  %v867_v1 = vld [vmem:[%s5262_s3] sm:$0xf]  ;;  %p336_p11 = scmp.lt.s32.totalorder %s3674_s1, 1 }
  0x15   : > { %3209 = vmatpush.msk.msra.mxu0 %vm616_vm0, %v3208_v0  ;;  %3528 = vmatpush.msk.msra.mxu1 %vm616_vm0, %v3208_v0  ;;  %v3274_v2 = vld [vmem:[%s5262_s3 + $0x18] sm:$0xf]  ;;  %v3342_v3 = vld [vmem:[%s5262_s3 + $0x4] sm:$0xf]  ;;  %v799_v4 = vld [vmem:[%s5262_s3] sm:$0xf] }
  0x16   : > { %3529 = vmatpush.msk.msra.mxu3 %vm616_vm0, %v3208_v0  ;;  %3530 = vmatpush.msk.msra.mxu2 %vm616_vm0, %v867_v1  ;;  %s337_s13 = scalar_select %p336_p11, %s3674_s1, 1  ;;  %vm519_vm1 = vcmask 31744   ;;  %v3308_v14 = vld [vmem:[%s5262_s3 + $0x10] sm:$0xf]  ;;  %v3276_v15 = vld [vmem:[%s5262_s3 + $0x18] sm:$0xf] }
  0x17   : > { %3242 = vmatpush.msk.msrb.mxu1 %vm616_vm0, %v799_v4  ;;  %3243 = vmatpush.msk.msrb.mxu0 %vm616_vm0, %v867_v1  ;;  %v3448_v26 = vld [vmem:[%s5262_s3 + $0x8] sm:$0xf]  ;;  %v3378_v27 = vld [vmem:[%s5262_s3 + $0x1c] sm:$0xf]  ;;  %v5265_v28 = vmov 0.0   ;;  %vm1330_vm2 = vcmask 1046528  }
  0x18   : > { %3275 = vmatpush.msk.msrb.mxu3 %vm616_vm0, %v3274_v2  ;;  %3343 = vmatpush.msk.msrb.mxu2 %vm616_vm0, %v3342_v3  ;;  %s3531_s16 = smul.u32 384, %s337_s13  ;;  %v3382_v29 = vld [vmem:[%s5262_s3 + $0x1c] sm:$0xf]  ;;  %v3982_v42 = vrot.slane %v5265_v28, 1  ;;  %v3488_v45 = vld [vmem:[%s5262_s3 + $0x20] sm:$0xf] }
  0x19   : > { %vm2179_vm3 = vcmask 1045504   ;;  %s332_s9 = sand.u32 1, %s3666_s19   ;;  %s3624_s7 = scalar_lea.hbm %s5264_s5, 512 }
  0x1a   : > { %s3800_s23 = scalar_lea.vmem %s5259_s0, %s3531_s16  ;;  %s3204_s10 = sshll.u32 %s332_s9, 8 }
  0x1b   : > { %v3803_v5 = vld [vmem:[%s3800_s23] sm:$0xff]  ;;  %v3806_v6 = vld [vmem:[%s3800_s23 + $0xf0] sm:$0xff]  ;;  %v3809_v7 = vld [vmem:[%s3800_s23 + $0x138] sm:$0xff]  ;;  %s4918_s11 = scalar_lea.vmem [#allocation3], %s3204_s10  ;;  %s3057_s22 = scalar_lea.sflag [#allocation4], %s332_s9 }
  0x1c   : > { %3210 = vmatmul.msk.f32.vlgmr.msra.gmra.mxu0 %vm519_vm1, %v3803_v5  ;;  %3230 = vmatmul.msk.f32.vlgmr.msra.gmra.mxu1 %vm519_vm1, %v3806_v6  ;;  %v3820_v8 = vld [vmem:[%s3800_s23 + $0x8] sm:$0xff]  ;;  %v3823_v9 = vld [vmem:[%s3800_s23 + $0xf8] sm:$0xff]  ;;  %v3826_v10 = vld [vmem:[%s3800_s23 + $0x140] sm:$0xff]  ;;  %v1331_v31 = vrot.slane %v3803_v5, 1 }
  0x1d   : > { %3236 = vmatmul.msk.f32.vlgmr.msra.gmra.mxu3 %vm519_vm1, %v3809_v7  ;;  %3264 = vmatmul.msk.f32.vlgmr.msra.gmra.mxu2 %vm519_vm1, %v3806_v6  ;;  %v3837_v11 = vld [vmem:[%s3800_s23 + $0x18] sm:$0xff]  ;;  %v3840_v12 = vld [vmem:[%s3800_s23 + $0x108] sm:$0xff]  ;;  %v3843_v13 = vld [vmem:[%s3800_s23 + $0x150] sm:$0xff]  ;;  %v1332_v32 = vrot.slane %v3820_v8, 1 }
  0x1e   : > { %3309 = vmatpush.msk.msra.mxu3 %vm616_vm0, %v3308_v14  ;;  %3277 = vmatpush.msk.msra.mxu1 %vm616_vm0, %v3276_v15  ;;  %v3862_v16 = vld [vmem:[%s3800_s23 + $0x20] sm:$0xff]  ;;  %v3865_v17 = vld [vmem:[%s3800_s23 + $0x110] sm:$0xff]  ;;  %v3868_v18 = vld [vmem:[%s3800_s23 + $0x158] sm:$0xff]  ;;  %v1336_v39 = vrot.slane %v3837_v11, 1 }
  0x1f   : > { %v3879_v19 = vld [vmem:[%s3800_s23 + $0x30] sm:$0xff]  ;;  %v3882_v20 = vld [vmem:[%s3800_s23 + $0x120] sm:$0xff]  ;;  %v3885_v21 = vld [vmem:[%s3800_s23 + $0x168] sm:$0xff]  ;;  %3383 = vmatpush.msk.msra.mxu2 %vm616_vm0, %v3382_v29  ;;  %v3948_v34 = vsel %vm1330_vm2, %v1331_v31, %v1332_v32  ;;  %v1337_v40 = vrot.slane %v3862_v16, 1 }
  0x20   : > { %v3896_v22 = vld [vmem:[%s3800_s23 + $0x38] sm:$0xff]  ;;  %v3899_v23 = vld [vmem:[%s3800_s23 + $0x128] sm:$0xff]  ;;  %v3902_v24 = vld [vmem:[%s3800_s23 + $0x170] sm:$0xff]  ;;  %v1341_v49 = vrot.slane %v3879_v19, 1 }
  0x21   : > { %v3913_v25 = vld [vmem:[%s3800_s23 + $0x48] sm:$0xff]  ;;  %v3934_v30 = vld [vmem:[%s3800_s23 + $0x50] sm:$0xff]  ;;  %v3945_v33 = vld [vmem:[%s3800_s23 + $0x60] sm:$0xff]  ;;  %v3985_v43 = vsel %vm1330_vm2, %v1336_v39, %v1337_v40  ;;  %v1342_v50 = vrot.slane %v3896_v22, 1 }
  0x22   : > { %v3951_v35 = vld [vmem:[%s3800_s23 + $0x10] sm:$0xff]  ;;  %v3963_v37 = vld [vmem:[%s3800_s23 + $0x68] sm:$0xff]  ;;  %v3979_v41 = vld [vmem:[%s3800_s23 + $0x78] sm:$0xff]  ;;  %v1346_v57 = vrot.slane %v3913_v25, 1  ;;  %v1347_v58 = vrot.slane %v3934_v30, 1  ;;  %v1351_v1 = vrot.slane %v3945_v33, 1 }
  0x23   : > { %v1334_v36 = vrot.slane %v3951_v35, 1  ;;  %v3988_v44 = vld [vmem:[%s3800_s23 + $0x28] sm:$0xff]  ;;  %v4004_v47 = vld [vmem:[%s3800_s23 + $0x80] sm:$0xff]  ;;  %v4020_v51 = vld [vmem:[%s3800_s23 + $0x90] sm:$0xff]  ;;  %v4023_v52 = vsel %vm1330_vm2, %v1341_v49, %v1342_v50  ;;  %v1352_v2 = vrot.slane %v3963_v37, 1 }
  0x24   : > { %3211 = vmatmul.msk.f32.gmra.mxu0 %vm519_vm1, %v3820_v8  ;;  %3231 = vmatmul.msk.f32.gmra.mxu1 %vm519_vm1, %v3823_v9  ;;  %v1339_v46 = vrot.slane %v3988_v44, 1  ;;  %5302 = vst [vmem:[#allocation6_spill] sm:$0xff] %v4023_v52  ;;  %v4026_v53 = vld [vmem:[%s3800_s23 + $0x40] sm:$0xff]  ;;  %v4038_v55 = vld [vmem:[%s3800_s23 + $0x98] sm:$0xff]  ;;  %v4054_v59 = vld [vmem:[%s3800_s23 + $0xa8] sm:$0xff]  ;;  %v4057_v60 = vsel %vm1330_vm2, %v1346_v57, %v1347_v58  ;;  %v1357_v49 = vrot.slane %v4004_v47, 1 }
  0x25   : > { %3237 = vmatmul.msk.f32.gmra.mxu3 %vm519_vm1, %v3826_v10  ;;  %3265 = vmatmul.msk.f32.gmra.mxu2 %vm519_vm1, %v3823_v9  ;;  %v3966_v38 = vsel %vm1330_vm2, %v1332_v32, %v1334_v36  ;;  %5303 = vst [vmem:[#allocation7_spill] sm:$0xff] %v4026_v53  ;;  %v1344_v54 = vrot.slane %v4026_v53, 1  ;;  %v4060_v61 = vld [vmem:[%s3800_s23 + $0x58] sm:$0xff]  ;;  %v4072_v63 = vld [vmem:[%s3800_s23 + $0xb0] sm:$0xff]  ;;  %v4092_v14 = vld [vmem:[%s3800_s23 + $0xc0] sm:$0xff]  ;;  %v4095_v15 = vsel %vm1330_vm2, %v1351_v1, %v1352_v2 }
  0x26   : > { %v4007_v48 = vsel %vm1330_vm2, %v1337_v40, %v1339_v46  ;;  %5305 = vst [vmem:[#allocation9_spill] sm:$0xff] %v4057_v60  ;;  %v1349_v62 = vrot.slane %v4060_v61, 1  ;;  %v4116_v39 = vld [vmem:[%s3800_s23 + $0xc8] sm:$0xff]  ;;  %v1356_v46 = vrot.slane %v3979_v41, 1 }
  0x27   : > { %v4041_v56 = vsel %vm1330_vm2, %v1342_v50, %v1344_v54  ;;  %5306 = vst [vmem:[#allocation10_spill] sm:$0xff] %v4060_v61 }
  0x28   : > { %5304 = vst [vmem:[#allocation8_spill] sm:$0xff] %v4041_v56  ;;  %v4075_v0 = vsel %vm1330_vm2, %v1347_v58, %v1349_v62  ;;  %v4142_v62 = vld [vmem:[%s3800_s23 + $0xd8] sm:$0xff]  ;;  %v4145_v1 = vsel %vm1330_vm2, %v1356_v46, %v1357_v49 }
  0x29   : > { %5307 = vst [vmem:[#allocation11_spill] sm:$0xff] %v4075_v0 }
  0x2a   : > { %5309 = vst [vmem:[#allocation13_spill] sm:$0xff] %v4095_v15 }
  0x2b   : > { %5317 = vst [vmem:[#allocation21_spill] sm:$0xff] %v4145_v1 }
  0x2c   : > { %3212 = vmatmul.msk.f32.gmra.mxu0 %vm519_vm1, %v3837_v11  ;;  %3232 = vmatmul.msk.f32.gmra.mxu1 %vm519_vm1, %v3840_v12 }
  0x2d   : > { %3238 = vmatmul.msk.f32.gmra.mxu3 %vm519_vm1, %v3843_v13  ;;  %3266 = vmatmul.msk.f32.gmra.mxu2 %vm519_vm1, %v3840_v12 }
  0x34   : > { %3213 = vmatmul.msk.f32.gmra.mxu0 %vm519_vm1, %v3862_v16  ;;  %3233 = vmatmul.msk.f32.gmra.mxu1 %vm519_vm1, %v3865_v17 }
  0x35   : > { %3239 = vmatmul.msk.f32.gmra.mxu3 %vm519_vm1, %v3868_v18  ;;  %3267 = vmatmul.msk.f32.gmra.mxu2 %vm519_vm1, %v3865_v17 }
  0x3c   : > { %3214 = vmatmul.msk.f32.gmra.mxu0 %vm519_vm1, %v3879_v19  ;;  %3234 = vmatmul.msk.f32.gmra.mxu1 %vm519_vm1, %v3882_v20 }
  0x3d   : > { %3240 = vmatmul.msk.f32.gmra.mxu3 %vm519_vm1, %v3885_v21  ;;  %3268 = vmatmul.msk.f32.gmra.mxu2 %vm519_vm1, %v3882_v20 }
  0x44   : > { %3215 = vmatmul.msk.f32.gmra.mxu0 %vm519_vm1, %v3896_v22  ;;  %3235 = vmatmul.msk.f32.gmra.mxu1 %vm519_vm1, %v3899_v23 }
  0x45   : > { %3241 = vmatmul.msk.f32.gmra.mxu3 %vm519_vm1, %v3902_v24  ;;  %3269 = vmatmul.msk.f32.gmra.mxu2 %vm519_vm1, %v3899_v23 }
  0x4c   : > { %3216 = vmatmul.msk.f32.gmra.mxu0 %vm519_vm1, %v3913_v25  ;;  %825 = vmatmul.f32.vlgmr.msrb.gmra.mxu1 %v5265_v28 }
  0x4d   : > { %3270 = vmatmul.msk.f32.gmra.mxu2 %vm519_vm1, %v3809_v7  ;;  %1068 = vmatmul.f32.vlgmr.msrb.gmra.mxu3 %v5265_v28 }
  0x4e   : > { %3449 = vmatpush.msk.msrb.mxu3 %vm616_vm0, %v3448_v26  ;;  %3379 = vmatpush.msk.msrb.mxu1 %vm616_vm0, %v3378_v27  ;;  %v4098_v26 = vld [vmem:[%s3800_s23 + $0x70] sm:$0xff] }
  0x4f   : > { %5310 = vst [vmem:[#allocation14_spill] sm:$0xff] %v4098_v26  ;;  %v1354_v27 = vrot.slane %v4098_v26, 1 }
  0x51   : > { %v4119_v40 = vsel %vm1330_vm2, %v1352_v2, %v1354_v27  ;;  %v4148_v2 = vld [vmem:[%s3800_s23 + $0x88] sm:$0xff] }
  0x52   : > { %5313 = vst [vmem:[#allocation17_spill] sm:$0xff] %v4119_v40  ;;  %v1359_v27 = vrot.slane %v4148_v2, 1 }
  0x53   : > { %5318 = vst [vmem:[#allocation22_spill] sm:$0xff] %v4148_v2  ;;  %v1362_v2 = vrot.slane %v4038_v55, 1 }
  0x54   : > { %3217 = vmatmul.msk.f32.gmra.mxu0 %vm519_vm1, %v3934_v30  ;;  %828 = vmatmul.f32.gmra.mxu1 %v5265_v28 }
  0x55   : > { %3271 = vmatmul.msk.f32.gmra.mxu2 %vm519_vm1, %v3826_v10  ;;  %1071 = vmatmul.f32.gmra.mxu3 %v5265_v28 }
  0x5c   : > { %3218 = vmatmul.msk.f32.gmra.mxu0 %vm519_vm1, %v3945_v33  ;;  %3278 = vmatmul.msk.f32.vlgmr.msra.gmra.mxu1 %vm519_vm1, %v3837_v11 }
  0x5d   : > { %3272 = vmatmul.msk.f32.gmra.mxu2 %vm519_vm1, %v3843_v13  ;;  %3310 = vmatmul.msk.f32.vlgmr.msra.gmra.mxu3 %vm519_vm1, %v3948_v34 }
  0x64   : > { %3219 = vmatmul.msk.f32.gmra.mxu0 %vm519_vm1, %v3963_v37  ;;  %3279 = vmatmul.msk.f32.gmra.mxu1 %vm519_vm1, %v3862_v16 }
  0x65   : > { %3273 = vmatmul.msk.f32.gmra.mxu2 %vm519_vm1, %v3868_v18  ;;  %3311 = vmatmul.msk.f32.gmra.mxu3 %vm519_vm1, %v3966_v38 }
  0x6c   : > { %3220 = vmatmul.msk.f32.gmra.mxu0 %vm519_vm1, %v3979_v41  ;;  %3280 = vmatmul.msk.f32.gmra.mxu1 %vm519_vm1, %v3879_v19 }
  0x6d   : > { %3312 = vmatmul.msk.f32.gmra.mxu3 %vm519_vm1, %v3985_v43  ;;  %3344 = vmatmul.msk.f32.vlgmr.msrb.gmra.mxu2 %vm519_vm1, %v3982_v42 }
  0x6e   : > { %3489 = vmatpush.msk.msrb.mxu2 %vm616_vm0, %v3488_v45  ;;  %v3346_v45 = vld [vmem:[%s5262_s3 + $0x4] sm:$0xf] }
  0x6f   : > { %3347 = vmatpush.msk.msra.mxu0 %vm616_vm0, %v3346_v45 }
  0x74   : > { %3221 = vmatmul.msk.f32.gmra.mxu0 %vm519_vm1, %v4004_v47  ;;  %3281 = vmatmul.msk.f32.gmra.mxu1 %vm519_vm1, %v3896_v22 }
  0x75   : > { %3313 = vmatmul.msk.f32.gmra.mxu3 %vm519_vm1, %v4007_v48  ;;  %3345 = vmatmul.msk.f32.gmra.mxu2 %vm519_vm1, %v3982_v42 }
  0x7c   : > { %3222 = vmatmul.msk.f32.gmra.mxu0 %vm519_vm1, %v4020_v51  ;;  %3282 = vmatmul.msk.f32.gmra.mxu1 %vm519_vm1, %v3913_v25 }
  0x7d   : > { %3314 = vmatmul.msk.f32.gmra.mxu3 %vm519_vm1, %v4023_v52  ;;  %3384 = vmatmul.msk.f32.vlgmr.msra.gmra.mxu2 %vm519_vm1, %v3985_v43 }
  0x84   : > { %3223 = vmatmul.msk.f32.gmra.mxu0 %vm519_vm1, %v4038_v55  ;;  %3283 = vmatmul.msk.f32.gmra.mxu1 %vm519_vm1, %v3934_v30 }
  0x85   : > { %3315 = vmatmul.msk.f32.gmra.mxu3 %vm519_vm1, %v4041_v56  ;;  %3385 = vmatmul.msk.f32.gmra.mxu2 %vm519_vm1, %v4007_v48 }
  0x8c   : > { %3224 = vmatmul.msk.f32.gmra.mxu0 %vm519_vm1, %v4054_v59  ;;  %3284 = vmatmul.msk.f32.gmra.mxu1 %vm519_vm1, %v3945_v33 }
  0x8d   : > { %3316 = vmatmul.msk.f32.gmra.mxu3 %vm519_vm1, %v4057_v60  ;;  %3386 = vmatmul.msk.f32.gmra.mxu2 %vm519_vm1, %v4023_v52 }
  0x94   : > { %3225 = vmatmul.msk.f32.gmra.mxu0 %vm519_vm1, %v4072_v63  ;;  %3285 = vmatmul.msk.f32.gmra.mxu1 %vm519_vm1, %v3963_v37 }
  0x95   : > { %3317 = vmatmul.msk.f32.gmra.mxu3 %vm519_vm1, %v4075_v0  ;;  %3387 = vmatmul.msk.f32.gmra.mxu2 %vm519_vm1, %v4041_v56 }
  0x99   : > { %v4087_v3 = vpop.f32.mrf.mxu0  ;;  %v4089_v4 = vpop.f32.mrf.mxu1 }
  0x9a   : > { %5308 = vst [vmem:[#allocation12_spill] sm:$0xff] %v4089_v4  ;;  %v4166_v4 = vld [vmem:[%s3800_s23 + $0xe0] sm:$0xff] }
  0x9c   : > { %3226 = vmatmul.msk.f32.gmra.mxu0 %vm519_vm1, %v4092_v14  ;;  %3286 = vmatmul.msk.f32.gmra.mxu1 %vm519_vm1, %v3979_v41 }
  0x9d   : > { %3318 = vmatmul.msk.f32.gmra.mxu3 %vm519_vm1, %v4095_v15  ;;  %3388 = vmatmul.msk.f32.gmra.mxu2 %vm519_vm1, %v4057_v60 }
  0xa0   : > { %v715_v29 = vpop.f32.mrf.mxu3  ;;  %v4109_v31 = vpop.f32.mrf.mxu2 }
  0xa1   : > { %5311 = vst [vmem:[#allocation15_spill] sm:$0xff] %v4109_v31  ;;  %v4111_v32 = vpop.f32.mrf.mxu0  ;;  %v4113_v36 = vpop.f32.mrf.mxu1 }
  0xa2   : > { %5312 = vst [vmem:[#allocation16_spill] sm:$0xff] %v4113_v36 }
  0xa4   : > { %3227 = vmatmul.msk.f32.gmra.mxu0 %vm519_vm1, %v4116_v39  ;;  %3287 = vmatmul.msk.f32.gmra.mxu1 %vm519_vm1, %v4004_v47 }
  0xa5   : > { %3319 = vmatmul.msk.f32.gmra.mxu3 %vm519_vm1, %v4119_v40  ;;  %3389 = vmatmul.msk.f32.gmra.mxu2 %vm519_vm1, %v4075_v0 }
  0xa8   : > { %v718_v50 = vpop.f32.mrf.mxu3  ;;  %v4135_v54 = vpop.f32.mrf.mxu2 }
  0xa9   : > { %5314 = vst [vmem:[#allocation18_spill] sm:$0xff] %v4135_v54  ;;  %v4137_v57 = vpop.f32.mrf.mxu0  ;;  %v4139_v58 = vpop.f32.mrf.mxu1  ;;  %v4191_v54 = vld [vmem:[%s3800_s23 + $0xa0] sm:$0xff] }
  0xaa   : > { %5315 = vst [vmem:[#allocation19_spill] sm:$0xff] %v4137_v57  ;;  %v4169_v57 = vsel %vm1330_vm2, %v1357_v49, %v1359_v27 }
  0xab   : > { %5316 = vst [vmem:[#allocation20_spill] sm:$0xff] %v4139_v58  ;;  %v4274_v58 = vld [vmem:[%s3800_s23 + $0xd0] sm:$0xff] }
  0xac   : > { %3228 = vmatmul.msk.f32.gmra.mxu0 %vm519_vm1, %v4142_v62  ;;  %3288 = vmatmul.msk.f32.gmra.mxu1 %vm519_vm1, %v4020_v51  ;;  %5322 = vst [vmem:[#allocation26_spill] sm:$0xff] %v4169_v57 }
  0xad   : > { %3320 = vmatmul.msk.f32.gmra.mxu3 %vm519_vm1, %v4145_v1  ;;  %3390 = vmatmul.msk.f32.gmra.mxu2 %vm519_vm1, %v4095_v15  ;;  %5327 = vst [vmem:[#allocation31_spill] sm:$0xff] %v4191_v54 }
  0xae   : > { %5341 = vst [vmem:[#allocation45_spill] sm:$0xff] %v4274_v58 }
  0xb0   : > { %v721_v45 = vpop.f32.mrf.mxu3  ;;  %v4159_v28 = vpop.f32.mrf.mxu2 }
  0xb1   : > { %5319 = vst [vmem:[#allocation23_spill] sm:$0xff] %v4159_v28  ;;  %v4161_v46 = vpop.f32.mrf.mxu0  ;;  %v4163_v36 = vpop.f32.mrf.mxu1 }
  0xb2   : > { %5320 = vst [vmem:[#allocation24_spill] sm:$0xff] %v4161_v46  ;;  %v1361_v46 = vrot.slane %v4020_v51, 1 }
  0xb3   : > { %5321 = vst [vmem:[#allocation25_spill] sm:$0xff] %v4163_v36 }
  0xb4   : > { %3229 = vmatmul.msk.f32.gmra.mxu0 %vm519_vm1, %v4166_v4  ;;  %3289 = vmatmul.msk.f32.gmra.mxu1 %vm519_vm1, %v4038_v55  ;;  %v4188_v15 = vsel %vm1330_vm2, %v1361_v46, %v1362_v2  ;;  %v1364_v46 = vrot.slane %v4191_v54, 1 }
  0xb5   : > { %3321 = vmatmul.msk.f32.gmra.mxu3 %vm519_vm1, %v4169_v57  ;;  %3391 = vmatmul.msk.f32.gmra.mxu2 %vm519_vm1, %v4119_v40  ;;  %5326 = vst [vmem:[#allocation30_spill] sm:$0xff] %v4188_v15  ;;  %v4200_v40 = vld [vmem:[%s5263_s4] ss:$0 sm:$0xff] }
  0xb6   : > { %v4215_v31 = vsel %vm1330_vm2, %v1362_v2, %v1364_v46 }
  0xb7   : > { %5331 = vst [vmem:[#allocation35_spill] sm:$0xff] %v4215_v31 }
  0xb8   : > { %v724_v26 = vpop.f32.mrf.mxu3  ;;  %v4181_v28 = vpop.f32.mrf.mxu2 }
  0xb9   : > { %5323 = vst [vmem:[#allocation27_spill] sm:$0xff] %v4181_v28  ;;  %v4183_v49 = vpop.f32.mrf.mxu0  ;;  %v4185_v27 = vpop.f32.mrf.mxu1 }
  0xba   : > { %5324 = vst [vmem:[#allocation28_spill] sm:$0xff] %v4183_v49  ;;  %v759_v49 = vadd.f32 %v4200_v40, %v715_v29  ;;  %v1366_v29 = vrot.slane %v4054_v59, 1 }
  0xbb   : > { %5325 = vst [vmem:[#allocation29_spill] sm:$0xff] %v4185_v27 }
  0xbc   : > { %3244 = vmatmul.msk.f32.vlgmr.msrb.gmra.mxu0 %vm519_vm1, %v3803_v5  ;;  %3290 = vmatmul.msk.f32.gmra.mxu1 %vm519_vm1, %v4054_v59 }
  0xbd   : > { %3322 = vmatmul.msk.f32.gmra.mxu3 %vm519_vm1, %v4188_v15  ;;  %3392 = vmatmul.msk.f32.gmra.mxu2 %vm519_vm1, %v4145_v1 }
  0xc0   : > { %v727_v28 = vpop.f32.mrf.mxu3  ;;  %v960_v27 = vpop.f32.mrf.mxu2 }
  0xc1   : > { %v4208_v0 = vadd.f32 %v960_v27, %v759_v49  ;;  %v4210_v36 = vpop.f32.mrf.mxu0  ;;  %v4212_v61 = vpop.f32.mrf.mxu1  ;;  %v1367_v49 = vrot.slane %v4072_v63, 1  ;;  %v760_v27 = vadd.f32 %v4200_v40, %v718_v50 }
  0xc2   : > { %5329 = vst [vmem:[#allocation33_spill] sm:$0xff] %v4210_v36 }
  0xc3   : > { %5328 = vst [vmem:[#allocation32_spill] sm:$0xff] %v4208_v0  ;;  %v4233_v1 = vsel %vm1330_vm2, %v1366_v29, %v1367_v49 }
  0xc4   : > { %5330 = vst [vmem:[#allocation34_spill] sm:$0xff] %v4212_v61  ;;  %3245 = vmatmul.msk.f32.gmra.mxu0 %vm519_vm1, %v3820_v8  ;;  %3291 = vmatmul.msk.f32.gmra.mxu1 %vm519_vm1, %v4072_v63  ;;  %v4236_v61 = vld [vmem:[%s3800_s23 + $0xb8] sm:$0xff] }
  0xc5   : > { %3323 = vmatmul.msk.f32.gmra.mxu3 %vm519_vm1, %v4215_v31  ;;  %3393 = vmatmul.msk.f32.gmra.mxu2 %vm519_vm1, %v4169_v57  ;;  %5334 = vst [vmem:[#allocation38_spill] sm:$0xff] %v4233_v1  ;;  %v1369_v50 = vrot.slane %v4236_v61, 1 }
  0xc6   : > { %5335 = vst [vmem:[#allocation39_spill] sm:$0xff] %v4236_v61 }
  0xc7   : > { %v4253_v60 = vsel %vm1330_vm2, %v1367_v49, %v1369_v50 }
  0xc8   : > { %v730_v2 = vpop.f32.mrf.mxu3  ;;  %v963_v46 = vpop.f32.mrf.mxu2  ;;  %5338 = vst [vmem:[#allocation42_spill] sm:$0xff] %v4253_v60 }
  0xc9   : > { %v4228_v36 = vadd.f32 %v963_v46, %v760_v27  ;;  %v4230_v54 = vpop.f32.mrf.mxu0  ;;  %v826_v0 = vpop.f32.mrf.mxu1  ;;  %v761_v27 = vadd.f32 %v4200_v40, %v721_v45  ;;  %v1371_v45 = vrot.slane %v4092_v14, 1 }
  0xca   : > { %5333 = vst [vmem:[#allocation37_spill] sm:$0xff] %v4230_v54 }
  0xcb   : > { %5332 = vst [vmem:[#allocation36_spill] sm:$0xff] %v4228_v36 }
  0xcc   : > { %3246 = vmatmul.msk.f32.gmra.mxu0 %vm519_vm1, %v3837_v11  ;;  %3292 = vmatmul.msk.f32.gmra.mxu1 %vm519_vm1, %v4092_v14 }
  0xcd   : > { %3324 = vmatmul.msk.f32.gmra.mxu3 %vm519_vm1, %v4233_v1  ;;  %3394 = vmatmul.msk.f32.gmra.mxu2 %vm519_vm1, %v4188_v15 }
  0xd0   : > { %v966_v29 = vpop.f32.mrf.mxu2  ;;  %v1069_v46 = vpop.f32.mrf.mxu3 }
  0xd1   : > { %v4248_v54 = vadd.f32 %v966_v29, %v761_v27  ;;  %v4250_v36 = vpop.f32.mrf.mxu0  ;;  %v829_v57 = vpop.f32.mrf.mxu1  ;;  %v1372_v27 = vrot.slane %v4116_v39, 1  ;;  %v762_v29 = vadd.f32 %v4200_v40, %v724_v26  ;;  %v1374_v26 = vrot.slane %v4274_v58, 1 }
  0xd2   : > { %5337 = vst [vmem:[#allocation41_spill] sm:$0xff] %v4250_v36 }
  0xd3   : > { %5336 = vst [vmem:[#allocation40_spill] sm:$0xff] %v4248_v54  ;;  %v4271_v15 = vsel %vm1330_vm2, %v1371_v45, %v1372_v27  ;;  %v4289_v56 = vsel %vm1330_vm2, %v1372_v27, %v1374_v26  ;;  %v1377_v27 = vrot.slane %v4166_v4, 1 }
  0xd4   : > { %3247 = vmatmul.msk.f32.gmra.mxu0 %vm519_vm1, %v3862_v16  ;;  %3293 = vmatmul.msk.f32.gmra.mxu1 %vm519_vm1, %v4116_v39 }
  0xd5   : > { %3325 = vmatmul.msk.f32.gmra.mxu3 %vm519_vm1, %v4253_v60  ;;  %3395 = vmatmul.msk.f32.gmra.mxu2 %vm519_vm1, %v4215_v31 }
  0xd8   : > { %v969_v49 = vpop.f32.mrf.mxu2  ;;  %v1072_v50 = vpop.f32.mrf.mxu3 }
  0xd9   : > { %v4266_v36 = vadd.f32 %v969_v49, %v762_v29  ;;  %v4268_v61 = vpop.f32.mrf.mxu0  ;;  %v1130_v54 = vpop.f32.mrf.mxu1  ;;  %v763_v29 = vadd.f32 %v4200_v40, %v727_v28  ;;  %v1376_v28 = vrot.slane %v4142_v62, 1 }
  0xda   : > { %5340 = vst [vmem:[#allocation44_spill] sm:$0xff] %v4268_v61 }
  0xdb   : > { %5339 = vst [vmem:[#allocation43_spill] sm:$0xff] %v4266_v36 }
  0xdc   : > { %3248 = vmatmul.msk.f32.gmra.mxu0 %vm519_vm1, %v3879_v19  ;;  %3294 = vmatmul.msk.f32.gmra.mxu1 %vm519_vm1, %v4142_v62 }
  0xdd   : > { %3326 = vmatmul.msk.f32.gmra.mxu3 %vm519_vm1, %v4271_v15  ;;  %3396 = vmatmul.msk.f32.gmra.mxu2 %vm519_vm1, %v4233_v1  ;;  %v4314_v1 = vld [vmem:[%s3800_s23 + $0xe8] sm:$0xff] }
  0xe0   : > { %v972_v45 = vpop.f32.mrf.mxu2  ;;  %v1495_v49 = vpop.f32.mrf.mxu3 }
  0xe1   : > { %v1006_v61 = vadd.f32 %v972_v45, %v763_v29  ;;  %v4286_v36 = vpop.f32.mrf.mxu0  ;;  %v1133_v31 = vpop.f32.mrf.mxu1  ;;  %v733_v29 = vadd.f32 %v4200_v40, %v4087_v3 }
  0xe2   : > { %5342 = vst [vmem:[#allocation46_spill] sm:$0xff] %v4286_v36 }
  0xe3   : > { %v4291_v53 = vadd.f32 %v1069_v46, %v1006_v61  ;;  %v764_v61 = vadd.f32 %v4200_v40, %v730_v2  ;;  %v1379_v2 = vrot.slane %v4314_v1, 1 }
  0xe4   : > { %3249 = vmatmul.msk.f32.gmra.mxu0 %vm519_vm1, %v3896_v22  ;;  %3295 = vmatmul.msk.f32.gmra.mxu1 %vm519_vm1, %v4166_v4 }
  0xe5   : > { %5343 = vst [vmem:[#allocation47_spill] sm:$0xff] %v4291_v53  ;;  %3327 = vmatmul.msk.f32.gmra.mxu3 %vm519_vm1, %v4289_v56  ;;  %3397 = vmatmul.msk.f32.gmra.mxu2 %vm519_vm1, %v4253_v60  ;;  %v4311_v53 = vsel %vm1330_vm2, %v1376_v28, %v1377_v27  ;;  %v832_v60 = vadd.f32 %v826_v0, %v733_v29 }
  0xe7   : > { %v1220_v3 = vadd.f32 %v1130_v54, %v832_v60  ;;  %v4336_v60 = vsel %vm1330_vm2, %v1377_v27, %v1379_v2  ;;  %v1382_v27 = vrot.slane %v3823_v9, 1 }
  0xe8   : > { %v975_v46 = vpop.f32.mrf.mxu2  ;;  %v1498_v26 = vpop.f32.mrf.mxu3 }
  0xe9   : > { %v1007_v45 = vadd.f32 %v975_v46, %v764_v61  ;;  %v4306_v36 = vpop.f32.mrf.mxu0  ;;  %v4308_v58 = vpop.f32.mrf.mxu1  ;;  %v1591_v0 = vadd.f32 %v1495_v49, %v1220_v3  ;;  %v734_v61 = vadd.f32 %v4200_v40, %v4111_v32  ;;  %v1381_v32 = vrot.slane %v3806_v6, 1 }
  0xea   : > { %5344 = vst [vmem:[#allocation48_spill] sm:$0xff] %v4306_v36 }
  0xeb   : > { %v4316_v52 = vadd.f32 %v1072_v50, %v1007_v45  ;;  %v833_v54 = vadd.f32 %v829_v57, %v734_v61 }
  0xec   : > { %3250 = vmatmul.msk.f32.gmra.mxu0 %vm519_vm1, %v3913_v25  ;;  %3296 = vmatmul.msk.f32.gmra.mxu1 %vm519_vm1, %v3806_v6 }
  0xed   : > { %3328 = vmatmul.msk.f32.gmra.mxu3 %vm519_vm1, %v4311_v53  ;;  %3398 = vmatmul.msk.f32.gmra.mxu2 %vm519_vm1, %v4271_v15  ;;  %v1221_v49 = vadd.f32 %v1133_v31, %v833_v54  ;;  %v4355_v31 = vsel %vm1330_vm2, %v1381_v32, %v1382_v27  ;;  %v4358_v54 = vld [vmem:[%s3800_s23 + $0x100] sm:$0xff] }
  0xee   : > { %v1384_v6 = vrot.slane %v4358_v54, 1 }
  0xef   : > { %v1592_v3 = vadd.f32 %v1498_v26, %v1221_v49 }
  0xf0   : > { %v4327_v28 = vpop.f32.mrf.mxu3  ;;  %v1689_v50 = vpop.f32.mrf.mxu2 }
  0xf1   : > { %v1695_v46 = vadd.f32 %v1689_v50, %v1591_v0  ;;  %v4331_v29 = vpop.f32.mrf.mxu0  ;;  %v4333_v45 = vpop.f32.mrf.mxu1 }
  0xf2   : > { %5345 = vst [vmem:[#allocation49_spill] sm:$0xff] %v4331_v29 }
  0xf4   : > { %3251 = vmatmul.msk.f32.gmra.mxu0 %vm519_vm1, %v3934_v30  ;;  %3297 = vmatmul.msk.f32.gmra.mxu1 %vm519_vm1, %v3823_v9 }
  0xf5   : > { %3329 = vmatmul.msk.f32.gmra.mxu3 %vm519_vm1, %v4336_v60  ;;  %3399 = vmatmul.msk.f32.gmra.mxu2 %vm519_vm1, %v4289_v56 }
  0xf8   : > { %v4348_v2 = vpop.f32.mrf.mxu3  ;;  %v1692_v57 = vpop.f32.mrf.mxu2 }
  0xf9   : > { %v1696_v0 = vadd.f32 %v1692_v57, %v1592_v3  ;;  %v4350_v50 = vpop.f32.mrf.mxu0  ;;  %v4352_v61 = vpop.f32.mrf.mxu1  ;;  %v4378_v57 = vsel %vm1330_vm2, %v1382_v27, %v1384_v6 }
  0xfa   : > { %5346 = vst [vmem:[#allocation50_spill] sm:$0xff] %v4350_v50 }
  0xfc   : > { %3252 = vmatmul.msk.f32.gmra.mxu0 %vm519_vm1, %v3945_v33  ;;  %3298 = vmatmul.msk.f32.gmra.mxu1 %vm519_vm1, %v3840_v12 }
  0xfd   : > { %3330 = vmatmul.msk.f32.gmra.mxu3 %vm519_vm1, %v4355_v31  ;;  %3400 = vmatmul.msk.f32.gmra.mxu2 %vm519_vm1, %v4311_v53 }
 0x100   : > { %v4369_v9 = vpop.f32.mrf.mxu3  ;;  %v1995_v26 = vpop.f32.mrf.mxu2 }
 0x101   : > { %v4371_v49 = vadd.f32 %v1995_v26, %v1695_v46  ;;  %v4373_v32 = vpop.f32.mrf.mxu0  ;;  %v4375_v3 = vpop.f32.mrf.mxu1  ;;  %v1386_v46 = vrot.slane %v3840_v12, 1  ;;  %v1387_v26 = vrot.slane %v3865_v17, 1 }
 0x102   : > { %5347 = vst [vmem:[#allocation51_spill] sm:$0xff] %v4373_v32 }
 0x103   : > { %5348 = vst [vmem:[#allocation52_spill] sm:$0xff] %v4375_v3  ;;  %v4399_v36 = vsel %vm1330_vm2, %v1386_v46, %v1387_v26  ;;  %v4402_v3 = vld [vmem:[%s3800_s23 + $0x118] sm:$0xff] }
 0x104   : > { %3253 = vmatmul.msk.f32.gmra.mxu0 %vm519_vm1, %v3963_v37  ;;  %3299 = vmatmul.msk.f32.gmra.mxu1 %vm519_vm1, %v3865_v17  ;;  %5352 = vst [vmem:[#allocation56_spill] sm:$0xff] %v4399_v36  ;;  %v1389_v12 = vrot.slane %v4402_v3, 1 }
 0x105   : > { %3331 = vmatmul.msk.f32.gmra.mxu3 %vm519_vm1, %v4378_v57  ;;  %3401 = vmatmul.msk.f32.gmra.mxu2 %vm519_vm1, %v4336_v60  ;;  %5353 = vst [vmem:[#allocation57_spill] sm:$0xff] %v4402_v3 }
 0x108   : > { %v4390_v32 = vpop.f32.mrf.mxu3  ;;  %v1998_v27 = vpop.f32.mrf.mxu2 }
 0x109   : > { %5349 = vst [vmem:[#allocation53_spill] sm:$0xff] %v4390_v32  ;;  %v4392_v6 = vadd.f32 %v1998_v27, %v1696_v0  ;;  %v4394_v50 = vpop.f32.mrf.mxu0  ;;  %v4396_v29 = vpop.f32.mrf.mxu1  ;;  %v4446_v32 = vld [vmem:[%s3800_s23 + $0x130] sm:$0xff] }
 0x10a   : > { %5350 = vst [vmem:[#allocation54_spill] sm:$0xff] %v4394_v50  ;;  %v4422_v50 = vsel %vm1330_vm2, %v1387_v26, %v1389_v12 }
 0x10b   : > { %5351 = vst [vmem:[#allocation55_spill] sm:$0xff] %v4396_v29 }
 0x10c   : > { %3254 = vmatmul.msk.f32.gmra.mxu0 %vm519_vm1, %v3979_v41  ;;  %3300 = vmatmul.msk.f32.gmra.mxu1 %vm519_vm1, %v3882_v20  ;;  %5357 = vst [vmem:[#allocation61_spill] sm:$0xff] %v4422_v50 }
 0x10d   : > { %3332 = vmatmul.msk.f32.gmra.mxu3 %vm519_vm1, %v4399_v36  ;;  %3402 = vmatmul.msk.f32.gmra.mxu2 %vm519_vm1, %v4355_v31  ;;  %5362 = vst [vmem:[#allocation66_spill] sm:$0xff] %v4446_v32 }
 0x110   : > { %v4413_v17 = vpop.f32.mrf.mxu3  ;;  %v4415_v0 = vpop.f32.mrf.mxu2 }
 0x111   : > { %5354 = vst [vmem:[#allocation58_spill] sm:$0xff] %v4413_v17  ;;  %v4417_v46 = vpop.f32.mrf.mxu0  ;;  %v4419_v27 = vpop.f32.mrf.mxu1  ;;  %v1391_v17 = vrot.slane %v3882_v20, 1  ;;  %v1394_v20 = vrot.slane %v4446_v32, 1 }
 0x112   : > { %5355 = vst [vmem:[#allocation59_spill] sm:$0xff] %v4417_v46  ;;  %v1392_v46 = vrot.slane %v3899_v23, 1 }
 0x113   : > { %5356 = vst [vmem:[#allocation60_spill] sm:$0xff] %v4419_v27 }
 0x114   : > { %3255 = vmatmul.msk.f32.gmra.mxu0 %vm519_vm1, %v4004_v47  ;;  %3301 = vmatmul.msk.f32.gmra.mxu1 %vm519_vm1, %v3899_v23  ;;  %v4443_v3 = vsel %vm1330_vm2, %v1391_v17, %v1392_v46 }
 0x115   : > { %3333 = vmatmul.msk.f32.gmra.mxu3 %vm519_vm1, %v4422_v50  ;;  %3403 = vmatmul.msk.f32.gmra.mxu2 %vm519_vm1, %v4378_v57  ;;  %5361 = vst [vmem:[#allocation65_spill] sm:$0xff] %v4443_v3 }
 0x118   : > { %v4434_v27 = vpop.f32.mrf.mxu3  ;;  %v4436_v26 = vpop.f32.mrf.mxu2 }
 0x119   : > { %5358 = vst [vmem:[#allocation62_spill] sm:$0xff] %v4434_v27  ;;  %v4438_v12 = vpop.f32.mrf.mxu0  ;;  %v4440_v29 = vpop.f32.mrf.mxu1  ;;  %v4466_v27 = vsel %vm1330_vm2, %v1392_v46, %v1394_v20 }
 0x11a   : > { %5359 = vst [vmem:[#allocation63_spill] sm:$0xff] %v4438_v12 }
 0x11b   : > { %5360 = vst [vmem:[#allocation64_spill] sm:$0xff] %v4440_v29 }
 0x11c   : > { %3256 = vmatmul.msk.f32.gmra.mxu0 %vm519_vm1, %v4020_v51  ;;  %3302 = vmatmul.msk.f32.gmra.mxu1 %vm519_vm1, %v3809_v7  ;;  %5367 = vst [vmem:[#allocation71_spill] sm:$0xff] %v4466_v27 }
 0x11d   : > { %3334 = vmatmul.msk.f32.gmra.mxu3 %vm519_vm1, %v4443_v3  ;;  %3404 = vmatmul.msk.f32.gmra.mxu2 %vm519_vm1, %v4399_v36 }
 0x120   : > { %v4457_v23 = vpop.f32.mrf.mxu3  ;;  %v4459_v17 = vpop.f32.mrf.mxu2 }
 0x121   : > { %5363 = vst [vmem:[#allocation67_spill] sm:$0xff] %v4457_v23  ;;  %v4461_v12 = vpop.f32.mrf.mxu0  ;;  %v4463_v29 = vpop.f32.mrf.mxu1  ;;  %v1396_v23 = vrot.slane %v3809_v7, 1 }
 0x122   : > { %5364 = vst [vmem:[#allocation68_spill] sm:$0xff] %v4459_v17  ;;  %v4490_v17 = vld [vmem:[%s3800_s23 + $0x148] sm:$0xff] }
 0x123   : > { %5365 = vst [vmem:[#allocation69_spill] sm:$0xff] %v4461_v12  ;;  %v1397_v12 = vrot.slane %v3826_v10, 1  ;;  %v1399_v7 = vrot.slane %v4490_v17, 1 }
 0x124   : > { %5366 = vst [vmem:[#allocation70_spill] sm:$0xff] %v4463_v29  ;;  %3257 = vmatmul.msk.f32.gmra.mxu0 %vm519_vm1, %v4038_v55  ;;  %3303 = vmatmul.msk.f32.gmra.mxu1 %vm519_vm1, %v3826_v10 }
 0x125   : > { %3335 = vmatmul.msk.f32.gmra.mxu3 %vm519_vm1, %v4466_v27  ;;  %3405 = vmatmul.msk.f32.gmra.mxu2 %vm519_vm1, %v4422_v50  ;;  %v4487_v36 = vsel %vm1330_vm2, %v1396_v23, %v1397_v12  ;;  %5372 = vst [vmem:[#allocation76_spill] sm:$0xff] %v4490_v17  ;;  %v4514_v50 = vsel %vm1330_vm2, %v1397_v12, %v1399_v7 }
 0x126   : > { %5371 = vst [vmem:[#allocation75_spill] sm:$0xff] %v4487_v36 }
 0x127   : > { %5376 = vst [vmem:[#allocation80_spill] sm:$0xff] %v4514_v50 }
 0x128   : > { %v4478_v29 = vpop.f32.mrf.mxu3  ;;  %v4480_v46 = vpop.f32.mrf.mxu2 }
 0x129   : > { %5368 = vst [vmem:[#allocation72_spill] sm:$0xff] %v4478_v29  ;;  %v4482_v20 = vpop.f32.mrf.mxu0  ;;  %v4484_v32 = vpop.f32.mrf.mxu1 }
 0x12a   : > { %5369 = vst [vmem:[#allocation73_spill] sm:$0xff] %v4482_v20  ;;  %v3414_v20 = vld [vmem:[%s5262_s3 + $0x14] sm:$0xf] }
 0x12b   : > { %5370 = vst [vmem:[#allocation74_spill] sm:$0xff] %v4484_v32  ;;  %3415 = vmatpush.msk.msra.mxu1 %vm616_vm0, %v3414_v20 }
 0x12c   : > { %3258 = vmatmul.msk.f32.gmra.mxu0 %vm519_vm1, %v4054_v59  ;;  %3304 = vmatmul.msk.f32.gmra.mxu1 %vm519_vm1, %v3843_v13 }
 0x12d   : > { %3336 = vmatmul.msk.f32.gmra.mxu3 %vm519_vm1, %v4487_v36  ;;  %3406 = vmatmul.msk.f32.gmra.mxu2 %vm519_vm1, %v4443_v3  ;;  %v4538_v3 = vld [vmem:[%s3800_s23 + $0x160] sm:$0xff] }
 0x12e   : > { %5381 = vst [vmem:[#allocation85_spill] sm:$0xff] %v4538_v3 }
 0x130   : > { %v4501_v10 = vpop.f32.mrf.mxu3  ;;  %v4503_v23 = vpop.f32.mrf.mxu2 }
 0x131   : > { %5373 = vst [vmem:[#allocation77_spill] sm:$0xff] %v4501_v10  ;;  %v4508_v32 = vpop.f32.mrf.mxu0  ;;  %v4510_v29 = vpop.f32.mrf.mxu1 }
 0x132   : > { %5374 = vst [vmem:[#allocation78_spill] sm:$0xff] %v4508_v32  ;;  %v1401_v32 = vrot.slane %v3843_v13, 1  ;;  %v3452_v13 = vld [vmem:[%s5262_s3 + $0x8] sm:$0xf] }
 0x133   : > { %5375 = vst [vmem:[#allocation79_spill] sm:$0xff] %v4510_v29  ;;  %v1402_v29 = vrot.slane %v3868_v18, 1  ;;  %3453 = vmatpush.msk.msra.mxu3 %vm616_vm0, %v3452_v13  ;;  %v3484_v13 = vld [vmem:[%s5262_s3 + $0x20] sm:$0xf] }
 0x134   : > { %3259 = vmatmul.msk.f32.gmra.mxu0 %vm519_vm1, %v4072_v63  ;;  %3305 = vmatmul.msk.f32.gmra.mxu1 %vm519_vm1, %v3868_v18  ;;  %v1404_v18 = vrot.slane %v4538_v3, 1 }
 0x135   : > { %3337 = vmatmul.msk.f32.gmra.mxu3 %vm519_vm1, %v4514_v50  ;;  %3407 = vmatmul.msk.f32.gmra.mxu2 %vm519_vm1, %v4466_v27  ;;  %v4535_v17 = vsel %vm1330_vm2, %v1401_v32, %v1402_v29 }
 0x136   : > { %5380 = vst [vmem:[#allocation84_spill] sm:$0xff] %v4535_v17  ;;  %3485 = vmatpush.msk.msrb.mxu0 %vm616_vm0, %v3484_v13 }
 0x138   : > { %v4526_v20 = vpop.f32.mrf.mxu3  ;;  %v4528_v12 = vpop.f32.mrf.mxu2 }
 0x139   : > { %5377 = vst [vmem:[#allocation81_spill] sm:$0xff] %v4526_v20  ;;  %v4530_v7 = vpop.f32.mrf.mxu0  ;;  %v4532_v10 = vpop.f32.mrf.mxu1 }
 0x13a   : > { %5378 = vst [vmem:[#allocation82_spill] sm:$0xff] %v4528_v12  ;;  %v4562_v12 = vsel %vm1330_vm2, %v1402_v29, %v1404_v18  ;;  %v1407_v29 = vrot.slane %v3902_v24, 1 }
 0x13b   : > { %5379 = vst [vmem:[#allocation83_spill] sm:$0xff] %v4532_v10 }
 0x13c   : > { %3260 = vmatmul.msk.f32.gmra.mxu0 %vm519_vm1, %v4092_v14  ;;  %3306 = vmatmul.msk.f32.gmra.mxu1 %vm519_vm1, %v3885_v21  ;;  %5385 = vst [vmem:[#allocation89_spill] sm:$0xff] %v4562_v12 }
 0x13d   : > { %3338 = vmatmul.msk.f32.gmra.mxu3 %vm519_vm1, %v4535_v17  ;;  %3408 = vmatmul.msk.f32.gmra.mxu2 %vm519_vm1, %v4487_v36 }
 0x140   : > { %v4553_v32 = vpop.f32.mrf.mxu3  ;;  %v4555_v10 = vpop.f32.mrf.mxu2 }
 0x141   : > { %5382 = vst [vmem:[#allocation86_spill] sm:$0xff] %v4553_v32  ;;  %v4557_v20 = vpop.f32.mrf.mxu0  ;;  %v4559_v27 = vpop.f32.mrf.mxu1 }
 0x142   : > { %5383 = vst [vmem:[#allocation87_spill] sm:$0xff] %v4555_v10  ;;  %v4588_v10 = vld [vmem:[%s3800_s23 + $0x178] sm:$0xff] }
 0x143   : > { %5384 = vst [vmem:[#allocation88_spill] sm:$0xff] %v4559_v27  ;;  %v1406_v27 = vrot.slane %v3885_v21, 1  ;;  %v1409_v21 = vrot.slane %v4588_v10, 1 }
 0x144   : > { %3261 = vmatmul.msk.f32.gmra.mxu0 %vm519_vm1, %v4116_v39  ;;  %3307 = vmatmul.msk.f32.gmra.mxu1 %vm519_vm1, %v3902_v24  ;;  %5388 = vst [vmem:[#allocation92_spill] sm:$0xff] %v4588_v10  ;;  %v2181_v10 = vrot.slane %v3820_v8, 2  ;;  %v2183_v8 = vrot.slane %v3951_v35, 2  ;;  %v2186_v35 = vrot.slane %v3862_v16, 2 }
 0x145   : > { %3339 = vmatmul.msk.f32.gmra.mxu3 %vm519_vm1, %v4562_v12  ;;  %3409 = vmatmul.msk.f32.gmra.mxu2 %vm519_vm1, %v4514_v50  ;;  %v1408_v50 = vsel %vm1330_vm2, %v1406_v27, %v1407_v29 }
 0x148   : > { %v4578_v18 = vpop.f32.mrf.mxu3  ;;  %v4580_v32 = vpop.f32.mrf.mxu2 }
 0x149   : > { %5386 = vst [vmem:[#allocation90_spill] sm:$0xff] %v4578_v18  ;;  %v4582_v3 = vpop.f32.mrf.mxu0  ;;  %v4584_v36 = vpop.f32.mrf.mxu1  ;;  %v1410_v18 = vsel %vm1330_vm2, %v1407_v29, %v1409_v21 }
 0x14a   : > { %5387 = vst [vmem:[#allocation91_spill] sm:$0xff] %v4584_v36 }
 0x14c   : > { %3262 = vmatmul.msk.f32.gmra.mxu0 %vm519_vm1, %v4142_v62  ;;  %3380 = vmatmul.msk.f32.vlgmr.msrb.gmra.mxu1 %vm519_vm1, %v3982_v42 }
 0x14d   : > { %3340 = vmatmul.msk.f32.gmra.mxu3 %vm519_vm1, %v1408_v50  ;;  %3410 = vmatmul.msk.f32.gmra.mxu2 %vm519_vm1, %v4535_v17  ;;  %v2180_v17 = vrot.slane %v3803_v5, 2 }
 0x150   : > { %v4598_v24 = vpop.f32.mrf.mxu3  ;;  %v4600_v13 = vpop.f32.mrf.mxu2 }
 0x151   : > { %5389 = vst [vmem:[#allocation93_spill] sm:$0xff] %v4598_v24  ;;  %v4602_v27 = vpop.f32.mrf.mxu0  ;;  %v4604_v36 = vpop.f32.mrf.mxu1 }
 0x152   : > { %5390 = vst [vmem:[#allocation94_spill] sm:$0xff] %v4600_v13  ;;  %v5395_v13 = vmov 0.0  }
 0x153   : > { %5391 = vst [vmem:[#allocation95_spill] sm:$0xff] %v4604_v36  ;;  %v4626_v5 = vrot.slane %v5395_v13, 2 }
 0x154   : > { %3263 = vmatmul.msk.f32.gmra.mxu0 %vm519_vm1, %v4166_v4  ;;  %3381 = vmatmul.msk.f32.gmra.mxu1 %vm519_vm1, %v3982_v42  ;;  %v2182_v42 = vsel %vm2179_vm3, %v2180_v17, %v2181_v10 }
 0x155   : > { %3341 = vmatmul.msk.f32.gmra.mxu3 %vm519_vm1, %v1410_v18  ;;  %3411 = vmatmul.msk.f32.gmra.mxu2 %vm519_vm1, %v4562_v12  ;;  %5396 = vst [vmem:[#allocation99_spill] sm:$0xff] %v4626_v5  ;;  %v2184_v12 = vsel %vm2179_vm3, %v2181_v10, %v2183_v8 }
 0x158   : > { %v4616_v24 = vpop.f32.mrf.mxu3  ;;  %v4618_v36 = vpop.f32.mrf.mxu2 }
 0x159   : > { %5392 = vst [vmem:[#allocation96_spill] sm:$0xff] %v4616_v24  ;;  %v4620_v29 = vpop.f32.mrf.mxu0  ;;  %v4622_v21 = vpop.f32.mrf.mxu1 }
 0x15a   : > { %5393 = vst [vmem:[#allocation97_spill] sm:$0xff] %v4618_v36 }
 0x15b   : > { %5394 = vst [vmem:[#allocation98_spill] sm:$0xff] %v4622_v21 }
 0x15c   : > { %3348 = vmatmul.msk.f32.vlgmr.msra.gmra.mxu0 %vm519_vm1, %v3948_v34  ;;  %3416 = vmatmul.msk.f32.vlgmr.msra.gmra.mxu1 %vm519_vm1, %v2182_v42  ;;  %v2185_v34 = vrot.slane %v3837_v11, 2  ;;  %v2188_v11 = vrot.slane %v3988_v44, 2  ;;  %v2191_v44 = vrot.slane %v3896_v22, 2 }
 0x15d   : > { %3412 = vmatmul.msk.f32.gmra.mxu2 %vm519_vm1, %v1408_v50  ;;  %3450 = vmatmul.msk.f32.vlgmr.msrb.gmra.mxu3 %vm519_vm1, %v4626_v5 }
 0x160   : > { %v4635_v24 = vpop.f32.mrf.mxu3  ;;  %v4637_v21 = vpop.f32.mrf.mxu2 }
 0x161   : > { %5397 = vst [vmem:[#allocation100_spill] sm:$0xff] %v4635_v24  ;;  %v4639_v17 = vpop.f32.mrf.mxu0  ;;  %v4641_v13 = vpop.f32.mrf.mxu1 }
 0x162   : > { %5398 = vst [vmem:[#allocation101_spill] sm:$0xff] %v4637_v21 }
 0x163   : > { %5399 = vst [vmem:[#allocation102_spill] sm:$0xff] %v4641_v13 }
 0x164   : > { %3349 = vmatmul.msk.f32.gmra.mxu0 %vm519_vm1, %v3966_v38  ;;  %3417 = vmatmul.msk.f32.gmra.mxu1 %vm519_vm1, %v2184_v12  ;;  %v2187_v38 = vsel %vm2179_vm3, %v2185_v34, %v2186_v35  ;;  %v2189_v34 = vsel %vm2179_vm3, %v2186_v35, %v2188_v11  ;;  %v5409_v11 = vld [vmem:[#allocation6_spill] sm:$0xff] }
 0x165   : > { %3413 = vmatmul.msk.f32.gmra.mxu2 %vm519_vm1, %v1410_v18  ;;  %3451 = vmatmul.msk.f32.gmra.mxu3 %vm519_vm1, %v4626_v5  ;;  %v5422_v5 = vld [vmem:[#allocation25_spill] sm:$0xff] }
 0x168   : > { %v4652_v50 = vpop.f32.mrf.mxu3  ;;  %v4654_v24 = vpop.f32.mrf.mxu2 }
 0x169   : > { %5400 = vst [vmem:[#allocation103_spill] sm:$0xff] %v4652_v50  ;;  %v4656_v13 = vpop.f32.mrf.mxu0  ;;  %v4658_v10 = vpop.f32.mrf.mxu1 }
 0x16a   : > { %5401 = vst [vmem:[#allocation104_spill] sm:$0xff] %v4654_v24 }
 0x16b   : > { %5402 = vst [vmem:[#allocation105_spill] sm:$0xff] %v4658_v10 }
 0x16c   : > { %3350 = vmatmul.msk.f32.gmra.mxu0 %vm519_vm1, %v3985_v43  ;;  %3418 = vmatmul.msk.f32.gmra.mxu1 %vm519_vm1, %v2187_v38  ;;  %v2190_v43 = vrot.slane %v3879_v19, 2  ;;  %v5410_v19 = vld [vmem:[#allocation7_spill] sm:$0xff] }
 0x16d   : > { %3454 = vmatmul.msk.f32.vlgmr.msra.gmra.mxu3 %vm519_vm1, %v2182_v42  ;;  %3490 = vmatmul.msk.f32.vlgmr.msrb.gmra.mxu2 %vm519_vm1, %v2187_v38  ;;  %v2193_v22 = vrot.slane %v5410_v19, 2 }
 0x170   : > { %v4667_v16 = vpop.f32.mrf.mxu3  ;;  %v4669_v18 = vpop.f32.mrf.mxu2 }
 0x171   : > { %5403 = vst [vmem:[#allocation106_spill] sm:$0xff] %v4667_v16  ;;  %v4671_v8 = vpop.f32.mrf.mxu0  ;;  %v4673_v10 = vpop.f32.mrf.mxu1 }
 0x172   : > { %5404 = vst [vmem:[#allocation107_spill] sm:$0xff] %v4669_v18  ;;  %v5418_v18 = vld [vmem:[#allocation9_spill] sm:$0xff] }
 0x173   : > { %5405 = vst [vmem:[#allocation108_spill] sm:$0xff] %v4673_v10 }
 0x174   : > { %3351 = vmatmul.msk.f32.gmra.mxu0 %vm519_vm1, %v4007_v48  ;;  %3419 = vmatmul.msk.f32.gmra.mxu1 %vm519_vm1, %v2189_v34  ;;  %v2192_v48 = vsel %vm2179_vm3, %v2190_v43, %v2191_v44  ;;  %v2194_v43 = vsel %vm2179_vm3, %v2191_v44, %v2193_v22 }
 0x175   : > { %3455 = vmatmul.msk.f32.gmra.mxu3 %vm519_vm1, %v2184_v12  ;;  %3491 = vmatmul.msk.f32.gmra.mxu2 %vm519_vm1, %v2189_v34 }
 0x178   : > { %v4683_v42 = vpop.f32.mrf.mxu3  ;;  %v4685_v16 = vpop.f32.mrf.mxu2 }
 0x179   : > { %5406 = vst [vmem:[#allocation109_spill] sm:$0xff] %v4683_v42  ;;  %v4687_v10 = vpop.f32.mrf.mxu0  ;;  %v4689_v35 = vpop.f32.mrf.mxu1 }
 0x17a   : > { %5407 = vst [vmem:[#allocation110_spill] sm:$0xff] %v4685_v16  ;;  %v5414_v16 = vld [vmem:[#allocation8_spill] sm:$0xff] }
 0x17b   : > { %5408 = vst [vmem:[#allocation111_spill] sm:$0xff] %v4689_v35 }
 0x17c   : > { %3352 = vmatmul.msk.f32.gmra.mxu0 %vm519_vm1, %v5409_v11  ;;  %3420 = vmatmul.msk.f32.gmra.mxu1 %vm519_vm1, %v2192_v48  ;;  %v2196_v11 = vrot.slane %v3934_v30, 2  ;;  %v5420_v30 = vld [vmem:[#allocation10_spill] sm:$0xff] }
 0x17d   : > { %3456 = vmatmul.msk.f32.gmra.mxu3 %vm519_vm1, %v2187_v38  ;;  %3492 = vmatmul.msk.f32.gmra.mxu2 %vm519_vm1, %v2192_v48  ;;  %v2195_v38 = vrot.slane %v3913_v25, 2  ;;  %v5419_v25 = vld [vmem:[#allocation15_spill] sm:$0xff] }
 0x180   : > { %v4698_v12 = vpop.f32.mrf.mxu3  ;;  %v4700_v42 = vpop.f32.mrf.mxu2 }
 0x181   : > { %5411 = vst [vmem:[#allocation6_spill] sm:$0xff] %v4698_v12  ;;  %v4702_v50 = vpop.f32.mrf.mxu0  ;;  %v4704_v35 = vpop.f32.mrf.mxu1 }
 0x182   : > { %5412 = vst [vmem:[#allocation7_spill] sm:$0xff] %v4700_v42  ;;  %v2197_v42 = vsel %vm2179_vm3, %v2195_v38, %v2196_v11  ;;  %v756_v38 = vadd.f32 %v4200_v40, %v5422_v5  ;;  %v2200_v5 = vrot.slane %v3945_v33, 2  ;;  %v5430_v33 = vld [vmem:[#allocation23_spill] sm:$0xff] }
 0x183   : > { %5413 = vst [vmem:[#allocation112_spill] sm:$0xff] %v4704_v35  ;;  %v5417_v35 = vld [vmem:[#allocation20_spill] sm:$0xff] }
 0x184   : > { %3353 = vmatmul.msk.f32.gmra.mxu0 %vm519_vm1, %v5414_v16  ;;  %3421 = vmatmul.msk.f32.gmra.mxu1 %vm519_vm1, %v2194_v43  ;;  %v755_v44 = vadd.f32 %v4200_v40, %v5417_v35 }
 0x185   : > { %3457 = vmatmul.msk.f32.gmra.mxu3 %vm519_vm1, %v2189_v34  ;;  %3493 = vmatmul.msk.f32.gmra.mxu2 %vm519_vm1, %v2194_v43 }
 0x186   : > { %v998_v34 = vadd.f32 %v5419_v25, %v755_v44  ;;  %v5424_v25 = vld [vmem:[#allocation11_spill] sm:$0xff] }
 0x188   : > { %v4714_v19 = vpop.f32.mrf.mxu3  ;;  %v4716_v12 = vpop.f32.mrf.mxu2 }
 0x189   : > { %5415 = vst [vmem:[#allocation8_spill] sm:$0xff] %v4714_v19  ;;  %v4720_v22 = vpop.f32.mrf.mxu0  ;;  %v1196_v16 = vpop.f32.mrf.mxu1  ;;  %v2198_v19 = vrot.slane %v5420_v30, 2 }
 0x18a   : > { %5416 = vst [vmem:[#allocation113_spill] sm:$0xff] %v4716_v12  ;;  %v1242_v12 = vadd.f32 %v1196_v16, %v998_v34 }
 0x18b   : > { %v2199_v44 = vsel %vm2179_vm3, %v2196_v11, %v2198_v19  ;;  %v5427_v11 = vld [vmem:[#allocation29_spill] sm:$0xff] }
 0x18c   : > { %3354 = vmatmul.msk.f32.gmra.mxu0 %vm519_vm1, %v5418_v18  ;;  %3422 = vmatmul.msk.f32.gmra.mxu1 %vm519_vm1, %v2197_v42  ;;  %v757_v19 = vadd.f32 %v4200_v40, %v5427_v11 }
 0x18d   : > { %3458 = vmatmul.msk.f32.gmra.mxu3 %vm519_vm1, %v2192_v48  ;;  %3494 = vmatmul.msk.f32.gmra.mxu2 %vm519_vm1, %v2197_v42  ;;  %v5425_v48 = vld [vmem:[#allocation18_spill] sm:$0xff] }
 0x18e   : > { %v999_v16 = vadd.f32 %v5425_v48, %v756_v38  ;;  %v5429_v48 = vld [vmem:[#allocation13_spill] sm:$0xff] }
 0x190   : > { %v1561_v35 = vpop.f32.mrf.mxu3  ;;  %v4730_v24 = vpop.f32.mrf.mxu2 }
 0x191   : > { %5421 = vst [vmem:[#allocation20_spill] sm:$0xff] %v4730_v24  ;;  %v4734_v21 = vadd.f32 %v1561_v35, %v1242_v12  ;;  %v4736_v18 = vpop.f32.mrf.mxu0  ;;  %v1199_v36 = vpop.f32.mrf.mxu1  ;;  %v2201_v12 = vrot.slane %v3963_v37, 2  ;;  %v1000_v37 = vadd.f32 %v5430_v33, %v757_v19  ;;  %v5434_v33 = vld [vmem:[#allocation17_spill] sm:$0xff] }
 0x192   : > { %v1243_v34 = vadd.f32 %v1199_v36, %v999_v16  ;;  %v5431_v36 = vld [vmem:[#allocation14_spill] sm:$0xff] }
 0x193   : > { %5423 = vst [vmem:[#allocation9_spill] sm:$0xff] %v4734_v21  ;;  %v2203_v16 = vrot.slane %v5431_v36, 2 }
 0x194   : > { %3355 = vmatmul.msk.f32.gmra.mxu0 %vm519_vm1, %v5424_v25  ;;  %3423 = vmatmul.msk.f32.gmra.mxu1 %vm519_vm1, %v2199_v44 }
 0x195   : > { %3459 = vmatmul.msk.f32.gmra.mxu3 %vm519_vm1, %v2194_v43  ;;  %3495 = vmatmul.msk.f32.gmra.mxu2 %vm519_vm1, %v2199_v44  ;;  %v2202_v43 = vsel %vm2179_vm3, %v2200_v5, %v2201_v12  ;;  %v2204_v19 = vsel %vm2179_vm3, %v2201_v12, %v2203_v16 }
 0x198   : > { %v1564_v30 = vpop.f32.mrf.mxu3  ;;  %v4747_v35 = vpop.f32.mrf.mxu2 }
 0x199   : > { %5426 = vst [vmem:[#allocation15_spill] sm:$0xff] %v4747_v35  ;;  %v4751_v25 = vadd.f32 %v1564_v30, %v1243_v34  ;;  %v4753_v21 = vpop.f32.mrf.mxu0  ;;  %v1202_v38 = vpop.f32.mrf.mxu1 }
 0x19a   : > { %v1244_v34 = vadd.f32 %v1202_v38, %v1000_v37  ;;  %v2206_v37 = vrot.slane %v4004_v47, 2 }
 0x19b   : > { %5428 = vst [vmem:[#allocation10_spill] sm:$0xff] %v4751_v25  ;;  %v5432_v25 = vld [vmem:[#allocation34_spill] sm:$0xff] }
 0x19c   : > { %3356 = vmatmul.msk.f32.gmra.mxu0 %vm519_vm1, %v5429_v48  ;;  %3424 = vmatmul.msk.f32.gmra.mxu1 %vm519_vm1, %v2202_v43  ;;  %v758_v5 = vadd.f32 %v4200_v40, %v5432_v25  ;;  %v2205_v25 = vrot.slane %v3979_v41, 2  ;;  %v5438_v41 = vld [vmem:[#allocation22_spill] sm:$0xff] }
 0x19d   : > { %3460 = vmatmul.msk.f32.gmra.mxu3 %vm519_vm1, %v2197_v42  ;;  %3496 = vmatmul.msk.f32.gmra.mxu2 %vm519_vm1, %v2202_v43  ;;  %v5435_v42 = vld [vmem:[#allocation27_spill] sm:$0xff]  ;;  %v2208_v47 = vrot.slane %v5438_v41, 2  ;;  %v5443_v41 = vld [vmem:[#allocation36_spill] sm:$0xff] }
 0x19e   : > { %v1001_v38 = vadd.f32 %v5435_v42, %v758_v5  ;;  %v5437_v5 = vld [vmem:[#allocation21_spill] sm:$0xff] }
 0x1a0   : > { %v1567_v30 = vpop.f32.mrf.mxu3  ;;  %v4763_v11 = vpop.f32.mrf.mxu2 }
 0x1a1   : > { %v4767_v35 = vadd.f32 %v1567_v30, %v1244_v34  ;;  %v4769_v48 = vpop.f32.mrf.mxu0  ;;  %v1205_v24 = vpop.f32.mrf.mxu1 }
 0x1a2   : > { %v1245_v36 = vadd.f32 %v1205_v24, %v1001_v38  ;;  %v5439_v24 = vld [vmem:[#allocation32_spill] sm:$0xff] }
 0x1a3   : > { %5433 = vst [vmem:[#allocation25_spill] sm:$0xff] %v4767_v35  ;;  %v2207_v35 = vsel %vm2179_vm3, %v2205_v25, %v2206_v37 }
 0x1a4   : > { %3357 = vmatmul.msk.f32.gmra.mxu0 %vm519_vm1, %v5434_v33  ;;  %3425 = vmatmul.msk.f32.gmra.mxu1 %vm519_vm1, %v2204_v19 }
 0x1a5   : > { %3461 = vmatmul.msk.f32.gmra.mxu3 %vm519_vm1, %v2199_v44  ;;  %3497 = vmatmul.msk.f32.gmra.mxu2 %vm519_vm1, %v2204_v19 }
 0x1a8   : > { %v1570_v34 = vpop.f32.mrf.mxu3  ;;  %v4780_v30 = vpop.f32.mrf.mxu2 }
 0x1a9   : > { %v4782_v12 = vadd.f32 %v1570_v34, %v1245_v36  ;;  %v4784_v16 = vpop.f32.mrf.mxu0  ;;  %v1208_v33 = vpop.f32.mrf.mxu1 }
 0x1aa   : > { %v1246_v44 = vadd.f32 %v1208_v33, %v5439_v24  ;;  %v2211_v33 = vrot.slane %v4038_v55, 2 }
 0x1ab   : > { %5436 = vst [vmem:[#allocation11_spill] sm:$0xff] %v4782_v12  ;;  %v5442_v12 = vld [vmem:[#allocation26_spill] sm:$0xff] }
 0x1ac   : > { %3358 = vmatmul.msk.f32.gmra.mxu0 %vm519_vm1, %v5437_v5  ;;  %3426 = vmatmul.msk.f32.gmra.mxu1 %vm519_vm1, %v2207_v35  ;;  %v2209_v5 = vsel %vm2179_vm3, %v2206_v37, %v2208_v47 }
 0x1ad   : > { %3462 = vmatmul.msk.f32.gmra.mxu3 %vm519_vm1, %v2202_v43  ;;  %3498 = vmatmul.msk.f32.gmra.mxu2 %vm519_vm1, %v2207_v35  ;;  %v2210_v43 = vrot.slane %v4020_v51, 2  ;;  %v5447_v51 = vld [vmem:[#allocation31_spill] sm:$0xff] }
 0x1ae   : > { %v2213_v55 = vrot.slane %v5447_v51, 2  ;;  %v5451_v51 = vld [vmem:[#allocation43_spill] sm:$0xff] }
 0x1af   : > { %v2212_v47 = vsel %vm2179_vm3, %v2210_v43, %v2211_v33 }
 0x1b0   : > { %v1573_v42 = vpop.f32.mrf.mxu3  ;;  %v4794_v38 = vpop.f32.mrf.mxu2 }
 0x1b1   : > { %5440 = vst [vmem:[#allocation18_spill] sm:$0xff] %v4794_v38  ;;  %v4796_v36 = vadd.f32 %v1573_v42, %v1246_v44  ;;  %v4798_v34 = vpop.f32.mrf.mxu0  ;;  %v1211_v25 = vpop.f32.mrf.mxu1  ;;  %v5446_v38 = vld [vmem:[#allocation30_spill] sm:$0xff] }
 0x1b2   : > { %v1247_v24 = vadd.f32 %v1211_v25, %v5443_v41 }
 0x1b3   : > { %5441 = vst [vmem:[#allocation29_spill] sm:$0xff] %v4796_v36 }
 0x1b4   : > { %3359 = vmatmul.msk.f32.gmra.mxu0 %vm519_vm1, %v5442_v12  ;;  %3427 = vmatmul.msk.f32.gmra.mxu1 %vm519_vm1, %v2209_v5 }
 0x1b5   : > { %3463 = vmatmul.msk.f32.gmra.mxu3 %vm519_vm1, %v2204_v19  ;;  %3499 = vmatmul.msk.f32.gmra.mxu2 %vm519_vm1, %v2209_v5  ;;  %v5448_v19 = vld [vmem:[#allocation40_spill] sm:$0xff] }
 0x1b8   : > { %v1576_v44 = vpop.f32.mrf.mxu3  ;;  %v4809_v42 = vpop.f32.mrf.mxu2 }
 0x1b9   : > { %5444 = vst [vmem:[#allocation13_spill] sm:$0xff] %v4809_v42  ;;  %v4811_v36 = vadd.f32 %v1576_v44, %v1247_v24  ;;  %v4813_v37 = vpop.f32.mrf.mxu0  ;;  %v1214_v12 = vpop.f32.mrf.mxu1  ;;  %v5450_v42 = vld [vmem:[#allocation35_spill] sm:$0xff] }
 0x1ba   : > { %v1248_v25 = vadd.f32 %v1214_v12, %v5448_v19  ;;  %v2216_v12 = vrot.slane %v4072_v63, 2 }
 0x1bb   : > { %5445 = vst [vmem:[#allocation23_spill] sm:$0xff] %v4811_v36 }
 0x1bc   : > { %3360 = vmatmul.msk.f32.gmra.mxu0 %vm519_vm1, %v5446_v38  ;;  %3428 = vmatmul.msk.f32.gmra.mxu1 %vm519_vm1, %v2212_v47  ;;  %v2214_v38 = vsel %vm2179_vm3, %v2211_v33, %v2213_v55 }
 0x1bd   : > { %3464 = vmatmul.msk.f32.gmra.mxu3 %vm519_vm1, %v2207_v35  ;;  %3500 = vmatmul.msk.f32.gmra.mxu2 %vm519_vm1, %v2212_v47  ;;  %v2215_v35 = vrot.slane %v4054_v59, 2  ;;  %v5455_v59 = vld [vmem:[#allocation39_spill] sm:$0xff] }
 0x1be   : > { %v2218_v63 = vrot.slane %v5455_v59, 2  ;;  %v2221_v59 = vrot.slane %v4116_v39, 2 }
 0x1bf   : > { %v2217_v55 = vsel %vm2179_vm3, %v2215_v35, %v2216_v12 }
 0x1c0   : > { %v1579_v41 = vpop.f32.mrf.mxu3  ;;  %v4823_v24 = vpop.f32.mrf.mxu2 }
 0x1c1   : > { %v4825_v44 = vadd.f32 %v1579_v41, %v1248_v25  ;;  %v4827_v36 = vpop.f32.mrf.mxu0  ;;  %v1217_v43 = vpop.f32.mrf.mxu1 }
 0x1c2   : > { %v1249_v19 = vadd.f32 %v1217_v43, %v5451_v51 }
 0x1c3   : > { %5449 = vst [vmem:[#allocation14_spill] sm:$0xff] %v4825_v44 }
 0x1c4   : > { %3361 = vmatmul.msk.f32.gmra.mxu0 %vm519_vm1, %v5450_v42  ;;  %3429 = vmatmul.msk.f32.gmra.mxu1 %vm519_vm1, %v2214_v38 }
 0x1c5   : > { %3465 = vmatmul.msk.f32.gmra.mxu3 %vm519_vm1, %v2209_v5  ;;  %3501 = vmatmul.msk.f32.gmra.mxu2 %vm519_vm1, %v2214_v38  ;;  %v5454_v5 = vld [vmem:[#allocation38_spill] sm:$0xff] }
 0x1c8   : > { %v1582_v25 = vpop.f32.mrf.mxu3  ;;  %v4838_v41 = vpop.f32.mrf.mxu2 }
 0x1c9   : > { %v4840_v44 = vadd.f32 %v1582_v25, %v1249_v19  ;;  %v4842_v33 = vpop.f32.mrf.mxu0  ;;  %v4844_v42 = vpop.f32.mrf.mxu1  ;;  %v5457_v19 = vld [vmem:[#allocation47_spill] sm:$0xff] }
 0x1ca   : > { %5453 = vst [vmem:[#allocation17_spill] sm:$0xff] %v4844_v42  ;;  %v5460_v42 = vld [vmem:[#allocation42_spill] sm:$0xff] }
 0x1cb   : > { %5452 = vst [vmem:[#allocation34_spill] sm:$0xff] %v4840_v44 }
 0x1cc   : > { %3362 = vmatmul.msk.f32.gmra.mxu0 %vm519_vm1, %v5454_v5  ;;  %3430 = vmatmul.msk.f32.gmra.mxu1 %vm519_vm1, %v2217_v55  ;;  %v2219_v5 = vsel %vm2179_vm3, %v2216_v12, %v2218_v63 }
 0x1cd   : > { %3466 = vmatmul.msk.f32.gmra.mxu3 %vm519_vm1, %v2212_v47  ;;  %3502 = vmatmul.msk.f32.gmra.mxu2 %vm519_vm1, %v2217_v55  ;;  %v2220_v47 = vrot.slane %v4092_v14, 2  ;;  %v5463_v14 = vld [vmem:[#allocation45_spill] sm:$0xff] }
 0x1ce   : > { %v2223_v39 = vrot.slane %v5463_v14, 2 }
 0x1d0   : > { %v1585_v43 = vpop.f32.mrf.mxu3  ;;  %v4853_v51 = vpop.f32.mrf.mxu2 }
 0x1d1   : > { %5456 = vst [vmem:[#allocation27_spill] sm:$0xff] %v4853_v51  ;;  %v4856_v25 = vadd.f32 %v1585_v43, %v5457_v19  ;;  %v4858_v44 = vpop.f32.mrf.mxu0  ;;  %v4860_v35 = vpop.f32.mrf.mxu1 }
 0x1d2   : > { %5459 = vst [vmem:[#allocation22_spill] sm:$0xff] %v4860_v35 }
 0x1d3   : > { %5458 = vst [vmem:[#allocation21_spill] sm:$0xff] %v4856_v25 }
 0x1d4   : > { %3363 = vmatmul.msk.f32.gmra.mxu0 %vm519_vm1, %v5460_v42  ;;  %3431 = vmatmul.msk.f32.gmra.mxu1 %vm519_vm1, %v2219_v5  ;;  %v2222_v42 = vsel %vm2179_vm3, %v2220_v47, %v2221_v59  ;;  %v2224_v47 = vsel %vm2179_vm3, %v2221_v59, %v2223_v39 }
 0x1d5   : > { %3467 = vmatmul.msk.f32.gmra.mxu3 %vm519_vm1, %v2214_v38  ;;  %3503 = vmatmul.msk.f32.gmra.mxu2 %vm519_vm1, %v2219_v5 }
 0x1d8   : > { %v1588_v43 = vpop.f32.mrf.mxu3  ;;  %v4870_v19 = vpop.f32.mrf.mxu2 }
 0x1d9   : > { %5461 = vst [vmem:[#allocation32_spill] sm:$0xff] %v4870_v19  ;;  %v4873_v35 = vadd.f32 %v1588_v43, %v4316_v52  ;;  %v1750_v12 = vpop.f32.mrf.mxu0  ;;  %v2344_v63 = vpop.f32.mrf.mxu1 }
 0x1db   : > { %5462 = vst [vmem:[#allocation26_spill] sm:$0xff] %v4873_v35 }
 0x1dc   : > { %3364 = vmatmul.msk.f32.gmra.mxu0 %vm519_vm1, %v4271_v15  ;;  %3432 = vmatmul.msk.f32.gmra.mxu1 %vm519_vm1, %v2222_v42  ;;  %v2225_v15 = vrot.slane %v4142_v62, 2  ;;  %v2228_v62 = vrot.slane %v4314_v1, 2 }
 0x1dd   : > { %3468 = vmatmul.msk.f32.gmra.mxu3 %vm519_vm1, %v2217_v55  ;;  %3504 = vmatmul.msk.f32.gmra.mxu2 %vm519_vm1, %v2222_v42  ;;  %v2226_v55 = vrot.slane %v4166_v4, 2  ;;  %v2440_v4 = vadd.f32 %v2344_v63, %v4371_v49  ;;  %v5467_v63 = vld [vmem:[#allocation24_spill] sm:$0xff] }
 0x1df   : > { %v2227_v39 = vsel %vm2179_vm3, %v2225_v15, %v2226_v55  ;;  %v2229_v49 = vsel %vm2179_vm3, %v2226_v55, %v2228_v62  ;;  %v3591_v55 = vld [vmem:[%s3800_s23 + $0xf0] sm:$0xff] }
 0x1e0   : > { %v4882_v38 = vpop.f32.mrf.mxu2  ;;  %v2537_v25 = vpop.f32.mrf.mxu3 }
 0x1e1   : > { %5464 = vst [vmem:[#allocation36_spill] sm:$0xff] %v4882_v38  ;;  %v4884_v52 = vpop.f32.mrf.mxu0  ;;  %v2347_v43 = vpop.f32.mrf.mxu1  ;;  %v2543_v15 = vadd.f32 %v2537_v25, %v2440_v4  ;;  %v3592_v4 = vld [vmem:[%s3800_s23 + $0xf8] sm:$0xff] }
 0x1e2   : > { %v2441_v25 = vadd.f32 %v2347_v43, %v4392_v6  ;;  %v2231_v62 = vrot.slane %v3592_v4, 2  ;;  %v5468_v43 = vld [vmem:[#allocation28_spill] sm:$0xff] }
 0x1e4   : > { %3365 = vmatmul.msk.f32.gmra.mxu0 %vm519_vm1, %v4289_v56  ;;  %3433 = vmatmul.msk.f32.gmra.mxu1 %vm519_vm1, %v2224_v47  ;;  %v5466_v56 = vld [vmem:[#allocation19_spill] sm:$0xff] }
 0x1e5   : > { %3469 = vmatmul.msk.f32.gmra.mxu3 %vm519_vm1, %v2219_v5  ;;  %3505 = vmatmul.msk.f32.gmra.mxu2 %vm519_vm1, %v2224_v47  ;;  %v735_v19 = vadd.f32 %v4200_v40, %v5466_v56 }
 0x1e7   : > { %v978_v5 = vadd.f32 %v4530_v7, %v735_v19 }
 0x1e8   : > { %v4894_v14 = vpop.f32.mrf.mxu2  ;;  %v2540_v35 = vpop.f32.mrf.mxu3 }
 0x1e9   : > { %5465 = vst [vmem:[#allocation30_spill] sm:$0xff] %v4894_v14  ;;  %v4896_v38 = vpop.f32.mrf.mxu0  ;;  %v2350_v59 = vpop.f32.mrf.mxu1  ;;  %v1222_v56 = vadd.f32 %v4308_v58, %v978_v5  ;;  %v2230_v5 = vrot.slane %v3591_v55, 2 }
 0x1eb   : > { %v1593_v1 = vadd.f32 %v4327_v28, %v1222_v56  ;;  %v2544_v28 = vadd.f32 %v2540_v35, %v2441_v25  ;;  %v2232_v6 = vsel %vm2179_vm3, %v2230_v5, %v2231_v62 }
 0x1ec   : > { %3366 = vmatmul.msk.f32.gmra.mxu0 %vm519_vm1, %v4311_v53  ;;  %3434 = vmatmul.msk.f32.gmra.mxu1 %vm519_vm1, %v2227_v39 }
 0x1ed   : > { %3470 = vmatmul.msk.f32.gmra.mxu3 %vm519_vm1, %v2222_v42  ;;  %3506 = vmatmul.msk.f32.gmra.mxu2 %vm519_vm1, %v2227_v39  ;;  %v736_v42 = vadd.f32 %v4200_v40, %v5467_v63 }
 0x1ef   : > { %v979_v58 = vadd.f32 %v4557_v20, %v736_v42 }
 0x1f0   : > { %v2598_v14 = vpop.f32.mrf.mxu3  ;;  %v2842_v7 = vpop.f32.mrf.mxu2 }
 0x1f1   : > { %v2932_v19 = vadd.f32 %v2842_v7, %v2543_v15  ;;  %v4913_v53 = vpop.f32.mrf.mxu0  ;;  %v2353_v51 = vpop.f32.mrf.mxu1  ;;  %v1840_v15 = vadd.f32 %v1750_v12, %v1593_v1 }
 0x1f3   : > { %3024 = vst [vmem:[%s4918_s11] sm:$0xff] %v2932_v19  ;;  %v2087_v42 = vadd.f32 %v4415_v0, %v1840_v15 }
 0x1f4   : > { %3367 = vmatmul.msk.f32.gmra.mxu0 %vm519_vm1, %v4336_v60  ;;  %3435 = vmatmul.msk.f32.gmra.mxu1 %vm519_vm1, %v2229_v49  ;;  %v1223_v60 = vadd.f32 %v4333_v45, %v979_v58 }
 0x1f5   : > { %3471 = vmatmul.msk.f32.gmra.mxu3 %vm519_vm1, %v2224_v47  ;;  %3507 = vmatmul.msk.f32.gmra.mxu2 %vm519_vm1, %v2229_v49  ;;  %v737_v47 = vadd.f32 %v4200_v40, %v5468_v43  ;;  %v2442_v35 = vadd.f32 %v2350_v59, %v2087_v42  ;;  %v2233_v40 = vrot.slane %v4358_v54, 2  ;;  %v5469_v54 = vld [vmem:[#allocation33_spill] sm:$0xff] }
 0x1f6   : > { %v1594_v45 = vadd.f32 %v4348_v2, %v1223_v60 }
 0x1f7   : > { %v980_v55 = vadd.f32 %v4582_v3, %v737_v47  ;;  %v2688_v12 = vadd.f32 %v2598_v14, %v2442_v35  ;;  %v2234_v59 = vsel %vm2179_vm3, %v2231_v62, %v2233_v40  ;;  %v3594_v62 = vld [vmem:[%s3800_s23 + $0x108] sm:$0xff] }
 0x1f8   : > { %v2601_v56 = vpop.f32.mrf.mxu3  ;;  %v2845_v7 = vpop.f32.mrf.mxu2  ;;  %v1841_v0 = vadd.f32 %v4884_v52, %v1594_v45  ;;  %v2235_v15 = vrot.slane %v3594_v62, 2  ;;  %v5472_v45 = vld [vmem:[#allocation68_spill] sm:$0xff] }
 0x1f9   : > { %v2933_v19 = vadd.f32 %v2845_v7, %v2544_v28  ;;  %v4932_v63 = vpop.f32.mrf.mxu0  ;;  %v2356_v20 = vpop.f32.mrf.mxu1  ;;  %v1224_v3 = vadd.f32 %v4352_v61, %v980_v55  ;;  %v3595_v28 = vld [vmem:[%s3800_s23 + $0x110] sm:$0xff] }
 0x1fa   : > { %v2088_v61 = vadd.f32 %v4436_v26, %v1841_v0  ;;  %v2236_v26 = vrot.slane %v3595_v28, 2 }
 0x1fb   : > { %3025 = vst [vmem:[%s4918_s11 + $0x8] sm:$0xff] %v2933_v19  ;;  %v1595_v14 = vadd.f32 %v4369_v9, %v1224_v3  ;;  %v5475_v3 = vld [vmem:[#allocation57_spill] sm:$0xff] }
 0x1fc   : > { %3368 = vmatmul.msk.f32.gmra.mxu0 %vm519_vm1, %v4355_v31  ;;  %3436 = vmatmul.msk.f32.gmra.mxu1 %vm519_vm1, %v2232_v6  ;;  %v2443_v4 = vadd.f32 %v2353_v51, %v2088_v61  ;;  %v2237_v51 = vsel %vm2179_vm3, %v2235_v15, %v2236_v26 }
 0x1fd   : > { %3472 = vmatmul.msk.f32.gmra.mxu3 %vm519_vm1, %v2227_v39  ;;  %3508 = vmatmul.msk.f32.gmra.mxu2 %vm519_vm1, %v2232_v6  ;;  %v4955_v39 = vld [vmem:[%s5263_s4] ss:$0 sm:$0xff]  ;;  %v1842_v7 = vadd.f32 %v4896_v38, %v1595_v14  ;;  %v5473_v38 = vld [vmem:[#allocation56_spill] sm:$0xff] }
 0x1fe   : > { %v738_v52 = vadd.f32 %v4955_v39, %v5469_v54  ;;  %v2689_v9 = vadd.f32 %v2601_v56, %v2443_v4  ;;  %v5474_v56 = vld [vmem:[#allocation53_spill] sm:$0xff] }
 0x1ff   : > { %v2089_v35 = vadd.f32 %v5472_v45, %v1842_v7  ;;  %v5479_v7 = vld [vmem:[#allocation61_spill] sm:$0xff] }
 0x200   : > { %v2604_v1 = vpop.f32.mrf.mxu3  ;;  %v2848_v58 = vpop.f32.mrf.mxu2  ;;  %v981_v5 = vadd.f32 %v4602_v27, %v738_v52  ;;  %v5476_v52 = vld [vmem:[#allocation55_spill] sm:$0xff] }
 0x201   : > { %v2934_v31 = vadd.f32 %v2848_v58, %v2688_v12  ;;  %v4949_v25 = vpop.f32.mrf.mxu0  ;;  %v2359_v2 = vpop.f32.mrf.mxu1  ;;  %v2444_v12 = vadd.f32 %v2356_v20, %v2089_v35  ;;  %v2238_v58 = vrot.slane %v5475_v3, 2  ;;  %v5480_v35 = vld [vmem:[#allocation60_spill] sm:$0xff] }
 0x203   : > { %3026 = vst [vmem:[%s4918_s11 + $0x10] sm:$0xff] %v2934_v31  ;;  %v2690_v54 = vadd.f32 %v2604_v1, %v2444_v12  ;;  %v2239_v20 = vsel %vm2179_vm3, %v2236_v26, %v2238_v58  ;;  %v3596_v26 = vld [vmem:[%s3800_s23 + $0x120] sm:$0xff] }
 0x204   : > { %3369 = vmatmul.msk.f32.gmra.mxu0 %vm519_vm1, %v4378_v57  ;;  %3437 = vmatmul.msk.f32.gmra.mxu1 %vm519_vm1, %v2234_v59  ;;  %v5470_v57 = vld [vmem:[#allocation52_spill] sm:$0xff] }
 0x205   : > { %3473 = vmatmul.msk.f32.gmra.mxu3 %vm519_vm1, %v2229_v49  ;;  %3509 = vmatmul.msk.f32.gmra.mxu2 %vm519_vm1, %v2234_v59  ;;  %v1225_v43 = vadd.f32 %v5470_v57, %v981_v5  ;;  %v5471_v49 = vld [vmem:[#allocation37_spill] sm:$0xff]  ;;  %v2240_v57 = vrot.slane %v3596_v26, 2 }
 0x206   : > { %v739_v55 = vadd.f32 %v4955_v39, %v5471_v49 }
 0x207   : > { %v1596_v0 = vadd.f32 %v5474_v56, %v1225_v43  ;;  %v3597_v43 = vld [vmem:[%s3800_s23 + $0x128] sm:$0xff] }
 0x208   : > { %v2607_v60 = vpop.f32.mrf.mxu3  ;;  %v2851_v19 = vpop.f32.mrf.mxu2  ;;  %v982_v40 = vadd.f32 %v4620_v29, %v739_v55 }
 0x209   : > { %v2935_v47 = vadd.f32 %v2851_v19, %v2689_v9  ;;  %v4972_v42 = vpop.f32.mrf.mxu0  ;;  %v2362_v27 = vpop.f32.mrf.mxu1  ;;  %v1843_v31 = vadd.f32 %v4913_v53, %v1596_v0  ;;  %v5478_v53 = vld [vmem:[#allocation58_spill] sm:$0xff] }
 0x20a   : > { %v1226_v29 = vadd.f32 %v5476_v52, %v982_v40 }
 0x20b   : > { %3027 = vst [vmem:[%s4918_s11 + $0x18] sm:$0xff] %v2935_v47  ;;  %v2090_v28 = vadd.f32 %v4480_v46, %v1843_v31  ;;  %v2241_v46 = vrot.slane %v3597_v43, 2  ;;  %v3598_v43 = vld [vmem:[%s3800_s23 + $0x138] sm:$0xff] }
 0x20c   : > { %3370 = vmatmul.msk.f32.gmra.mxu0 %vm519_vm1, %v5473_v38  ;;  %3438 = vmatmul.msk.f32.gmra.mxu1 %vm519_vm1, %v2237_v51  ;;  %v1597_v1 = vadd.f32 %v5478_v53, %v1226_v29 }
 0x20d   : > { %3474 = vmatmul.msk.f32.gmra.mxu3 %vm519_vm1, %v2232_v6  ;;  %3510 = vmatmul.msk.f32.gmra.mxu2 %vm519_vm1, %v2237_v51  ;;  %v5477_v6 = vld [vmem:[#allocation41_spill] sm:$0xff]  ;;  %v2445_v19 = vadd.f32 %v2359_v2, %v2090_v28  ;;  %v2242_v2 = vsel %vm2179_vm3, %v2240_v57, %v2241_v46 }
 0x20e   : > { %v740_v15 = vadd.f32 %v4955_v39, %v5477_v6  ;;  %v1844_v47 = vadd.f32 %v4932_v63, %v1597_v1  ;;  %v5482_v63 = vld [vmem:[#allocation65_spill] sm:$0xff] }
 0x20f   : > { %v2691_v49 = vadd.f32 %v2607_v60, %v2445_v19  ;;  %v5483_v60 = vld [vmem:[#allocation62_spill] sm:$0xff]  ;;  %v5489_v19 = vld [vmem:[#allocation71_spill] sm:$0xff] }
 0x210   : > { %v2610_v61 = vpop.f32.mrf.mxu3  ;;  %v2854_v14 = vpop.f32.mrf.mxu2  ;;  %v983_v9 = vadd.f32 %v4639_v17, %v740_v15  ;;  %v2091_v12 = vadd.f32 %v4503_v23, %v1844_v47  ;;  %v3599_v47 = vld [vmem:[%s3800_s23 + $0x140] sm:$0xff] }
 0x211   : > { %v2936_v5 = vadd.f32 %v2854_v14, %v2690_v54  ;;  %v4989_v4 = vpop.f32.mrf.mxu0  ;;  %v2365_v62 = vpop.f32.mrf.mxu1  ;;  %v5484_v54 = vld [vmem:[#allocation66_spill] sm:$0xff]  ;;  %v5485_v14 = vld [vmem:[#allocation64_spill] sm:$0xff] }
 0x212   : > { %v1227_v40 = vadd.f32 %v5480_v35, %v983_v9  ;;  %v2446_v31 = vadd.f32 %v2362_v27, %v2091_v12  ;;  %v2243_v52 = vrot.slane %v5484_v54, 2 }
 0x213   : > { %3028 = vst [vmem:[%s4918_s11 + $0x20] sm:$0xff] %v2936_v5 }
 0x214   : > { %3371 = vmatmul.msk.f32.gmra.mxu0 %vm519_vm1, %v5479_v7  ;;  %3439 = vmatmul.msk.f32.gmra.mxu1 %vm519_vm1, %v2239_v20  ;;  %v1598_v58 = vadd.f32 %v5483_v60, %v1227_v40  ;;  %v2692_v29 = vadd.f32 %v2610_v61, %v2446_v31  ;;  %v2244_v27 = vsel %vm2179_vm3, %v2241_v46, %v2243_v52  ;;  %v5487_v7 = vld [vmem:[#allocation82_spill] sm:$0xff]  ;;  %v2245_v46 = vrot.slane %v3598_v43, 2  ;;  %v5492_v60 = vld [vmem:[#allocation87_spill] sm:$0xff]  ;;  %v3600_v43 = vld [vmem:[%s3800_s23 + $0x150] sm:$0xff] }
 0x215   : > { %3475 = vmatmul.msk.f32.gmra.mxu3 %vm519_vm1, %v2234_v59  ;;  %3511 = vmatmul.msk.f32.gmra.mxu2 %vm519_vm1, %v2239_v20  ;;  %v5481_v59 = vld [vmem:[#allocation44_spill] sm:$0xff] }
 0x216   : > { %v741_v0 = vadd.f32 %v4955_v39, %v5481_v59  ;;  %v1845_v23 = vadd.f32 %v4949_v25, %v1598_v58  ;;  %v5488_v25 = vld [vmem:[#allocation67_spill] sm:$0xff]  ;;  %v5490_v59 = vld [vmem:[#allocation70_spill] sm:$0xff] }
 0x218   : > { %v2613_v55 = vpop.f32.mrf.mxu3  ;;  %v2857_v45 = vpop.f32.mrf.mxu2  ;;  %v984_v3 = vadd.f32 %v4656_v13, %v741_v0  ;;  %v2092_v9 = vadd.f32 %v5487_v7, %v1845_v23  ;;  %v5495_v23 = vld [vmem:[#allocation76_spill] sm:$0xff] }
 0x219   : > { %v2937_v38 = vadd.f32 %v2857_v45, %v2691_v49  ;;  %v5007_v56 = vpop.f32.mrf.mxu0  ;;  %v2368_v17 = vpop.f32.mrf.mxu1  ;;  %v2246_v49 = vrot.slane %v3599_v47, 2  ;;  %v3601_v47 = vld [vmem:[%s3800_s23 + $0x158] sm:$0xff] }
 0x21a   : > { %v1228_v13 = vadd.f32 %v5485_v14, %v984_v3  ;;  %v2447_v57 = vadd.f32 %v2365_v62, %v2092_v9 }
 0x21b   : > { %3029 = vst [vmem:[%s4918_s11 + $0x28] sm:$0xff] %v2937_v38  ;;  %v2247_v62 = vsel %vm2179_vm3, %v2245_v46, %v2246_v49  ;;  %v2250_v46 = vrot.slane %v3600_v43, 2 }
 0x21c   : > { %3372 = vmatmul.msk.f32.gmra.mxu0 %vm519_vm1, %v5482_v63  ;;  %3440 = vmatmul.msk.f32.gmra.mxu1 %vm519_vm1, %v2242_v2  ;;  %v1599_v61 = vadd.f32 %v5488_v25, %v1228_v13  ;;  %v2693_v35 = vadd.f32 %v2613_v55, %v2447_v57  ;;  %v5494_v55 = vld [vmem:[#allocation72_spill] sm:$0xff] }
 0x21d   : > { %3476 = vmatmul.msk.f32.gmra.mxu3 %vm519_vm1, %v2237_v51  ;;  %3512 = vmatmul.msk.f32.gmra.mxu2 %vm519_vm1, %v2242_v2  ;;  %v5486_v51 = vld [vmem:[#allocation46_spill] sm:$0xff] }
 0x21e   : > { %v742_v1 = vadd.f32 %v4955_v39, %v5486_v51  ;;  %v1846_v45 = vadd.f32 %v4972_v42, %v1599_v61  ;;  %v5493_v42 = vld [vmem:[#allocation75_spill] sm:$0xff] }
 0x220   : > { %v2616_v5 = vpop.f32.mrf.mxu3  ;;  %v2860_v6 = vpop.f32.mrf.mxu2  ;;  %v985_v26 = vadd.f32 %v4671_v8, %v742_v1  ;;  %v2093_v58 = vadd.f32 %v5492_v60, %v1846_v45  ;;  %v5502_v60 = vld [vmem:[#allocation94_spill] sm:$0xff] }
 0x221   : > { %v2938_v15 = vadd.f32 %v2860_v6, %v2692_v29  ;;  %v5024_v28 = vpop.f32.mrf.mxu0  ;;  %v2371_v53 = vpop.f32.mrf.mxu1  ;;  %v2248_v29 = vrot.slane %v5495_v23, 2  ;;  %v5496_v6 = vld [vmem:[#allocation74_spill] sm:$0xff] }
 0x222   : > { %v1229_v0 = vadd.f32 %v5490_v59, %v985_v26  ;;  %v2448_v52 = vadd.f32 %v2368_v17, %v2093_v58  ;;  %v5500_v59 = vld [vmem:[#allocation79_spill] sm:$0xff] }
 0x223   : > { %3030 = vst [vmem:[%s4918_s11 + $0x30] sm:$0xff] %v2938_v15  ;;  %v2249_v17 = vsel %vm2179_vm3, %v2246_v49, %v2248_v29 }
 0x224   : > { %3373 = vmatmul.msk.f32.gmra.mxu0 %vm519_vm1, %v5489_v19  ;;  %3441 = vmatmul.msk.f32.gmra.mxu1 %vm519_vm1, %v2244_v27  ;;  %v1600_v54 = vadd.f32 %v5494_v55, %v1229_v0  ;;  %v2694_v13 = vadd.f32 %v2616_v5, %v2448_v52  ;;  %v5499_v19 = vld [vmem:[#allocation80_spill] sm:$0xff] }
 0x225   : > { %3477 = vmatmul.msk.f32.gmra.mxu3 %vm519_vm1, %v2239_v20  ;;  %3513 = vmatmul.msk.f32.gmra.mxu2 %vm519_vm1, %v2244_v27  ;;  %v5491_v20 = vld [vmem:[#allocation48_spill] sm:$0xff] }
 0x226   : > { %v743_v63 = vadd.f32 %v4955_v39, %v5491_v20  ;;  %v1847_v14 = vadd.f32 %v4989_v4, %v1600_v54  ;;  %v5498_v4 = vld [vmem:[#allocation77_spill] sm:$0xff] }
 0x227   : > { %v5505_v54 = vld [vmem:[#allocation85_spill] sm:$0xff] }
 0x228   : > { %v2619_v40 = vpop.f32.mrf.mxu3  ;;  %v2863_v38 = vpop.f32.mrf.mxu2  ;;  %v986_v31 = vadd.f32 %v4687_v10, %v743_v63  ;;  %v2094_v61 = vadd.f32 %v4580_v32, %v1847_v14  ;;  %v2251_v32 = vrot.slane %v3601_v47, 2  ;;  %v2253_v52 = vrot.slane %v5505_v54, 2 }
 0x229   : > { %v2939_v12 = vadd.f32 %v2863_v38, %v2693_v35  ;;  %v5042_v3 = vpop.f32.mrf.mxu0  ;;  %v2374_v8 = vpop.f32.mrf.mxu1 }
 0x22a   : > { %v1230_v10 = vadd.f32 %v5496_v6, %v986_v31  ;;  %v2449_v57 = vadd.f32 %v2371_v53, %v2094_v61  ;;  %v2252_v53 = vsel %vm2179_vm3, %v2250_v46, %v2251_v32  ;;  %v5503_v31 = vld [vmem:[#allocation84_spill] sm:$0xff]  ;;  %v5506_v6 = vld [vmem:[#allocation83_spill] sm:$0xff] }
 0x22b   : > { %3031 = vst [vmem:[%s4918_s11 + $0x38] sm:$0xff] %v2939_v12 }
 0x22c   : > { %3374 = vmatmul.msk.f32.gmra.mxu0 %vm519_vm1, %v5493_v42  ;;  %3442 = vmatmul.msk.f32.gmra.mxu1 %vm519_vm1, %v2247_v62  ;;  %v1601_v5 = vadd.f32 %v5498_v4, %v1230_v10  ;;  %v2695_v45 = vadd.f32 %v2619_v40, %v2449_v57  ;;  %v5504_v40 = vld [vmem:[#allocation81_spill] sm:$0xff]  ;;  %v3602_v4 = vld [vmem:[%s3800_s23 + $0x168] sm:$0xff]  ;;  %v5510_v57 = vld [vmem:[#allocation86_spill] sm:$0xff] }
 0x22d   : > { %3478 = vmatmul.msk.f32.gmra.mxu3 %vm519_vm1, %v2242_v2  ;;  %3514 = vmatmul.msk.f32.gmra.mxu2 %vm519_vm1, %v2247_v62  ;;  %v5497_v2 = vld [vmem:[#allocation49_spill] sm:$0xff] }
 0x22e   : > { %v744_v25 = vadd.f32 %v4955_v39, %v5497_v2  ;;  %v1848_v49 = vadd.f32 %v5007_v56, %v1601_v5  ;;  %v5507_v2 = vld [vmem:[#allocation51_spill] sm:$0xff]  ;;  %v5509_v5 = vld [vmem:[#allocation89_spill] sm:$0xff] }
 0x230   : > { %v2622_v15 = vpop.f32.mrf.mxu3  ;;  %v2866_v51 = vpop.f32.mrf.mxu2  ;;  %v987_v26 = vadd.f32 %v4702_v50, %v744_v25  ;;  %v2095_v58 = vadd.f32 %v5502_v60, %v1848_v49  ;;  %v5508_v25 = vld [vmem:[#allocation97_spill] sm:$0xff] }
 0x231   : > { %v2940_v1 = vadd.f32 %v2866_v51, %v2694_v13  ;;  %v5059_v7 = vpop.f32.mrf.mxu0  ;;  %v2377_v9 = vpop.f32.mrf.mxu1 }
 0x232   : > { %v1231_v0 = vadd.f32 %v5500_v59, %v987_v26  ;;  %v2450_v55 = vadd.f32 %v2374_v8, %v2095_v58  ;;  %v2254_v8 = vsel %vm2179_vm3, %v2251_v32, %v2253_v52 }
 0x233   : > { %3032 = vst [vmem:[%s4918_s11 + $0x40] sm:$0xff] %v2940_v1 }
 0x234   : > { %3375 = vmatmul.msk.f32.gmra.mxu0 %vm519_vm1, %v5499_v19  ;;  %3443 = vmatmul.msk.f32.gmra.mxu1 %vm519_vm1, %v2249_v17  ;;  %v1602_v42 = vadd.f32 %v5504_v40, %v1231_v0  ;;  %v2696_v29 = vadd.f32 %v2622_v15, %v2450_v55  ;;  %v3603_v15 = vld [vmem:[%s3800_s23 + $0x170] sm:$0xff]  ;;  %s3527_s23 = sshll.u32 %s3674_s1, 8  ;;  %s3072_s1 = sshll.u32 %s4918_s11, 4  ;;  %s3073_s1 = int_to_ptr.vmem [resolvable:$true] %s3072_s1 }
 0x235   : > { %3479 = vmatmul.msk.f32.gmra.mxu3 %vm519_vm1, %v2244_v27  ;;  %3515 = vmatmul.msk.f32.gmra.mxu2 %vm519_vm1, %v2249_v17  ;;  %v5501_v27 = vld [vmem:[#allocation50_spill] sm:$0xff]  ;;  %v2256_v19 = vrot.slane %v3603_v15, 2  ;;  %v5516_v40 = vld [vmem:[#allocation92_spill] sm:$0xff]  ;;  %s3071_s16 = scalar_lea.hbm %s5264_s5, %s3527_s23 }
 0x236   : > { %v745_v63 = vadd.f32 %v4955_v39, %v5501_v27  ;;  %v1849_v23 = vadd.f32 %v5024_v28, %v1602_v42  ;;  %v2255_v28 = vrot.slane %v3602_v4, 2  ;;  %v2258_v42 = vrot.slane %v5516_v40, 2  ;;  %s3074_s17 = sshll.u32 %s3071_s16, 4  ;;  %s3075_s17 = int_to_ptr.hbm [resolvable:$true] %s3074_s17 }
 0x237   : > { %s3618_s25 = sshra.s32 %s3075_s17, 4  ;;  %s3619_s25 = int_to_ptr.hbm [resolvable:$true] %s3618_s25 }
 0x238   : > { %v2625_v35 = vpop.f32.mrf.mxu3  ;;  %v2869_v38 = vpop.f32.mrf.mxu2  ;;  %v988_v56 = vadd.f32 %v4720_v22, %v745_v63  ;;  %v2096_v61 = vadd.f32 %v5508_v25, %v1849_v23  ;;  %v5512_v63 = vld [vmem:[#allocation54_spill] sm:$0xff]  ;;  %s3620_s27 = scalar_lea.hbm %s3619_s25, 256  ;;  %p3625_p1 = scmp.lt.s32.totalorder %s3619_s25, %s5264_s5 }
 0x239   : > { %v2941_v12 = vadd.f32 %v2869_v38, %v2695_v45  ;;  %v5077_v20 = vpop.f32.mrf.mxu0  ;;  %v2380_v50 = vpop.f32.mrf.mxu1  ;;  %v5511_v38 = vld [vmem:[#allocation88_spill] sm:$0xff]  ;;  %v747_v60 = vadd.f32 %v4955_v39, %v5512_v63  ;;  %v5525_v63 = vld [vmem:[#allocation98_spill] sm:$0xff]  ;;  %p3621_p12 = scmp.ne.s32.totalorder %s3619_s25, %s3620_s27  ;;  %p3626_p2 = scmp.lt.s32.totalorder %s3624_s7, %s3620_s27 }
 0x23a   : > { %v1232_v10 = vadd.f32 %v5506_v6, %v988_v56  ;;  %v2451_v46 = vadd.f32 %v2377_v9, %v2096_v61  ;;  %v5513_v9 = vld [vmem:[#allocation101_spill] sm:$0xff] }
 0x23b   : > { %3033 = vst [vmem:[%s4918_s11 + $0x48] sm:$0xff] %v2941_v12  ;;  %p3622_p13 = pnand %p3621_p12, %p3757_p4  ;;  %p3627_p3 = por %p3626_p2, %p3625_p1 }
 0x23c   : > { %3376 = vmatmul.msk.f32.gmra.mxu0 %vm519_vm1, %v5503_v31  ;;  %3444 = vmatmul.msk.f32.gmra.mxu1 %vm519_vm1, %v2252_v53  ;;  %v1603_v43 = vadd.f32 %v5510_v57, %v1232_v10  ;;  %v2697_v32 = vadd.f32 %v2625_v35, %v2451_v46  ;;  %v5515_v35 = vld [vmem:[#allocation90_spill] sm:$0xff] }
 0x23d   : > { %3480 = vmatmul.msk.f32.gmra.mxu3 %vm519_vm1, %v2247_v62  ;;  %3516 = vmatmul.msk.f32.gmra.mxu2 %vm519_vm1, %v2252_v53  ;;  %v746_v62 = vadd.f32 %v4955_v39, %v5507_v2  ;;  %v5518_v2 = vld [vmem:[#allocation59_spill] sm:$0xff]  ;;  %p3623_p0 = pneg %p3622_p13 }
 0x23e   : > { %v1850_v47 = vadd.f32 %v5042_v3, %v1603_v43  ;;  %v990_v3 = vadd.f32 %v4753_v21, %v747_v60 }
 0x23f   : > { %v989_v26 = vadd.f32 %v4736_v18, %v746_v62  ;;  %v2257_v18 = vsel %vm2179_vm3, %v2255_v28, %v2256_v19  ;;  %p3628_p5 = pnand %p3627_p3, %p3623_p0 }
 0x240   : > { %v2628_v14 = vpop.f32.mrf.mxu3  ;;  %v2872_v13 = vpop.f32.mrf.mxu2  ;;  %v2097_v58 = vadd.f32 %v5513_v9, %v1850_v47  ;;  %v5522_v47 = vld [vmem:[#allocation63_spill] sm:$0xff] }
 0x241   : > { %v2942_v22 = vadd.f32 %v2872_v13, %v2696_v29  ;;  %v5094_v51 = vpop.f32.mrf.mxu0  ;;  %v2383_v1 = vpop.f32.mrf.mxu1  ;;  %v1233_v59 = vadd.f32 %v5511_v38, %v989_v26  ;;  %v5517_v29 = vld [vmem:[#allocation91_spill] sm:$0xff] }
 0x242   : > { %v2452_v56 = vadd.f32 %v2380_v50, %v2097_v58  ;;  %v1234_v13 = vadd.f32 %v5517_v29, %v990_v3  ;;  %v748_v50 = vadd.f32 %v4955_v39, %v5518_v2  ;;  %v5526_v3 = vld [vmem:[#allocation69_spill] sm:$0xff] }
 0x243   : > { %3034 = vst [vmem:[%s4918_s11 + $0x50] sm:$0xff] %v2942_v22  ;;  %v1604_v31 = vadd.f32 %v5515_v35, %v1233_v59  ;;  %v2259_v22 = vsel %vm2179_vm3, %v2256_v19, %v2258_v42  ;;  %v5521_v19 = vld [vmem:[#allocation95_spill] sm:$0xff]  ;;  %v750_v35 = vadd.f32 %v4955_v39, %v5526_v3  ;;  %v5530_v2 = vld [vmem:[#allocation73_spill] sm:$0xff]  ;;  %v5539_v3 = vld [vmem:[#allocation20_spill] sm:$0xff] }
 0x244   : > { %3377 = vmatmul.msk.f32.gmra.mxu0 %vm519_vm1, %v5509_v5  ;;  %3445 = vmatmul.msk.f32.gmra.mxu1 %vm519_vm1, %v2254_v8  ;;  %v2698_v54 = vadd.f32 %v2628_v14, %v2452_v56  ;;  %v5520_v14 = vld [vmem:[#allocation93_spill] sm:$0xff] }
 0x245   : > { %3481 = vmatmul.msk.f32.gmra.mxu3 %vm519_vm1, %v2249_v17  ;;  %3517 = vmatmul.msk.f32.gmra.mxu2 %vm519_vm1, %v2254_v8  ;;  %v5514_v17 = vld [vmem:[#allocation99_spill] sm:$0xff]  ;;  %v1851_v55 = vadd.f32 %v5059_v7, %v1604_v31  ;;  %v991_v7 = vadd.f32 %v4769_v48, %v748_v50  ;;  %v1605_v25 = vadd.f32 %v5520_v14, %v1234_v13  ;;  %v5527_v31 = vld [vmem:[#allocation110_spill] sm:$0xff] }
 0x246   : > { %v749_v48 = vadd.f32 %v4955_v39, %v5522_v47  ;;  %v751_v50 = vadd.f32 %v4955_v39, %v5530_v2 }
 0x247   : > { %v1852_v4 = vadd.f32 %v5077_v20, %v1605_v25  ;;  %v1235_v26 = vadd.f32 %v5521_v19, %v991_v7  ;;  %v5532_v7 = vld [vmem:[#allocation103_spill] sm:$0xff] }
 0x248   : > { %v2631_v49 = vpop.f32.mrf.mxu3  ;;  %v2875_v45 = vpop.f32.mrf.mxu2 }
 0x249   : > { %v2943_v0 = vadd.f32 %v2875_v45, %v2697_v32  ;;  %v1792_v12 = vpop.f32.mrf.mxu0  ;;  %v2386_v27 = vpop.f32.mrf.mxu1  ;;  %v5523_v32 = vld [vmem:[#allocation107_spill] sm:$0xff]  ;;  %v5524_v45 = vld [vmem:[#allocation96_spill] sm:$0xff] }
 0x24a   : > { %v1606_v38 = vadd.f32 %v5524_v45, %v1235_v26 }
 0x24b   : > { %3035 = vst [vmem:[%s4918_s11 + $0x58] sm:$0xff] %v2943_v0 }
 0x24c   : > { %3446 = vmatmul.msk.f32.gmra.mxu1 %vm519_vm1, %v2257_v18  ;;  %3486 = vmatmul.msk.f32.vlgmr.msrb.gmra.mxu0 %vm519_vm1, %v5514_v17 }
 0x24d   : > { %3482 = vmatmul.msk.f32.gmra.mxu3 %vm519_vm1, %v2252_v53  ;;  %3518 = vmatmul.msk.f32.gmra.mxu2 %vm519_vm1, %v2257_v18  ;;  %v5519_v53 = vld [vmem:[#allocation104_spill] sm:$0xff] }
 0x24e   : > { %v2098_v62 = vadd.f32 %v5519_v53, %v1851_v55  ;;  %v5531_v53 = vld [vmem:[#allocation7_spill] sm:$0xff] }
 0x250   : > { %v2634_v52 = vpop.f32.mrf.mxu3  ;;  %v2878_v23 = vpop.f32.mrf.mxu2  ;;  %v2453_v61 = vadd.f32 %v2383_v1, %v2098_v62  ;;  %v2099_v1 = vadd.f32 %v5523_v32, %v1852_v4 }
 0x251   : > { %v2944_v6 = vadd.f32 %v2878_v23, %v2698_v54  ;;  %v1795_v10 = vpop.f32.mrf.mxu0  ;;  %v2389_v21 = vpop.f32.mrf.mxu1  ;;  %v5529_v23 = vld [vmem:[#allocation102_spill] sm:$0xff] }
 0x252   : > { %v2699_v28 = vadd.f32 %v2631_v49, %v2453_v61  ;;  %v2454_v20 = vadd.f32 %v2386_v27, %v2099_v1  ;;  %v1853_v49 = vadd.f32 %v5094_v51, %v1606_v38  ;;  %v5528_v27 = vld [vmem:[#allocation100_spill] sm:$0xff]  ;;  %v5536_v1 = vld [vmem:[#allocation106_spill] sm:$0xff] }
 0x253   : > { %3036 = vst [vmem:[%s4918_s11 + $0x60] sm:$0xff] %v2944_v6 }
 0x254   : > { %3447 = vmatmul.msk.f32.gmra.mxu1 %vm519_vm1, %v2259_v22  ;;  %3487 = vmatmul.msk.f32.gmra.mxu0 %vm519_vm1, %v5514_v17  ;;  %v2700_v59 = vadd.f32 %v2634_v52, %v2454_v20  ;;  %v2100_v56 = vadd.f32 %v5527_v31, %v1853_v49  ;;  %v5537_v49 = vld [vmem:[#allocation108_spill] sm:$0xff]  ;;  %v5540_v31 = vld [vmem:[#allocation109_spill] sm:$0xff] }
 0x255   : > { %3483 = vmatmul.msk.f32.gmra.mxu3 %vm519_vm1, %v2254_v8  ;;  %3519 = vmatmul.msk.f32.gmra.mxu2 %vm519_vm1, %v2259_v22  ;;  %v992_v8 = vadd.f32 %v4784_v16, %v749_v48  ;;  %v993_v16 = vadd.f32 %v4798_v34, %v750_v35  ;;  %v994_v34 = vadd.f32 %v4813_v37, %v751_v50  ;;  %v5535_v48 = vld [vmem:[#allocation113_spill] sm:$0xff]  ;;  %v5544_v50 = vld [vmem:[#allocation6_spill] sm:$0xff] }
 0x256   : > { %v2455_v51 = vadd.f32 %v2389_v21, %v2100_v56 }
 0x257   : > { %v1236_v60 = vadd.f32 %v5525_v63, %v992_v8  ;;  %v1237_v29 = vadd.f32 %v5529_v23, %v993_v16  ;;  %v5542_v23 = vld [vmem:[#allocation16_spill] sm:$0xff] }
 0x258   : > { %v2637_v5 = vpop.f32.mrf.mxu3  ;;  %v2881_v15 = vpop.f32.mrf.mxu2 }
 0x259   : > { %v2945_v57 = vadd.f32 %v2881_v15, %v2699_v28  ;;  %v1798_v43 = vpop.f32.mrf.mxu0  ;;  %v2392_v46 = vpop.f32.mrf.mxu1  ;;  %v1607_v40 = vadd.f32 %v5528_v27, %v1236_v60  ;;  %v2701_v55 = vadd.f32 %v2637_v5, %v2455_v51  ;;  %v1608_v21 = vadd.f32 %v5532_v7, %v1237_v29  ;;  %v5533_v28 = vld [vmem:[#allocation105_spill] sm:$0xff]  ;;  %v5538_v60 = vld [vmem:[#allocation12_spill] sm:$0xff]  ;;  %v5541_v51 = vld [vmem:[#allocation111_spill] sm:$0xff] }
 0x25a   : > { %v1238_v5 = vadd.f32 %v5533_v28, %v994_v34  ;;  %v754_v29 = vadd.f32 %v4955_v39, %v5542_v23  ;;  %v5552_v23 = vld [vmem:[#allocation11_spill] sm:$0xff] }
 0x25b   : > { %3037 = vst [vmem:[%s4918_s11 + $0x68] sm:$0xff] %v2945_v57  ;;  %v1854_v42 = vadd.f32 %v1792_v12, %v1607_v40  ;;  %v1855_v14 = vadd.f32 %v1795_v10, %v1608_v21  ;;  %v5534_v57 = vld [vmem:[#allocation78_spill] sm:$0xff]  ;;  %v5545_v21 = vld [vmem:[#allocation112_spill] sm:$0xff] }
 0x25c   : > { %v752_v47 = vadd.f32 %v4955_v39, %v5534_v57 }
 0x25d   : > { %v2101_v62 = vadd.f32 %v5531_v53, %v1854_v42  ;;  %v2102_v32 = vadd.f32 %v5535_v48, %v1855_v14 }
 0x25e   : > { %v995_v37 = vadd.f32 %v4827_v36, %v752_v47 }
 0x25f   : > { %v2456_v12 = vadd.f32 %v2392_v46, %v2101_v62  ;;  %v1609_v46 = vadd.f32 %v5536_v1, %v1238_v5  ;;  %v5547_v1 = vld [vmem:[#allocation9_spill] sm:$0xff] }
 0x260   : > { %v2640_v0 = vpop.f32.mrf.mxu3  ;;  %v2884_v18 = vpop.f32.mrf.mxu2 }
 0x261   : > { %v2946_v9 = vadd.f32 %v2884_v18, %v2700_v59  ;;  %v1801_v58 = vpop.f32.mrf.mxu0  ;;  %v2395_v17 = vpop.f32.mrf.mxu1  ;;  %v2702_v25 = vadd.f32 %v2640_v0, %v2456_v12  ;;  %v1856_v8 = vadd.f32 %v1798_v43, %v1609_v46  ;;  %v1239_v59 = vadd.f32 %v5537_v49, %v995_v37 }
 0x262   : > { %v2457_v10 = vadd.f32 %v2395_v17, %v2102_v32 }
 0x263   : > { %3038 = vst [vmem:[%s4918_s11 + $0x70] sm:$0xff] %v2946_v9  ;;  %v753_v9 = vadd.f32 %v4955_v39, %v5538_v60  ;;  %v2103_v35 = vadd.f32 %v5539_v3, %v1856_v8  ;;  %v1610_v17 = vadd.f32 %v5540_v31, %v1239_v59 }
 0x265   : > { %v996_v36 = vadd.f32 %v4842_v33, %v753_v9  ;;  %v1857_v56 = vadd.f32 %v1801_v58, %v1610_v17  ;;  %v997_v33 = vadd.f32 %v4858_v44, %v754_v29 }
 0x267   : > { %v1240_v42 = vadd.f32 %v5541_v51, %v996_v36  ;;  %v1241_v12 = vadd.f32 %v5545_v21, %v997_v33  ;;  %v5550_v36 = vld [vmem:[#allocation13_spill] sm:$0xff] }
 0x268   : > { %v2643_v54 = vpop.f32.mrf.mxu3  ;;  %v2887_v52 = vpop.f32.mrf.mxu2 }
 0x269   : > { %v2947_v13 = vadd.f32 %v2887_v52, %v2701_v55  ;;  %v1804_v6 = vpop.f32.mrf.mxu0  ;;  %v2398_v22 = vpop.f32.mrf.mxu1  ;;  %v2703_v45 = vadd.f32 %v2643_v54, %v2457_v10 }
 0x26a   : > { %v2458_v43 = vadd.f32 %v2398_v22, %v2103_v35  ;;  %v1611_v22 = vadd.f32 %v5544_v50, %v1240_v42 }
 0x26b   : > { %3039 = vst [vmem:[%s4918_s11 + $0x78] sm:$0xff] %v2947_v13  ;;  %v5543_v13 = vld [vmem:[#allocation15_spill] sm:$0xff] }
 0x26c   : > { %v2104_v2 = vadd.f32 %v5543_v13, %v1857_v56  ;;  %v1858_v53 = vadd.f32 %v1804_v6, %v1611_v22 }
 0x26e   : > { %v2105_v39 = vadd.f32 %v4763_v11, %v1858_v53 }
 0x270   : > { %v2646_v61 = vpop.f32.mrf.mxu3  ;;  %v2890_v4 = vpop.f32.mrf.mxu2 }
 0x271   : > { %v2948_v15 = vadd.f32 %v2890_v4, %v2702_v25  ;;  %v1807_v19 = vpop.f32.mrf.mxu0  ;;  %v2401_v26 = vpop.f32.mrf.mxu1  ;;  %v2704_v16 = vadd.f32 %v2646_v61, %v2458_v43  ;;  %v5546_v4 = vld [vmem:[#allocation8_spill] sm:$0xff]  ;;  %v5551_v43 = vld [vmem:[#allocation25_spill] sm:$0xff] }
 0x272   : > { %v2459_v58 = vadd.f32 %v2401_v26, %v2104_v2  ;;  %v1612_v28 = vadd.f32 %v5546_v4, %v1241_v12 }
 0x273   : > { %3040 = vst [vmem:[%s4918_s11 + $0x80] sm:$0xff] %v2948_v15 }
 0x274   : > { %v1859_v44 = vadd.f32 %v1807_v19, %v1612_v28 }
 0x276   : > { %v2106_v32 = vadd.f32 %v4780_v30, %v1859_v44 }
 0x278   : > { %v2649_v38 = vpop.f32.mrf.mxu3  ;;  %v2893_v20 = vpop.f32.mrf.mxu2 }
 0x279   : > { %v2949_v0 = vadd.f32 %v2893_v20, %v2703_v45  ;;  %v1810_v18 = vpop.f32.mrf.mxu0  ;;  %v2404_v63 = vpop.f32.mrf.mxu1  ;;  %v2705_v62 = vadd.f32 %v2649_v38, %v2459_v58  ;;  %v5548_v20 = vld [vmem:[#allocation18_spill] sm:$0xff] }
 0x27a   : > { %v2460_v5 = vadd.f32 %v2404_v63, %v2105_v39  ;;  %v1860_v46 = vadd.f32 %v1810_v18, %v5547_v1  ;;  %v5557_v1 = vld [vmem:[#allocation14_spill] sm:$0xff] }
 0x27b   : > { %3041 = vst [vmem:[%s4918_s11 + $0x88] sm:$0xff] %v2949_v0  ;;  %v5549_v0 = vld [vmem:[#allocation10_spill] sm:$0xff] }
 0x27c   : > { %v2107_v49 = vadd.f32 %v5548_v20, %v1860_v46 }
 0x280   : > { %v2652_v27 = vpop.f32.mrf.mxu3  ;;  %v2896_v40 = vpop.f32.mrf.mxu2 }
 0x281   : > { %v2950_v55 = vadd.f32 %v2896_v40, %v2704_v16  ;;  %v1813_v54 = vpop.f32.mrf.mxu0  ;;  %v2407_v52 = vpop.f32.mrf.mxu1  ;;  %v2706_v15 = vadd.f32 %v2652_v27, %v2460_v5  ;;  %v5555_v5 = vld [vmem:[#allocation23_spill] sm:$0xff] }
 0x282   : > { %v2461_v37 = vadd.f32 %v2407_v52, %v2106_v32  ;;  %v1861_v63 = vadd.f32 %v1813_v54, %v5549_v0 }
 0x283   : > { %3042 = vst [vmem:[%s4918_s11 + $0x90] sm:$0xff] %v2950_v55 }
 0x284   : > { %v2108_v31 = vadd.f32 %v5550_v36, %v1861_v63  ;;  %v5560_v63 = vld [vmem:[#allocation17_spill] sm:$0xff] }
 0x288   : > { %v2655_v34 = vpop.f32.mrf.mxu3  ;;  %v2899_v7 = vpop.f32.mrf.mxu2 }
 0x289   : > { %v2951_v14 = vadd.f32 %v2899_v7, %v2705_v62  ;;  %v1816_v25 = vpop.f32.mrf.mxu0  ;;  %v2410_v61 = vpop.f32.mrf.mxu1  ;;  %v2707_v10 = vadd.f32 %v2655_v34, %v2461_v37  ;;  %v5553_v34 = vld [vmem:[#allocation29_spill] sm:$0xff] }
 0x28a   : > { %v2462_v59 = vadd.f32 %v2410_v61, %v2107_v49  ;;  %v1862_v56 = vadd.f32 %v1816_v25, %v5551_v43  ;;  %v5554_v61 = vld [vmem:[#allocation27_spill] sm:$0xff]  ;;  %v5559_v49 = vld [vmem:[#allocation36_spill] sm:$0xff] }
 0x28b   : > { %3043 = vst [vmem:[%s4918_s11 + $0x98] sm:$0xff] %v2951_v14 }
 0x28c   : > { %v2109_v54 = vadd.f32 %v4823_v24, %v1862_v56 }
 0x290   : > { %v2658_v57 = vpop.f32.mrf.mxu3  ;;  %v2902_v6 = vpop.f32.mrf.mxu2 }
 0x291   : > { %v2952_v26 = vadd.f32 %v2902_v6, %v2706_v15  ;;  %v1819_v47 = vpop.f32.mrf.mxu0  ;;  %v2413_v48 = vpop.f32.mrf.mxu1  ;;  %v2708_v60 = vadd.f32 %v2658_v57, %v2462_v59 }
 0x292   : > { %v2463_v17 = vadd.f32 %v2413_v48, %v2108_v31  ;;  %v1863_v29 = vadd.f32 %v1819_v47, %v5552_v23  ;;  %v5556_v47 = vld [vmem:[#allocation32_spill] sm:$0xff] }
 0x293   : > { %3044 = vst [vmem:[%s4918_s11 + $0xa0] sm:$0xff] %v2952_v26 }
 0x294   : > { %v2110_v53 = vadd.f32 %v4838_v41, %v1863_v29 }
 0x298   : > { %v2661_v11 = vpop.f32.mrf.mxu3  ;;  %v2905_v8 = vpop.f32.mrf.mxu2 }
 0x299   : > { %v2953_v45 = vadd.f32 %v2905_v8, %v2707_v10  ;;  %v1822_v38 = vpop.f32.mrf.mxu0  ;;  %v2416_v19 = vpop.f32.mrf.mxu1  ;;  %v2709_v16 = vadd.f32 %v2661_v11, %v2463_v17  ;;  %v5562_v17 = vld [vmem:[#allocation26_spill] sm:$0xff] }
 0x29a   : > { %v2464_v52 = vadd.f32 %v2416_v19, %v2109_v54  ;;  %v1864_v7 = vadd.f32 %v1822_v38, %v5553_v34  ;;  %v5564_v54 = vld [vmem:[#allocation22_spill] sm:$0xff] }
 0x29b   : > { %3045 = vst [vmem:[%s4918_s11 + $0xa8] sm:$0xff] %v2953_v45  ;;  %v5558_v45 = vld [vmem:[#allocation21_spill] sm:$0xff] }
 0x29c   : > { %v2111_v39 = vadd.f32 %v5554_v61, %v1864_v7 }
 0x2a0   : > { %v2664_v9 = vpop.f32.mrf.mxu3  ;;  %v2908_v30 = vpop.f32.mrf.mxu2 }
 0x2a1   : > { %v2954_v3 = vadd.f32 %v2908_v30, %v2708_v60  ;;  %v1825_v35 = vpop.f32.mrf.mxu0  ;;  %v2419_v18 = vpop.f32.mrf.mxu1  ;;  %v2710_v13 = vadd.f32 %v2664_v9, %v2464_v52  ;;  %v5561_v30 = vld [vmem:[#allocation34_spill] sm:$0xff] }
 0x2a2   : > { %v2465_v62 = vadd.f32 %v2419_v18, %v2110_v53  ;;  %v1865_v44 = vadd.f32 %v1825_v35, %v5555_v5 }
 0x2a3   : > { %3046 = vst [vmem:[%s4918_s11 + $0xb0] sm:$0xff] %v2954_v3 }
 0x2a4   : > { %v2112_v48 = vadd.f32 %v5556_v47, %v1865_v44 }
 0x2a8   : > { %v2667_v27 = vpop.f32.mrf.mxu3  ;;  %v2911_v40 = vpop.f32.mrf.mxu2 }
 0x2a9   : > { %v2955_v51 = vadd.f32 %v2911_v40, %v2709_v16  ;;  %v1828_v42 = vpop.f32.mrf.mxu0  ;;  %v2422_v55 = vpop.f32.mrf.mxu1  ;;  %v2711_v21 = vadd.f32 %v2667_v27, %v2465_v62  ;;  %v5563_v27 = vld [vmem:[#allocation30_spill] sm:$0xff] }
 0x2aa   : > { %v2466_v28 = vadd.f32 %v2422_v55, %v2111_v39  ;;  %v1866_v46 = vadd.f32 %v1828_v42, %v5557_v1 }
 0x2ab   : > { %3047 = vst [vmem:[%s4918_s11 + $0xb8] sm:$0xff] %v2955_v51 }
 0x2ac   : > { %v2113_v59 = vadd.f32 %v5559_v49, %v1866_v46 }
 0x2b0   : > { %v2670_v2 = vpop.f32.mrf.mxu3  ;;  %v2914_v33 = vpop.f32.mrf.mxu2 }
 0x2b1   : > { %v2956_v50 = vadd.f32 %v2914_v33, %v2710_v13  ;;  %v1831_v22 = vpop.f32.mrf.mxu0  ;;  %v2425_v58 = vpop.f32.mrf.mxu1  ;;  %v2712_v15 = vadd.f32 %v2670_v2, %v2466_v28 }
 0x2b2   : > { %v2467_v32 = vadd.f32 %v2425_v58, %v2112_v48  ;;  %v1867_v3 = vadd.f32 %v1831_v22, %v5561_v30 }
 0x2b3   : > { %3048 = vst [vmem:[%s4918_s11 + $0xc0] sm:$0xff] %v2956_v50 }
 0x2b4   : > { %v2114_v40 = vadd.f32 %v5563_v27, %v1867_v3 }
 0x2b8   : > { %v2673_v24 = vpop.f32.mrf.mxu3  ;;  %v2917_v12 = vpop.f32.mrf.mxu2 }
 0x2b9   : > { %v2957_v14 = vadd.f32 %v2917_v12, %v2711_v21  ;;  %v2428_v25 = vpop.f32.mrf.mxu1  ;;  %v1834_v4 = vpop.f32.mrf.mxu0  ;;  %v2713_v10 = vadd.f32 %v2673_v24, %v2467_v32 }
 0x2ba   : > { %v1868_v38 = vadd.f32 %v1834_v4, %v5558_v45  ;;  %v2468_v0 = vadd.f32 %v2428_v25, %v2113_v59 }
 0x2bb   : > { %3049 = vst [vmem:[%s4918_s11 + $0xc8] sm:$0xff] %v2957_v14 }
 0x2bc   : > { %v1940_v60 = vadd.f32 %v5560_v63, %v1868_v38 }
 0x2c0   : > { %v2676_v57 = vpop.f32.mrf.mxu3  ;;  %v2920_v41 = vpop.f32.mrf.mxu2 }
 0x2c1   : > { %v2958_v6 = vadd.f32 %v2920_v41, %v2712_v15  ;;  %v2431_v26 = vpop.f32.mrf.mxu1  ;;  %v1837_v37 = vpop.f32.mrf.mxu0  ;;  %v2714_v35 = vadd.f32 %v2676_v57, %v2468_v0 }
 0x2c2   : > { %v1869_v43 = vadd.f32 %v1837_v37, %v5562_v17  ;;  %v2469_v55 = vadd.f32 %v2431_v26, %v2114_v40 }
 0x2c3   : > { %3050 = vst [vmem:[%s4918_s11 + $0xd0] sm:$0xff] %v2958_v6 }
 0x2c4   : > { %v1941_v52 = vadd.f32 %v5564_v54, %v1869_v43 }
 0x2c8   : > { %v2679_v11 = vpop.f32.mrf.mxu3  ;;  %v2923_v8 = vpop.f32.mrf.mxu2 }
 0x2c9   : > { %v2959_v19 = vadd.f32 %v2923_v8, %v2713_v10  ;;  %v2434_v20 = vpop.f32.mrf.mxu1  ;;  %v2781_v9 = vpop.f32.mrf.mxu0  ;;  %v2715_v23 = vadd.f32 %v2679_v11, %v2469_v55 }
 0x2ca   : > { %v2470_v18 = vadd.f32 %v2434_v20, %v1940_v60 }
 0x2cb   : > { %3051 = vst [vmem:[%s4918_s11 + $0xd8] sm:$0xff] %v2959_v19 }
 0x2d0   : > { %v2682_v36 = vpop.f32.mrf.mxu3  ;;  %v2926_v31 = vpop.f32.mrf.mxu2 }
 0x2d1   : > { %v2716_v56 = vadd.f32 %v2682_v36, %v2470_v18  ;;  %v2960_v16 = vadd.f32 %v2926_v31, %v2714_v35  ;;  %v2437_v42 = vpop.f32.mrf.mxu1  ;;  %v2784_v13 = vpop.f32.mrf.mxu0 }
 0x2d2   : > { %v2471_v29 = vadd.f32 %v2437_v42, %v1941_v52 }
 0x2d3   : > { %3052 = vst [vmem:[%s4918_s11 + $0xe0] sm:$0xff] %v2960_v16  ;;  %v2787_v51 = vadd.f32 %v2781_v9, %v2716_v56 }
 0x2d5   : > { %3054 = vst [vmem:[%s4918_s11 + $0xf0] sm:$0xff] %v2787_v51 }
 0x2d8   : > { %v2685_v2 = vpop.f32.mrf.mxu3  ;;  %v2929_v33 = vpop.f32.mrf.mxu2 }
 0x2d9   : > { %v2717_v50 = vadd.f32 %v2685_v2, %v2471_v29  ;;  %v2961_v22 = vadd.f32 %v2929_v33, %v2715_v23 }
 0x2db   : > { %3053 = vst [vmem:[%s4918_s11 + $0xe8] sm:$0xff] %v2961_v22  ;;  %v2788_v58 = vadd.f32 %v2784_v13, %v2717_v50 }
 0x2dd   : > { %3055 = vst [vmem:[%s4918_s11 + $0xf8] sm:$0xff] %v2788_v58 }
 0x2de   : > { %3631 = shalt.err (!%p3628_p5)
}
 0x2df   : > { %s3685_s9 = smov 128   ;;  %s3686_s11 = smov 8  }
 0x2e0   : > { %3532 = dma.vmem_to_hbm [thread:$0]  (%p3757_p4), %s3073_s1, 4096, %s3075_s17, %s3057_s22, %s3685_s9, %s3685_s9, %s3686_s11  }
 0x2e1 PF: > { %p3538_p6 = scmp.ge.s32.totalorder %s3682_s21, 2  ;;  %s3089_s12 = sand.u32 1, %s3662_s18  }
 0x2e2   : > { %s3090_s13 = scalar_lea.sflag [#allocation4], %s3089_s12 }
 0x2e3   : > { %p3535_p7 = pnand %p3538_p6, %p3764_p8 }
 0x2e5   : > { %p3536_p9 = pneg %p3535_p7 }
 0x2e7   : > { %3657 = dma.done.wait (%p3536_p9), %s3090_s13, 4096  }
 0x2e8   : > { %3659 = vsyncadd (%p3536_p9), %s3090_s13, 4294963200  ;;  %s18_s21 = sadd.s32 1, %s3682_s21   ;;  %s5565_s18 = smov %s3666_s19 }
 0x2e9   : > { %p15_p10 = scmp.ge.s32.totalorder %s18_s21, 4   ;;  %s5566_s19 = smov %s3670_s20 }
 0x2ea   : > { %s5567_s20 = smov %s3770_s29  ;;  %s5568_s1 = smov %s3678_s2 }
 0x2eb   : > { %s5569_s2 = smov %s5571_s24  ;;  %17 = sbr.rel (!%p15_p10) target bundleno = 4 (0x4), region = 91 }
 0x2f0   :  { %3096 = vsyncpa [#allocation4], 1 }
 0x2f1   :  { %3098 = vsyncpa [#allocation4 + $0x1], 1 }

</bundles_post_ra>
